<compile_context>
chip_gen: v6e
topology: v6e:2x2x1
jax: 0.10.0
libtpu: 0.0.40
codegen_flags: <defaults>
</compile_context>

<pallas_src>
import functools

import jax
import jax.numpy as jnp
import numpy as np
from jax import lax
from jax.experimental import pallas as pl
from jax.experimental.pallas import tpu as pltpu


# --------------------------------------------------------------------------
# Kernel: one grid step processes G graphs stacked along the sublane axis.
# --------------------------------------------------------------------------
def graphblock_kernel(x_ref, a_ref, wg_ref, w1_ref, w2_ref, pe_ref, b1_ref,
                      o_ref, *, g, n_pad, n_valid, eps=1e-5):
    f32 = jnp.float32
    bf16 = jnp.bfloat16

    x = x_ref[...]                                   # [G*n_pad, Ep] f32
    e_p = x.shape[-1]
    inv_n = f32(1.0 / n_valid)

    # Row mask only if the per-graph node axis was padded (padded rows must not
    # contaminate the per-graph BatchNorm statistics).
    if n_valid == n_pad:
        mask = None
    else:
        rows = lax.broadcasted_iota(jnp.int32, (g, n_pad, 1), 1)
        mask = (rows < n_valid).astype(f32)

    # Packed E-wide parameters: rows 0..4 of pe_ref.
    b_gcn = pe_ref[0:1, :]
    g1, be1 = pe_ref[1:2, :], pe_ref[2:3, :]
    g2, be2 = pe_ref[3:4, :], pe_ref[4:5, :]

    def bn(h, gamma, beta):
        # Per-graph, training-mode (biased) batch stats in one pass.
        # Sublane split on an 8-aligned boundary -> cheap layout-preserving
        # reshape; reduction over the per-graph node axis.
        hg = h.reshape(g, n_pad, e_p)
        hm = hg if mask is None else hg * mask
        s1 = jnp.sum(hm, axis=1, keepdims=True)          # [G,1,Ep]
        s2 = jnp.sum(hm * hm, axis=1, keepdims=True)     # [G,1,Ep]
        mu = s1 * inv_n
        var = jnp.maximum(s2 * inv_n - mu * mu, 0.0)
        # Folded normalization: h*scale + shift (2 VPU ops/element).
        scale = gamma * lax.rsqrt(var + eps)             # [G,1,Ep]
        shift = beta - mu * scale                        # [G,1,Ep]
        return (hg * scale + shift).reshape(g * n_pad, e_p)

    # ---- mixer (GCN): h = A_blockdiag @ X_stack @ W + b (bf16 MXU, f32 acc) --
    ax = jnp.dot(a_ref[...], x.astype(bf16), preferred_element_type=f32)
    h = jnp.dot(ax.astype(bf16), wg_ref[...], preferred_element_type=f32) + b_gcn

    # ---- residual + bn1 ----
    h = bn(h + x, g1, be1)

    # ---- feed-forward: Linear(E, M*E) -> ReLU -> Linear(M*E, E, bias=False) --
    f = jnp.dot(h.astype(bf16), w1_ref[...], preferred_element_type=f32) + b1_ref[...]
    f = jnp.maximum(f, 0.0)
    f = jnp.dot(f.astype(bf16), w2_ref[...], preferred_element_type=f32)

    # ---- residual + bn2 (lane-dense full-vreg store) ----
    o_ref[...] = bn(f + h, g2, be2).astype(o_ref.dtype)


# --------------------------------------------------------------------------
# One-time operand preparation (hoisted out of the per-call wrapper).
# --------------------------------------------------------------------------
def _round_up(v, m):
    return (v + m - 1) // m * m


def _pad_to(arr, shape):
    pads = [(0, t - s) for s, t in zip(arr.shape, shape)]
    return jnp.pad(arr, pads)


def prepare_graphblock(params, a_norm, *, n, graphs_per_step):
    """Pads/casts/packs all grid-invariant operands once (weights in bf16,
    block-diagonal adjacency for `graphs_per_step` graphs stacked along the
    sublane axis, and the five E-wide vectors packed into one (8, Ep) slab)."""
    e = params["w_gcn"].shape[0]
    hidden = params["w1"].shape[1]
    g = graphs_per_step

    n_p = _round_up(n, 8)          # sublane alignment per graph
    e_p = _round_up(e, 128)        # lane-dense embedding axis
    h_p = _round_up(hidden, 128)   # lane-dense FF hidden axis

    a_pad = _pad_to(a_norm.astype(jnp.float32), (n_p, n_p))
    # Block-diagonal adjacency: G copies of A on the diagonal (bf16, tiny).
    a_blk = jnp.kron(jnp.eye(g, dtype=jnp.float32), a_pad).astype(jnp.bfloat16)

    wg = _pad_to(params["w_gcn"], (e_p, e_p)).astype(jnp.bfloat16)
    w1 = _pad_to(params["w1"], (e_p, h_p)).astype(jnp.bfloat16)
    w2 = _pad_to(params["w2"], (h_p, e_p)).astype(jnp.bfloat16)
    b1 = _pad_to(params["b1"].reshape(1, -1), (1, h_p)).astype(jnp.float32)

    pe = jnp.zeros((8, e_p), jnp.float32)
    pe = pe.at[0, :e].set(params["b_gcn"].reshape(-1))
    pe = pe.at[1, :e].set(params["bn1_gamma"].reshape(-1))
    pe = pe.at[2, :e].set(params["bn1_beta"].reshape(-1))
    pe = pe.at[3, :e].set(params["bn2_gamma"].reshape(-1))
    pe = pe.at[4, :e].set(params["bn2_beta"].reshape(-1))

    return dict(a_blk=a_blk, wg=wg, w1=w1, w2=w2, b1=b1, pe=pe,
                n=n, n_p=n_p, e=e, e_p=e_p, h_p=h_p, g=g)


# --------------------------------------------------------------------------
# Forward wrapper
# --------------------------------------------------------------------------
def graph_block(x, prep):
    """GraphBlock forward.  x: [N, E] (one graph) or [B, N, E] (batch of graphs
    sharing adjacency/params; G = prep['g'] graphs per grid step)."""
    single = (x.ndim == 2)
    if single:
        x = x[None]
    b, n, e = x.shape
    if n != prep["n"] or e != prep["e"]:
        raise ValueError("shape mismatch with prepared operands")

    g, n_p, e_p, h_p = prep["g"], prep["n_p"], prep["e_p"], prep["h_p"]
    b_pad = _round_up(b, g)
    steps = b_pad // g
    m = g * n_p                      # stacked sublane rows per grid step

    xp = jnp.pad(x.astype(jnp.float32),
                 ((0, b_pad - b), (0, n_p - n), (0, e_p - e)))
    xp = xp.reshape(steps, m, e_p)

    kernel = functools.partial(graphblock_kernel, g=g, n_pad=n_p, n_valid=n)

    out = pl.pallas_call(
        kernel,
        out_shape=jax.ShapeDtypeStruct((steps, m, e_p), jnp.float32),
        grid=(steps,),
        in_specs=[
            pl.BlockSpec((None, m, e_p), lambda i: (i, 0, 0)),   # x (G graphs/step)
            pl.BlockSpec((m, m), lambda i: (0, 0)),              # block-diag A (bf16)
            pl.BlockSpec((e_p, e_p), lambda i: (0, 0)),          # W_gcn (bf16)
            pl.BlockSpec((e_p, h_p), lambda i: (0, 0)),          # W1 (bf16)
            pl.BlockSpec((h_p, e_p), lambda i: (0, 0)),          # W2 (bf16)
            pl.BlockSpec((8, e_p), lambda i: (0, 0)),            # packed E-wide params
            pl.BlockSpec((1, h_p), lambda i: (0, 0)),            # b1
        ],
        out_specs=pl.BlockSpec((None, m, e_p), lambda i: (i, 0, 0)),
        # Default scoped-VMEM limit is ample here (blocks total ~1.5 MiB);
        # derive a real vmem_limit_bytes from block sizes only when tiles grow.
        compiler_params=pltpu.CompilerParams(
            dimension_semantics=("parallel",),
        ),
    )(xp, prep["a_blk"], prep["wg"], prep["w1"], prep["w2"], prep["pe"],
      prep["b1"])

    out = out.reshape(b_pad, n_p, e_p)[:b, :n, :e]
    return out[0] if single else out


# --------------------------------------------------------------------------
# Glue: graph construction, params, pure-JAX reference
# --------------------------------------------------------------------------
def build_norm_adjacency(edges, n):
    """Dense symmetrically normalized adjacency with self loops (plain JAX glue)."""
    a = jnp.zeros((n, n), jnp.float32)
    a = a.at[edges[:, 0], edges[:, 1]].set(1.0)
    a = a.at[edges[:, 1], edges[:, 0]].set(1.0)
    a = jnp.maximum(a, jnp.eye(n, dtype=jnp.float32))   # self loops
    deg = jnp.sum(a, axis=1)
    dinv = lax.rsqrt(deg)
    return a * dinv[:, None] * dinv[None, :]


def init_params(key, emb, mult):
    ks = jax.random.split(key, 4)
    hidden = mult * emb
    s_g = 1.0 / jnp.sqrt(emb)
    s_1 = 1.0 / jnp.sqrt(emb)
    s_2 = 1.0 / jnp.sqrt(hidden)
    return {
        "w_gcn": jax.random.uniform(ks[0], (emb, emb), jnp.float32, -s_g, s_g),
        "b_gcn": jnp.zeros((1, emb), jnp.float32),
        "bn1_gamma": jnp.ones((1, emb), jnp.float32),
        "bn1_beta": jnp.zeros((1, emb), jnp.float32),
        "w1": jax.random.uniform(ks[1], (emb, hidden), jnp.float32, -s_1, s_1),
        "b1": jax.random.uniform(ks[2], (1, hidden), jnp.float32, -s_1, s_1),
        "w2": jax.random.uniform(ks[3], (hidden, emb), jnp.float32, -s_2, s_2),
        "bn2_gamma": jnp.ones((1, emb), jnp.float32),
        "bn2_beta": jnp.zeros((1, emb), jnp.float32),
    }


def reference_forward(x, a_norm, params, eps=1e-5):
    def bn(h, g, b):
        mu = jnp.mean(h, axis=0, keepdims=True)
        var = jnp.mean((h - mu) ** 2, axis=0, keepdims=True)
        return (h - mu) * lax.rsqrt(var + eps) * g + b

    h = a_norm @ x @ params["w_gcn"] + params["b_gcn"]
    h = bn(h + x, params["bn1_gamma"], params["bn1_beta"])
    f = jnp.maximum(h @ params["w1"] + params["b1"], 0.0)
    f = f @ params["w2"]
    return bn(f + h, params["bn2_gamma"], params["bn2_beta"])


# --------------------------------------------------------------------------
if __name__ == "__main__":
    key = jax.random.PRNGKey(0)
    k_x, k_p = jax.random.split(key)

    n = 32          # nodes per graph
    emb = 128       # embedding width: multiple of 128 -> lane-dense, no padding
    mult = 4        # FF expansion (hidden = 512)
    batch = 16      # graphs in the batch (shared adjacency / weights)
    g_per_step = 8  # graphs per grid step -> 256 LHS rows, grid = (2,) parallel

    # deterministic ring + chord edge list
    idx = jnp.arange(n)
    ring = jnp.stack([idx, (idx + 1) % n], axis=1)
    chord = jnp.stack([idx, (idx + 5) % n], axis=1)
    edges = jnp.concatenate([ring, chord], axis=0).astype(jnp.int32)

    a_norm = build_norm_adjacency(edges, n)
    x = jax.random.normal(k_x, (batch, n, emb), jnp.float32)
    params = init_params(k_p, emb, mult)

    # One-time operand packing (hoisted out of the per-call path), then a
    # jitted forward that only pads/reshapes x and runs the Pallas kernel.
    prep = prepare_graphblock(params, a_norm, n=n, graphs_per_step=g_per_step)
    fwd = jax.jit(functools.partial(graph_block, prep=prep))

    out = fwd(x)
    jax.block_until_ready(out)
    assert out.shape == (batch, n, emb)

    # Tolerance check against a pure-f32 JAX reference (kernel uses bf16 MXU
    # operands with f32 accumulation, so allow bf16-level tolerance).
    ref = jax.vmap(lambda xb: reference_forward(xb, a_norm, params))(x)
    np.testing.assert_allclose(np.asarray(out), np.asarray(ref),
                               atol=0.08, rtol=0.0)

    print("KERNEL_OK")
</pallas_src>

<mosaic_0001>
module attributes {stable_mosaic.version = 11 : i64} {
  func.func @graphblock_kernel(%arg0: i32, %arg1: memref<1x256x128xf32, #tpu.memory_space<vmem>>, %arg2: memref<256x256xbf16, #tpu.memory_space<vmem>>, %arg3: memref<128x128xbf16, #tpu.memory_space<vmem>>, %arg4: memref<128x512xbf16, #tpu.memory_space<vmem>>, %arg5: memref<512x128xbf16, #tpu.memory_space<vmem>>, %arg6: memref<8x128xf32, #tpu.memory_space<vmem>>, %arg7: memref<1x512xf32, #tpu.memory_space<vmem>>, %arg8: memref<1x256x128xf32, #tpu.memory_space<vmem>>) attributes {dimension_semantics = [#tpu.dimension_semantics<parallel>], iteration_bounds = array<i64: 2>, scalar_prefetch = 0 : i64, scratch_operands = 0 : i64, tpu.core_type = #tpu.core_type<tc>, window_params = [{transform_indices = @transform_0, window_bounds = array<i64: 1, 256, 128>}, {pipeline_mode = #tpu.pipeline_mode<synchronous>, transform_indices = @transform_1, window_bounds = array<i64: 256, 256>}, {pipeline_mode = #tpu.pipeline_mode<synchronous>, transform_indices = @transform_2, window_bounds = array<i64: 128, 128>}, {pipeline_mode = #tpu.pipeline_mode<synchronous>, transform_indices = @transform_3, window_bounds = array<i64: 128, 512>}, {pipeline_mode = #tpu.pipeline_mode<synchronous>, transform_indices = @transform_4, window_bounds = array<i64: 512, 128>}, {pipeline_mode = #tpu.pipeline_mode<synchronous>, transform_indices = @transform_5, window_bounds = array<i64: 8, 128>}, {pipeline_mode = #tpu.pipeline_mode<synchronous>, transform_indices = @transform_6, window_bounds = array<i64: 1, 512>}, {transform_indices = @transform_7, window_bounds = array<i64: 1, 256, 128>}]} {
    %c0 = arith.constant 0 : index
    %c0_0 = arith.constant 0 : index
    %c0_1 = arith.constant 0 : index
    %0 = vector.load %arg1[%c0, %c0_0, %c0_1] : memref<1x256x128xf32, #tpu.memory_space<vmem>>, vector<1x256x128xf32>
    %1 = vector.shape_cast %0 : vector<1x256x128xf32> to vector<256x128xf32>
    %c0_2 = arith.constant 0 : index
    %c0_3 = arith.constant 0 : index
    %2 = vector.load %arg6[%c0_2, %c0_3] : memref<8x128xf32, #tpu.memory_space<vmem>>, vector<1x128xf32>
    %c1 = arith.constant 1 : index
    %c0_4 = arith.constant 0 : index
    %3 = vector.load %arg6[%c1, %c0_4] : memref<8x128xf32, #tpu.memory_space<vmem>>, vector<1x128xf32>
    %c2 = arith.constant 2 : index
    %c0_5 = arith.constant 0 : index
    %4 = vector.load %arg6[%c2, %c0_5] : memref<8x128xf32, #tpu.memory_space<vmem>>, vector<1x128xf32>
    %c3 = arith.constant 3 : index
    %c0_6 = arith.constant 0 : index
    %5 = vector.load %arg6[%c3, %c0_6] : memref<8x128xf32, #tpu.memory_space<vmem>>, vector<1x128xf32>
    %c4 = arith.constant 4 : index
    %c0_7 = arith.constant 0 : index
    %6 = vector.load %arg6[%c4, %c0_7] : memref<8x128xf32, #tpu.memory_space<vmem>>, vector<1x128xf32>
    %c0_8 = arith.constant 0 : index
    %c0_9 = arith.constant 0 : index
    %7 = vector.load %arg2[%c0_8, %c0_9] : memref<256x256xbf16, #tpu.memory_space<vmem>>, vector<256x256xbf16>
    %8 = arith.truncf %1 : vector<256x128xf32> to vector<256x128xbf16>
    %cst = arith.constant dense<0.000000e+00> : vector<256x128xf32>
    %9 = tpu.matmul %7, %8, %cst {dimension_numbers = #tpu.dot_dimension_numbers<[1], [0], [0], [1], [0, 0, 1, 1], [], []>} : vector<256x256xbf16>, vector<256x128xbf16>, vector<256x128xf32> -> vector<256x128xf32>
    %10 = arith.truncf %9 : vector<256x128xf32> to vector<256x128xbf16>
    %c0_10 = arith.constant 0 : index
    %c0_11 = arith.constant 0 : index
    %11 = vector.load %arg3[%c0_10, %c0_11] : memref<128x128xbf16, #tpu.memory_space<vmem>>, vector<128x128xbf16>
    %cst_12 = arith.constant dense<0.000000e+00> : vector<256x128xf32>
    %12 = tpu.matmul %10, %11, %cst_12 {dimension_numbers = #tpu.dot_dimension_numbers<[1], [0], [0], [1], [0, 0, 1, 1], [], []>} : vector<256x128xbf16>, vector<128x128xbf16>, vector<256x128xf32> -> vector<256x128xf32>
    %13 = vector.broadcast %2 : vector<1x128xf32> to vector<256x128xf32>
    %14 = arith.addf %12, %13 : vector<256x128xf32>
    %15 = arith.addf %14, %1 : vector<256x128xf32>
    %16 = vector.shape_cast %15 : vector<256x128xf32> to vector<8x32x128xf32>
    %cst_13 = arith.constant dense<0.000000e+00> : vector<8x128xf32>
    %17 = vector.multi_reduction <add>, %16, %cst_13 [1] : vector<8x32x128xf32> to vector<8x128xf32>
    %18 = vector.shape_cast %17 : vector<8x128xf32> to vector<8x1x128xf32>
    %19 = arith.mulf %16, %16 : vector<8x32x128xf32>
    %cst_14 = arith.constant dense<0.000000e+00> : vector<8x128xf32>
    %20 = vector.multi_reduction <add>, %19, %cst_14 [1] : vector<8x32x128xf32> to vector<8x128xf32>
    %21 = vector.shape_cast %20 : vector<8x128xf32> to vector<8x1x128xf32>
    %cst_15 = arith.constant 3.125000e-02 : f32
    %22 = vector.broadcast %cst_15 : f32 to vector<8x1x128xf32>
    %23 = arith.mulf %18, %22 : vector<8x1x128xf32>
    %cst_16 = arith.constant 3.125000e-02 : f32
    %24 = vector.broadcast %cst_16 : f32 to vector<8x1x128xf32>
    %25 = arith.mulf %21, %24 : vector<8x1x128xf32>
    %26 = arith.mulf %23, %23 : vector<8x1x128xf32>
    %27 = arith.subf %25, %26 : vector<8x1x128xf32>
    %cst_17 = arith.constant 0.000000e+00 : f32
    %28 = vector.broadcast %cst_17 : f32 to vector<8x1x128xf32>
    %29 = arith.maximumf %27, %28 : vector<8x1x128xf32>
    %cst_18 = arith.constant 9.99999974E-6 : f32
    %30 = vector.broadcast %cst_18 : f32 to vector<8x1x128xf32>
    %31 = arith.addf %29, %30 : vector<8x1x128xf32>
    %32 = math.rsqrt %31 : vector<8x1x128xf32>
    %33 = vector.shape_cast %3 : vector<1x128xf32> to vector<1x1x128xf32>
    %34 = vector.broadcast %33 : vector<1x1x128xf32> to vector<8x1x128xf32>
    %35 = arith.mulf %34, %32 : vector<8x1x128xf32>
    %36 = arith.mulf %23, %35 : vector<8x1x128xf32>
    %37 = vector.shape_cast %4 : vector<1x128xf32> to vector<1x1x128xf32>
    %38 = vector.broadcast %37 : vector<1x1x128xf32> to vector<8x1x128xf32>
    %39 = arith.subf %38, %36 : vector<8x1x128xf32>
    %40 = vector.broadcast %35 : vector<8x1x128xf32> to vector<8x32x128xf32>
    %41 = arith.mulf %16, %40 : vector<8x32x128xf32>
    %42 = vector.broadcast %39 : vector<8x1x128xf32> to vector<8x32x128xf32>
    %43 = arith.addf %41, %42 : vector<8x32x128xf32>
    %44 = vector.shape_cast %43 : vector<8x32x128xf32> to vector<256x128xf32>
    %45 = arith.truncf %44 : vector<256x128xf32> to vector<256x128xbf16>
    %c0_19 = arith.constant 0 : index
    %c0_20 = arith.constant 0 : index
    %46 = vector.load %arg4[%c0_19, %c0_20] : memref<128x512xbf16, #tpu.memory_space<vmem>>, vector<128x512xbf16>
    %cst_21 = arith.constant dense<0.000000e+00> : vector<256x512xf32>
    %47 = tpu.matmul %45, %46, %cst_21 {dimension_numbers = #tpu.dot_dimension_numbers<[1], [0], [0], [1], [0, 0, 1, 1], [], []>} : vector<256x128xbf16>, vector<128x512xbf16>, vector<256x512xf32> -> vector<256x512xf32>
    %c0_22 = arith.constant 0 : index
    %c0_23 = arith.constant 0 : index
    %48 = vector.load %arg7[%c0_22, %c0_23] : memref<1x512xf32, #tpu.memory_space<vmem>>, vector<1x512xf32>
    %49 = vector.broadcast %48 : vector<1x512xf32> to vector<256x512xf32>
    %50 = arith.addf %47, %49 : vector<256x512xf32>
    %cst_24 = arith.constant 0.000000e+00 : f32
    %51 = vector.broadcast %cst_24 : f32 to vector<256x512xf32>
    %52 = arith.maximumf %50, %51 : vector<256x512xf32>
    %53 = arith.truncf %52 : vector<256x512xf32> to vector<256x512xbf16>
    %c0_25 = arith.constant 0 : index
    %c0_26 = arith.constant 0 : index
    %54 = vector.load %arg5[%c0_25, %c0_26] : memref<512x128xbf16, #tpu.memory_space<vmem>>, vector<512x128xbf16>
    %cst_27 = arith.constant dense<0.000000e+00> : vector<256x128xf32>
    %55 = tpu.matmul %53, %54, %cst_27 {dimension_numbers = #tpu.dot_dimension_numbers<[1], [0], [0], [1], [0, 0, 1, 1], [], []>} : vector<256x512xbf16>, vector<512x128xbf16>, vector<256x128xf32> -> vector<256x128xf32>
    %56 = arith.addf %55, %44 : vector<256x128xf32>
    %57 = vector.shape_cast %56 : vector<256x128xf32> to vector<8x32x128xf32>
    %cst_28 = arith.constant dense<0.000000e+00> : vector<8x128xf32>
    %58 = vector.multi_reduction <add>, %57, %cst_28 [1] : vector<8x32x128xf32> to vector<8x128xf32>
    %59 = vector.shape_cast %58 : vector<8x128xf32> to vector<8x1x128xf32>
    %60 = arith.mulf %57, %57 : vector<8x32x128xf32>
    %cst_29 = arith.constant dense<0.000000e+00> : vector<8x128xf32>
    %61 = vector.multi_reduction <add>, %60, %cst_29 [1] : vector<8x32x128xf32> to vector<8x128xf32>
    %62 = vector.shape_cast %61 : vector<8x128xf32> to vector<8x1x128xf32>
    %cst_30 = arith.constant 3.125000e-02 : f32
    %63 = vector.broadcast %cst_30 : f32 to vector<8x1x128xf32>
    %64 = arith.mulf %59, %63 : vector<8x1x128xf32>
    %cst_31 = arith.constant 3.125000e-02 : f32
    %65 = vector.broadcast %cst_31 : f32 to vector<8x1x128xf32>
    %66 = arith.mulf %62, %65 : vector<8x1x128xf32>
    %67 = arith.mulf %64, %64 : vector<8x1x128xf32>
    %68 = arith.subf %66, %67 : vector<8x1x128xf32>
    %cst_32 = arith.constant 0.000000e+00 : f32
    %69 = vector.broadcast %cst_32 : f32 to vector<8x1x128xf32>
    %70 = arith.maximumf %68, %69 : vector<8x1x128xf32>
    %cst_33 = arith.constant 9.99999974E-6 : f32
    %71 = vector.broadcast %cst_33 : f32 to vector<8x1x128xf32>
    %72 = arith.addf %70, %71 : vector<8x1x128xf32>
    %73 = math.rsqrt %72 : vector<8x1x128xf32>
    %74 = vector.shape_cast %5 : vector<1x128xf32> to vector<1x1x128xf32>
    %75 = vector.broadcast %74 : vector<1x1x128xf32> to vector<8x1x128xf32>
    %76 = arith.mulf %75, %73 : vector<8x1x128xf32>
    %77 = arith.mulf %64, %76 : vector<8x1x128xf32>
    %78 = vector.shape_cast %6 : vector<1x128xf32> to vector<1x1x128xf32>
    %79 = vector.broadcast %78 : vector<1x1x128xf32> to vector<8x1x128xf32>
    %80 = arith.subf %79, %77 : vector<8x1x128xf32>
    %81 = vector.broadcast %76 : vector<8x1x128xf32> to vector<8x32x128xf32>
    %82 = arith.mulf %57, %81 : vector<8x32x128xf32>
    %83 = vector.broadcast %80 : vector<8x1x128xf32> to vector<8x32x128xf32>
    %84 = arith.addf %82, %83 : vector<8x32x128xf32>
    %85 = vector.shape_cast %84 : vector<8x32x128xf32> to vector<256x128xf32>
    %c0_34 = arith.constant 0 : index
    %c0_35 = arith.constant 0 : index
    %c0_36 = arith.constant 0 : index
    %86 = vector.load %arg8[%c0_34, %c0_35, %c0_36] : memref<1x256x128xf32, #tpu.memory_space<vmem>>, vector<1x256x128xf32>
    %87 = vector.shape_cast %86 : vector<1x256x128xf32> to vector<256x128xf32>
    %88 = vector.shape_cast %85 : vector<256x128xf32> to vector<1x256x128xf32>
    tpu.vector_store %arg8[%c0_34, %c0_35, %c0_36], %88 {strides = array<i32>} : memref<1x256x128xf32, #tpu.memory_space<vmem>>, vector<1x256x128xf32>,
    return
  }
  func.func @transform_0(%arg0: i32) -> (i32, i32, i32) {
    %c0_i32 = arith.constant 0 : i32
    %c0_i32_0 = arith.constant 0 : i32
    %c0_i32_1 = arith.constant 0 : i32
    return %arg0, %c0_i32, %c0_i32_0 : i32, i32, i32
  }
  func.func @transform_1(%arg0: i32) -> (i32, i32) {
    %c0_i32 = arith.constant 0 : i32
    %c0_i32_0 = arith.constant 0 : i32
    %c0_i32_1 = arith.constant 0 : i32
    return %c0_i32, %c0_i32_0 : i32, i32
  }
  func.func @transform_2(%arg0: i32) -> (i32, i32) {
    %c0_i32 = arith.constant 0 : i32
    %c0_i32_0 = arith.constant 0 : i32
    %c0_i32_1 = arith.constant 0 : i32
    return %c0_i32, %c0_i32_0 : i32, i32
  }
  func.func @transform_3(%arg0: i32) -> (i32, i32) {
    %c0_i32 = arith.constant 0 : i32
    %c0_i32_0 = arith.constant 0 : i32
    %c0_i32_1 = arith.constant 0 : i32
    return %c0_i32, %c0_i32_0 : i32, i32
  }
  func.func @transform_4(%arg0: i32) -> (i32, i32) {
    %c0_i32 = arith.constant 0 : i32
    %c0_i32_0 = arith.constant 0 : i32
    %c0_i32_1 = arith.constant 0 : i32
    return %c0_i32, %c0_i32_0 : i32, i32
  }
  func.func @transform_5(%arg0: i32) -> (i32, i32) {
    %c0_i32 = arith.constant 0 : i32
    %c0_i32_0 = arith.constant 0 : i32
    %c0_i32_1 = arith.constant 0 : i32
    return %c0_i32, %c0_i32_0 : i32, i32
  }
  func.func @transform_6(%arg0: i32) -> (i32, i32) {
    %c0_i32 = arith.constant 0 : i32
    %c0_i32_0 = arith.constant 0 : i32
    %c0_i32_1 = arith.constant 0 : i32
    return %c0_i32, %c0_i32_0 : i32, i32
  }
  func.func @transform_7(%arg0: i32) -> (i32, i32, i32) {
    %c0_i32 = arith.constant 0 : i32
    %c0_i32_0 = arith.constant 0 : i32
    %c0_i32_1 = arith.constant 0 : i32
    return %arg0, %c0_i32, %c0_i32_0 : i32, i32, i32
  }
}

</mosaic_0001>

<bundles_post_ra>
// kernel: graph_block.1
= control target key start
LH: loop header
LB: loop body
LE: loop exit
PB: predicated region body
PF: predicated region fallthrough
CT: control target
= control target key end

     0   :  { %s5696_s0 = inlined_call_operand.hbm [shape: f32[2,256,128], index: 0, kind: input, shape index: {}]   ;;  %s5697_s1 = inlined_call_operand.hbm [shape: bf16[256,256], index: 1, kind: input, shape index: {}]   ;;  %s5698_s2 = inlined_call_operand.hbm [shape: bf16[128,128], index: 2, kind: input, shape index: {}]   ;;  %s5699_s3 = inlined_call_operand.hbm [shape: bf16[128,512], index: 3, kind: input, shape index: {}]   ;;  %s5700_s4 = inlined_call_operand.hbm [shape: bf16[512,128], index: 4, kind: input, shape index: {}]   ;;  %s5701_s5 = inlined_call_operand.vmem [shape: f32[8,128], index: 5, kind: input, shape index: {}]   ;;  %s5702_s6 = inlined_call_operand.vmem [shape: f32[1,512], index: 6, kind: input, shape index: {}]   ;;  %s5703_s7 = inlined_call_operand.hbm [shape: f32[2,256,128], index: 7, kind: output, shape index: {}]  }
   0x1   :  { %5712 = sst [smem:[#allocation16_spill]] %s5697_s1 }
   0x2   :  { %12 = vsyncpa [#allocation3], 0 }
   0x3   :  { %14 = vsyncpa [#allocation3 + $0x1], 0 }
   0x4   :  { %15 = vsyncpa [#allocation6], 0 }
   0x5   :  { %16 = vsyncpa [#allocation9], 0 }
   0x6   :  { %17 = vsyncpa [#allocation4], 0 }
   0x7   :  { %19 = vsyncpa [#allocation4 + $0x1], 0  ;;  %s4452_s24 = smov 0   ;;  %s4454_s25 = smov 0  }
   0x8   :  { %s4456_s26 = smov 0   ;;  %s4458_s27 = smov 0  }
   0x9 LB: > { %s4473_s28 = sadd.s32 4294967295, %s4395_s27   ;;  %s3350_s29 = sadd.s32 4294967294, %s4395_s27   ;;  %s4395_s27 = sphi %s4458_s27, %s5735_s27   ;;  %s4391_s26 = sphi %s4456_s26, %s5734_s26   ;;  %s4387_s25 = sphi %s4454_s25, %s5733_s25   ;;  %s4383_s24 = sphi %s4452_s24, %s5732_s24  }
   0xa   : > { %p45_p0 = scmp.ne.s32.totalorder %s4387_s25, %s4383_s24  ;;  %p5705_p1 = scmp.eq.s32.totalorder %s4473_s28, 0 }
   0xb   : > { %p195_p2 = scmp.eq.s32.totalorder %s4473_s28, 1  ;;  %p201_p3 = scmp.eq.s32.totalorder %s3350_s29, 1 }
   0xc   : > { %p4482_p4 = por %p5705_p1, %p45_p0  ;;  %p3351_p5 = scmp.ge.s32.totalorder %s4395_s27, 1 }
   0xd   : > { %p4487_p6 = por %p201_p3, %p45_p0  ;;  %p208_p7 = scmp.lt.s32.totalorder %s4395_s27, 3 }
   0xe   : > { %s5713_s30 = scalar_select %p4482_p4, 1, 0 }
   0xf   : > { %s5714_s8 = scalar_select %p4487_p6, 1, 0 }
  0x10   : > { %p4492_p8 = pnand %p3351_p5, %p208_p7  ;;  %s4397_s10 = smov [#allocation5]  }
  0x11   : > { %s220_s11 = sshll.u32 %s4397_s10, 4  ;;  %s4398_s13 = smov [#allocation8]   ;;  %s221_s11 = int_to_ptr.vmem [resolvable:$true] %s220_s11 }
  0x12   : > { %s5715_s9 = scalar_select %p4492_p8, 1, 0 }
  0x13   : > { %p3923_p9 = pneg %p4492_p8  ;;  %s246_s14 = sshll.u32 %s4398_s13, 4  ;;  %s247_s14 = int_to_ptr.vmem [resolvable:$true] %s246_s14 }
  0x14   : > { %s4202_s15 = scalar_lea.vmem %s221_s11, 4096  ;;  %p4210_p5 = scmp.lt.s32.totalorder %s221_s11, %s221_s11 }
  0x15   : > { %p4501_p11 = pnand %p3923_p9, %p5705_p1  ;;  %p4203_p13 = scmp.ne.s32.totalorder %s221_s11, %s4202_s15 }
  0x16   : > { %p4211_p7 = scmp.lt.s32.totalorder %s4202_s15, %s4202_s15 }
  0x17   : > { %p4193_p12 = pneg %p4501_p11 }
  0x18   : > { %p4212_p10 = por %p4211_p7, %p4210_p5 }
  0x19   : > { %p4205_p0 = pnand %p4203_p13, %p4193_p12 }
  0x1b   : > { %p4206_p3 = pneg %p4205_p0 }
  0x1d   : > { %p4213_p9 = pnand %p4212_p10, %p4206_p3 }
  0x1f   : > { %4216 = shalt.err (!%p4213_p9)
}
  0x20   : > { %s5704_s16 = smov 128   ;;  %s5706_s17 = smov 8  }
  0x21   : > { %s5717_s1 = sld [smem:[#allocation16_spill]]  ;;  %s4228_s20 = scalar_lea.vmem %s247_s14, 4096 }
  0x22   : > { %p4229_p13 = scmp.ne.s32.totalorder %s247_s14, %s4228_s20  ;;  %p4236_p10 = scmp.lt.s32.totalorder %s247_s14, %s247_s14 }
  0x23   : > { %p4237_p3 = scmp.lt.s32.totalorder %s4228_s20, %s4228_s20 }
  0x24   : > { %p4231_p0 = pnand %p4229_p13, %p4193_p12 }
  0x25   : > { %p4238_p7 = por %p4237_p3, %p4236_p10 }
  0x26   : > { %p4232_p5 = pneg %p4231_p0 }
  0x27   : > { %3926 = dma.hbm_to_vmem [thread:$0]  (!%p4501_p11), %s5717_s1, 4096, %s221_s11, [#allocation6], %s5704_s16, %s5704_s16, %s5706_s17  }
  0x28   : > { %p4239_p9 = pnand %p4238_p7, %p4232_p5 }
  0x2a   : > { %4242 = shalt.err (!%p4239_p9)
}
  0x2b   : > { %s4401_s21 = smov 256   ;;  %s4402_s22 = smov 16  }
  0x2c   : > { %3932 = dma.hbm_to_vmem [thread:$0]  (!%p4501_p11), %s5699_s3, 4096, %s247_s14, [#allocation9], %s4401_s21, %s4401_s21, %s4402_s22  }
  0x2d   : > { %s4403_s10 = smov [#allocation7]  }
  0x2e   : > { %s233_s11 = sshll.u32 %s4403_s10, 4  ;;  %s234_s11 = int_to_ptr.vmem [resolvable:$true] %s233_s11 }
  0x2f   : > { %s4254_s13 = scalar_lea.vmem %s234_s11, 1024  ;;  %p4262_p5 = scmp.lt.s32.totalorder %s234_s11, %s234_s11 }
  0x30   : > { %p4255_p13 = scmp.ne.s32.totalorder %s234_s11, %s4254_s13  ;;  %p4263_p3 = scmp.lt.s32.totalorder %s4254_s13, %s4254_s13 }
  0x32   : > { %p4257_p0 = pnand %p4255_p13, %p4193_p12  ;;  %p4264_p7 = por %p4263_p3, %p4262_p5 }
  0x34   : > { %p4258_p10 = pneg %p4257_p0 }
  0x36   : > { %p4265_p9 = pnand %p4264_p7, %p4258_p10 }
  0x38   : > { %4268 = shalt.err (!%p4265_p9)
}
  0x39   : > { %s4404_s15 = smov 64   ;;  %s4405_s18 = smov 4  }
  0x3a   : > { %3929 = dma.hbm_to_vmem [thread:$0]  (!%p4501_p11), %s5698_s2, 1024, %s234_s11, [#allocation6], %s4404_s15, %s4404_s15, %s4405_s18  }
  0x3b   : > { %s4406_s20 = smov [#allocation10]  }
  0x3c   : > { %s259_s21 = sshll.u32 %s4406_s20, 4  ;;  %s260_s21 = int_to_ptr.vmem [resolvable:$true] %s259_s21 }
  0x3d   : > { %s4280_s22 = scalar_lea.vmem %s260_s21, 4096  ;;  %p4288_p10 = scmp.lt.s32.totalorder %s260_s21, %s260_s21 }
  0x3e   : > { %p4281_p13 = scmp.ne.s32.totalorder %s260_s21, %s4280_s22  ;;  %p4289_p3 = scmp.lt.s32.totalorder %s4280_s22, %s4280_s22 }
  0x40   : > { %p4283_p0 = pnand %p4281_p13, %p4193_p12  ;;  %p4290_p7 = por %p4289_p3, %p4288_p10 }
  0x42   : > { %p4284_p5 = pneg %p4283_p0 }
  0x44   : > { %p4291_p9 = pnand %p4290_p7, %p4284_p5 }
  0x46   : > { %4294 = shalt.err (!%p4291_p9)
}
  0x47   : > { %3935 = dma.hbm_to_vmem [thread:$0]  (!%p4501_p11), %s5700_s4, 4096, %s260_s21, [#allocation9], %s4404_s15, %s4404_s15, %s4405_s18  }
  0x48   : > { %s4543_s10 = sadd.s32 1, %s4395_s27   ;;  %s32_s11 = sadd.s32 1, %s4391_s26 }
  0x49   : > { %s29_s12 = ssub.s32 %s4395_s27, %s4543_s10  ;;  %p39_p12 = scmp.ne.s32.totalorder %s4391_s26, %s4387_s25 }
  0x4a   : > { %p30_p13 = scmp.eq.s32.totalorder %s29_s12, 0  ;;  %p40_p0 = scmp.eq.s32.totalorder %s4395_s27, 0 }
  0x4b   : > { %p4553_p5 = por %p195_p2, %p39_p12  ;;  %p3948_p10 = scmp.lt.s32.totalorder %s4395_s27, 2 }
  0x4c   : > { %s4559_s14 = scalar_select %p30_p13, %s4391_s26, %s32_s11  }
  0x4d   : > { %s5718_s13 = scalar_select %p4553_p5, 1, 0 }
  0x4e   : > { %p41_p3 = por %p40_p0, %p39_p12  ;;  %s279_s19 = sand.u32 1, %s4391_s26  }
  0x4f   : > { %s3357_s20 = sshll.u32 %s279_s19, 8  ;;  %s3477_s15 = sshll.u32 %s4395_s27, 12 }
  0x50   : > { %s4566_s22 = scalar_lea.hbm %s5696_s0, %s3477_s15  ;;  %s283_s23 = scalar_lea.vmem [#allocation2], %s3357_s20 }
  0x51   : > { %s290_s29 = sshll.u32 %s283_s23, 4  ;;  %p4570_p2 = pnand %p3948_p10, %p41_p3  ;;  %s4568_s29 = int_to_ptr.vmem [resolvable:$true] %s290_s29 }
  0x52   : > { %s4574_s11 = scalar_lea.sflag [#allocation3], %s279_s19  ;;  %s4295_s16 = scalar_lea.hbm %s4566_s22, 4096 }
  0x53   : > { %p4296_p11 = scmp.ne.s32.totalorder %s4566_s22, %s4295_s16  ;;  %p4297_p7 = pneg %p4570_p2 }
  0x54   : > { %s4300_s20 = scalar_lea.hbm %s5696_s0, 8192  ;;  %p4301_p13 = scmp.lt.s32.totalorder %s4566_s22, %s5696_s0 }
  0x55   : > { %p4298_p9 = pnand %p4297_p7, %p4296_p11  ;;  %p4302_p0 = scmp.lt.s32.totalorder %s4300_s20, %s4295_s16 }
  0x57   : > { %p4299_p12 = pneg %p4298_p9  ;;  %p4303_p10 = por %p4302_p0, %p4301_p13 }
  0x59   : > { %p4304_p3 = pnand %p4303_p10, %p4299_p12 }
  0x5b   : > { %4307 = shalt.err (!%p4304_p3)
}
  0x5c   : > { %s4308_s19 = scalar_lea.vmem %s4568_s29, 4096  ;;  %s4407_s17 = smov [#allocation2]  }
  0x5d   : > { %p4309_p1 = scmp.ne.s32.totalorder %s4568_s29, %s4308_s19  ;;  %s4313_s1 = sshll.u32 %s4407_s17, 4  ;;  %s4314_s1 = int_to_ptr.vmem [resolvable:$false] %s4313_s1 }
  0x5e   : > { %s4315_s15 = scalar_lea.vmem %s4314_s1, 8192  ;;  %p4316_p9 = scmp.lt.s32.totalorder %s4568_s29, %s4314_s1 }
  0x5f   : > { %p4311_p6 = pnand %p4309_p1, %p4297_p7  ;;  %p4317_p5 = scmp.lt.s32.totalorder %s4315_s15, %s4308_s19 }
  0x61   : > { %p4312_p11 = pneg %p4311_p6  ;;  %p4318_p4 = por %p4317_p5, %p4316_p9 }
  0x63   : > { %p4319_p8 = pnand %p4318_p4, %p4312_p11 }
  0x65   : > { %4322 = shalt.err (!%p4319_p8)
}
  0x66   : > { %s5720_s16 = smov 8   ;;  %s5721_s18 = smov 128  }
  0x67   : > { %3939 = dma.hbm_to_vmem [thread:$0]  (!%p4570_p2), %s4566_s22, 4096, %s4568_s29, %s4574_s11, %s5721_s18, %s5721_s18, %s5720_s16  }
  0x68   : > { %p5722_p1 = scmp.ne.s32.totalorder %s5715_s9, 0 }
  0x69   : > { %s4601_s17 = sand.u32 (!%p5722_p1), 1, %s4387_s25   ;;  %p5723_p4 = scmp.ne.s32.totalorder (!%p5722_p1), %s5713_s30, 0 }
  0x6a   : > { %302 = sbr.rel (%p5722_p1) target bundleno = 1227 (0x4cb), region = 48  ;;  %s3361_s1 = sshll.u32 (!%p5722_p1), %s4601_s17, 8 }
  0x6b   : > { %s305_s20 = scalar_lea.sflag (!%p5722_p1), [#allocation3], %s4601_s17  ;;  %s4607_s12 = scalar_lea.vmem (!%p5722_p1), [#allocation2], %s3361_s1 }
  0x6f   : > { %4366 = dma.done.wait (%p5723_p4), %s305_s20, 4096  }
  0x70   : > { %4368 = vsyncadd (%p5723_p4), %s305_s20, 4294963200  ;;  %p5724_p6 = scmp.eq.s32.totalorder %s4473_s28, 0 }
  0x72   : > { %4370 = dma.done.wait (%p5724_p6), [#allocation6], 5120   ;;  %p5725_p8 = pmov %p5724_p6 }
  0x73   : > { %p5726_p5 = pmov %p5724_p6 }
  0x74   : > { %4372 = vsyncadd (%p5725_p8), [#allocation6], 4294962176 }
  0x75   : > { %4374 = dma.done.wait (%p5726_p5), [#allocation9], 8192   ;;  %p5727_p2 = pmov %p5726_p5 }
  0x76   : > { %v386_v0 = vld [vmem:[%s4607_s12 + $0xf0] sm:$0xff]  ;;  %v387_v1 = vld [vmem:[%s4607_s12 + $0xf8] sm:$0xff]  ;;  %v384_v5 = vld [vmem:[%s4607_s12 + $0xe0] sm:$0xff]  ;;  %p5729_p12 = scmp.ne.s32.totalorder %s5718_s13, 0  ;;  %s4409_s21 = smov [#allocation11]  }
  0x77   : > { %4376 = vsyncadd (%p5727_p2), [#allocation9], 4294959104  ;;  %v370_v2 = vld [vmem:[%s4607_s12 + $0x70] sm:$0xff]  ;;  %v440_v3 = vpack.c.bf16 %v387_v1, %v386_v0  ;;  %v371_v4 = vld [vmem:[%s4607_s12 + $0x78] sm:$0xff]  ;;  %s4327_s23 = sshll.u32 %s4409_s21, 4  ;;  %s4328_s23 = int_to_ptr.vmem [resolvable:$false] %s4327_s23 }
  0x78   : > { %v385_v6 = vld [vmem:[%s4607_s12 + $0xe8] sm:$0xff]  ;;  %v432_v7 = vpack.c.bf16 %v371_v4, %v370_v2  ;;  %v368_v9 = vld [vmem:[%s4607_s12 + $0x60] sm:$0xff]  ;;  %v382_v11 = vld [vmem:[%s4607_s12 + $0xd0] sm:$0xff]  ;;  %s4329_s19 = scalar_lea.vmem %s4328_s23, 8192 }
  0x79   : > { %v439_v8 = vpack.c.bf16 %v385_v6, %v384_v5  ;;  %v369_v10 = vld [vmem:[%s4607_s12 + $0x68] sm:$0xff]  ;;  %3479 = vmatprep.subr.bf16.mxu0 %v440_v3  ;;  %v383_v12 = vld [vmem:[%s4607_s12 + $0xd8] sm:$0xff]  ;;  %3887 = vmatprep.subr.bf16.mxu1 %v440_v3  ;;  %v366_v15 = vld [vmem:[%s4607_s12 + $0x50] sm:$0xff] }
  0x7a   : > { %3480 = vmatpush3.bf16.msra.mxu0 %v432_v7  ;;  %v431_v13 = vpack.c.bf16 %v369_v10, %v368_v9  ;;  %3895 = vmatpush3.bf16.msra.mxu1 %v432_v7  ;;  %v438_v14 = vpack.c.bf16 %v383_v12, %v382_v11  ;;  %v367_v16 = vld [vmem:[%s4607_s12 + $0x58] sm:$0xff]  ;;  %v380_v17 = vld [vmem:[%s4607_s12 + $0xc0] sm:$0xff]  ;;  %v381_v18 = vld [vmem:[%s4607_s12 + $0xc8] sm:$0xff] }
  0x7b   : > { %3481 = vmatprep.subr.bf16.mxu0 %v439_v8  ;;  %3888 = vmatprep.subr.bf16.mxu1 %v439_v8  ;;  %v430_v19 = vpack.c.bf16 %v367_v16, %v366_v15  ;;  %v437_v20 = vpack.c.bf16 %v381_v18, %v380_v17  ;;  %v364_v21 = vld [vmem:[%s4607_s12 + $0x40] sm:$0xff]  ;;  %v365_v22 = vld [vmem:[%s4607_s12 + $0x48] sm:$0xff]  ;;  %v378_v23 = vld [vmem:[%s4607_s12 + $0xb0] sm:$0xff] }
  0x7c   : > { %v379_v24 = vld [vmem:[%s4607_s12 + $0xb8] sm:$0xff]  ;;  %v4001_v25 = vld [vmem:[#allocation5 + $0x4] ss:$8 sps:$4 sm:$0xff]   ;;  %v429_v26 = vpack.c.bf16 %v365_v22, %v364_v21  ;;  %v4640_v27 = vld [vmem:[%s4607_s12 + $0x30] sm:$0xff] }
  0x7d   : > { %v436_v28 = vpack.c.bf16 %v379_v24, %v378_v23  ;;  %v4643_v29 = vld [vmem:[%s4607_s12 + $0x38] sm:$0xff]  ;;  %633 = vmatprep.mubr.bf16.mxu0 %v4001_v25  ;;  %v376_v30 = vld [vmem:[%s4607_s12 + $0xa0] sm:$0xff]  ;;  %v377_v31 = vld [vmem:[%s4607_s12 + $0xa8] sm:$0xff] }
  0x7e   : > { %3482 = vmatpush3.bf16.msra.mxu0 %v431_v13  ;;  %3896 = vmatpush3.bf16.msra.mxu1 %v431_v13  ;;  %v428_v32 = vpack.c.bf16 %v4643_v29, %v4640_v27  ;;  %v4650_v33 = vld [vmem:[%s4607_s12 + $0x20] sm:$0xff]  ;;  %v435_v34 = vpack.c.bf16 %v377_v31, %v376_v30  ;;  %v4653_v35 = vld [vmem:[%s4607_s12 + $0x28] sm:$0xff]  ;;  %v374_v36 = vld [vmem:[%s4607_s12 + $0x90] sm:$0xff] }
  0x7f   : > { %3483 = vmatprep.subr.bf16.mxu0 %v438_v14  ;;  %3889 = vmatprep.subr.bf16.mxu1 %v438_v14  ;;  %v375_v37 = vld [vmem:[%s4607_s12 + $0x98] sm:$0xff]  ;;  %v427_v38 = vpack.c.bf16 %v4653_v35, %v4650_v33  ;;  %v4660_v39 = vld [vmem:[%s4607_s12 + $0x10] sm:$0xff]  ;;  %v372_v42 = vld [vmem:[%s4607_s12 + $0x80] sm:$0xff] }
  0x80   : > { %v434_v40 = vpack.c.bf16 %v375_v37, %v374_v36  ;;  %v4663_v41 = vld [vmem:[%s4607_s12 + $0x18] sm:$0xff]  ;;  %v373_v43 = vld [vmem:[%s4607_s12 + $0x88] sm:$0xff]  ;;  %v4670_v45 = vld [vmem:[%s4607_s12] sm:$0xff] }
  0x81   : > { %v426_v44 = vpack.c.bf16 %v4663_v41, %v4660_v39  ;;  %v433_v46 = vpack.c.bf16 %v373_v43, %v372_v42  ;;  %v4673_v47 = vld [vmem:[%s4607_s12 + $0x8] sm:$0xff]  ;;  %v4002_v51 = vld [vmem:[#allocation5 + $0x14] ss:$8 sps:$4 sm:$0xff]   ;;  %v4004_v57 = vld [vmem:[#allocation5 + $0x10] ss:$8 sps:$4 sm:$0xff]  }
  0x82   : > { %3484 = vmatpush3.bf16.msra.mxu0 %v430_v19  ;;  %3897 = vmatpush3.bf16.msra.mxu1 %v430_v19  ;;  %v4033_v48 = vld [vmem:[#allocation5 + $0xc4] ss:$8 sps:$4 sm:$0xff]   ;;  %v425_v49 = vpack.c.bf16 %v4673_v47, %v4670_v45  ;;  %v3999_v50 = vld [vmem:[#allocation5] ss:$8 sps:$4 sm:$0xff]   ;;  %v4037_v53 = vld [vmem:[#allocation5 + $0xd4] ss:$8 sps:$4 sm:$0xff]  }
  0x83   : > { %3485 = vmatprep.subr.bf16.mxu0 %v437_v20  ;;  %3890 = vmatprep.subr.bf16.mxu1 %v437_v20  ;;  %v4031_v52 = vld [vmem:[#allocation5 + $0xc0] ss:$8 sps:$4 sm:$0xff]   ;;  %v4047_v54 = vld [vmem:[#allocation7 + $0x38] sm:$0xff]   ;;  %v4048_v55 = vld [vmem:[#allocation7 + $0x30] sm:$0xff]  }
  0x84   : > { %729 = vmatprep.mubr.bf16.mxu1 %v4033_v48  ;;  %v4049_v56 = vld [vmem:[#allocation7 + $0x28] sm:$0xff]   ;;  %v4040_v58 = vld [vmem:[#allocation5 + $0xd0] ss:$8 sps:$4 sm:$0xff]   ;;  %v4050_v61 = vld [vmem:[#allocation7 + $0x20] sm:$0xff]  }
  0x85   : > { %v4005_v59 = vld [vmem:[#allocation5 + $0x24] ss:$8 sps:$4 sm:$0xff]   ;;  %v4007_v62 = vld [vmem:[#allocation5 + $0x20] ss:$8 sps:$4 sm:$0xff]   ;;  %v4008_v0 = vld [vmem:[#allocation5 + $0x34] ss:$8 sps:$4 sm:$0xff]  }
  0x86   : > { %3486 = vmatpush3.bf16.msra.mxu0 %v429_v26  ;;  %3898 = vmatpush3.bf16.msra.mxu1 %v429_v26  ;;  %v4041_v60 = vld [vmem:[#allocation5 + $0xe4] ss:$8 sps:$4 sm:$0xff]   ;;  %v4043_v63 = vld [vmem:[#allocation5 + $0xe0] ss:$8 sps:$4 sm:$0xff]   ;;  %v4044_v1 = vld [vmem:[#allocation5 + $0xf4] ss:$8 sps:$4 sm:$0xff]  }
  0x87   : > { %3487 = vmatprep.subr.bf16.mxu0 %v436_v28  ;;  %3891 = vmatprep.subr.bf16.mxu1 %v436_v28  ;;  %v4010_v2 = vld [vmem:[#allocation5 + $0x30] ss:$8 sps:$4 sm:$0xff]   ;;  %v4011_v4 = vld [vmem:[#allocation5 + $0x44] ss:$8 sps:$4 sm:$0xff]   ;;  %v4013_v5 = vld [vmem:[#allocation5 + $0x40] ss:$8 sps:$4 sm:$0xff]  }
  0x88   : > { %v4046_v3 = vld [vmem:[#allocation5 + $0xf0] ss:$8 sps:$4 sm:$0xff]   ;;  %v4014_v6 = vld [vmem:[#allocation5 + $0x54] ss:$8 sps:$4 sm:$0xff]   ;;  %v4017_v8 = vld [vmem:[#allocation5 + $0x64] ss:$8 sps:$4 sm:$0xff]  }
  0x89   : > { %v4016_v7 = vld [vmem:[#allocation5 + $0x50] ss:$8 sps:$4 sm:$0xff]   ;;  %v4019_v9 = vld [vmem:[#allocation5 + $0x60] ss:$8 sps:$4 sm:$0xff]   ;;  %v4020_v10 = vld [vmem:[#allocation5 + $0x74] ss:$8 sps:$4 sm:$0xff]  }
  0x8a   : > { %3488 = vmatpush3.bf16.msra.mxu0 %v428_v32  ;;  %3899 = vmatpush3.bf16.msra.mxu1 %v428_v32  ;;  %v4022_v11 = vld [vmem:[#allocation5 + $0x70] ss:$8 sps:$4 sm:$0xff]   ;;  %v4023_v12 = vld [vmem:[#allocation5 + $0x84] ss:$8 sps:$4 sm:$0xff]   ;;  %v4025_v13 = vld [vmem:[#allocation5 + $0x80] ss:$8 sps:$4 sm:$0xff]  }
  0x8b   : > { %3489 = vmatprep.subr.bf16.mxu0 %v435_v34  ;;  %3892 = vmatprep.subr.bf16.mxu1 %v435_v34  ;;  %v4026_v14 = vld [vmem:[#allocation5 + $0x94] ss:$8 sps:$4 sm:$0xff]   ;;  %v4028_v16 = vld [vmem:[#allocation5 + $0x90] ss:$8 sps:$4 sm:$0xff]   ;;  %v4029_v17 = vld [vmem:[#allocation5 + $0xa4] ss:$8 sps:$4 sm:$0xff]  }
  0x8c   : > { %v4051_v15 = vld [vmem:[#allocation7 + $0x18] sm:$0xff]   ;;  %v4052_v18 = vld [vmem:[#allocation7 + $0x10] sm:$0xff]   ;;  %v4053_v19 = vld [vmem:[#allocation7 + $0x8] sm:$0xff]  }
  0x8d   : > { %v4034_v20 = vld [vmem:[#allocation5 + $0xa0] ss:$8 sps:$4 sm:$0xff]   ;;  %v4035_v21 = vld [vmem:[#allocation5 + $0xb4] ss:$8 sps:$4 sm:$0xff]   ;;  %v4039_v23 = vld [vmem:[#allocation5 + $0xb0] ss:$8 sps:$4 sm:$0xff]  }
  0x8e   : > { %3490 = vmatpush3.bf16.msra.mxu0 %v427_v38  ;;  %3900 = vmatpush3.bf16.msra.mxu1 %v427_v38  ;;  %v4054_v22 = vld [vmem:[#allocation7] sm:$0xff]   ;;  %v4055_v24 = vld [vmem:[#allocation8 + $0xe8] ss:$16 sps:$4 sm:$0xff]   ;;  %v4057_v25 = vld [vmem:[#allocation8 + $0xec] ss:$16 sps:$4 sm:$0xff]  }
  0x8f   : > { %3491 = vmatprep.subr.bf16.mxu0 %v434_v40  ;;  %3893 = vmatprep.subr.bf16.mxu1 %v434_v40  ;;  %v4060_v26 = vld [vmem:[#allocation8 + $0xcc] ss:$16 sps:$4 sm:$0xff]   ;;  %v4058_v28 = vld [vmem:[#allocation8 + $0xc8] ss:$16 sps:$4 sm:$0xff]  }
  0x90   : > { %v4063_v30 = vld [vmem:[#allocation8 + $0xac] ss:$16 sps:$4 sm:$0xff]   ;;  %v4061_v31 = vld [vmem:[#allocation8 + $0xa8] ss:$16 sps:$4 sm:$0xff]  }
  0x92   : > { %3492 = vmatpush3.bf16.msra.mxu0 %v426_v44  ;;  %3901 = vmatpush3.bf16.msra.mxu1 %v426_v44 }
  0x93   : > { %3493 = vmatprep.subr.bf16.mxu0 %v433_v46  ;;  %3894 = vmatprep.subr.bf16.mxu1 %v433_v46 }
  0x96   : > { %3494 = vmatpush3.bf16.msra.mxu0 %v425_v49  ;;  %3902 = vmatpush3.bf16.msra.mxu1 %v425_v49 }
  0x97   : > { %3839 = vmatprep.subr.bf16.mxu1 %v4047_v54  ;;  %1846 = vmatprep.subr.bf16.mxu0 %v4057_v25 }
  0x99   : > { %634 = vmatmul.mubr.bf16.vlgmr.msra.gmra.mxu0 %v3999_v50  ;;  %730 = vmatmul.mubr.bf16.vlgmr.msra.gmra.mxu1 %v4031_v52 }
  0x9a   : > { %641 = vmatprep.mubr.bf16.mxu0 %v4002_v51  ;;  %737 = vmatprep.mubr.bf16.mxu1 %v4037_v53 }
  0x9b   : > { %3840 = vmatpush3.bf16.msra.mxu1 %v4047_v54  ;;  %1847 = vmatpush1.bf16.msra.mxu0 %v4055_v24 }
  0x9c   : > { %3841 = vmatprep.subr.bf16.mxu1 %v4048_v55  ;;  %1848 = vmatprep.subr.bf16.mxu0 %v4060_v26 }
  0x9f   : > { %3842 = vmatpush3.bf16.msra.mxu1 %v4048_v55  ;;  %1849 = vmatpush1.bf16.msra.mxu0 %v4058_v28 }
  0xa0   : > { %3843 = vmatprep.subr.bf16.mxu1 %v4049_v56  ;;  %1850 = vmatprep.subr.bf16.mxu0 %v4063_v30 }
  0xa1   : > { %642 = vmatmul.mubr.bf16.gmra.mxu0 %v4004_v57  ;;  %738 = vmatmul.mubr.bf16.gmra.mxu1 %v4040_v58 }
  0xa2   : > { %649 = vmatprep.mubr.bf16.mxu0 %v4005_v59  ;;  %745 = vmatprep.mubr.bf16.mxu1 %v4041_v60 }
  0xa3   : > { %3844 = vmatpush3.bf16.msra.mxu1 %v4049_v56  ;;  %1851 = vmatpush1.bf16.msra.mxu0 %v4061_v31 }
  0xa4   : > { %3845 = vmatprep.subr.bf16.mxu1 %v4050_v61 }
  0xa7   : > { %3846 = vmatpush3.bf16.msra.mxu1 %v4050_v61 }
  0xa8   : > { %3847 = vmatprep.subr.bf16.mxu1 %v4051_v15 }
  0xa9   : > { %650 = vmatmul.mubr.bf16.gmra.mxu0 %v4007_v62  ;;  %746 = vmatmul.mubr.bf16.gmra.mxu1 %v4043_v63 }
  0xaa   : > { %657 = vmatprep.mubr.bf16.mxu0 %v4008_v0  ;;  %753 = vmatprep.mubr.bf16.mxu1 %v4044_v1 }
  0xab   : > { %3848 = vmatpush3.bf16.msra.mxu1 %v4051_v15 }
  0xac   : > { %3849 = vmatprep.subr.bf16.mxu1 %v4052_v18 }
  0xaf   : > { %3850 = vmatpush3.bf16.msra.mxu1 %v4052_v18 }
  0xb0   : > { %3851 = vmatprep.subr.bf16.mxu1 %v4053_v19 }
  0xb1   : > { %658 = vmatmul.mubr.bf16.gmra.mxu0 %v4010_v2  ;;  %754 = vmatmul.mubr.bf16.gmra.mxu1 %v4046_v3 }
  0xb2   : > { %665 = vmatprep.mubr.bf16.mxu0 %v4011_v4 }
  0xb3   : > { %3852 = vmatpush3.bf16.msra.mxu1 %v4053_v19 }
  0xb4   : > { %3853 = vmatprep.subr.bf16.mxu1 %v4054_v22 }
  0xb7   : > { %3854 = vmatpush3.bf16.msra.mxu1 %v4054_v22 }
  0xb9   : > { %666 = vmatmul.mubr.bf16.gmra.mxu0 %v4013_v5 }
  0xba   : > { %673 = vmatprep.mubr.bf16.mxu0 %v4014_v6 }
  0xc1   : > { %674 = vmatmul.mubr.bf16.gmra.mxu0 %v4016_v7 }
  0xc2   : > { %681 = vmatprep.mubr.bf16.mxu0 %v4017_v8 }
  0xc9   : > { %682 = vmatmul.mubr.bf16.gmra.mxu0 %v4019_v9 }
  0xca   : > { %689 = vmatprep.mubr.bf16.mxu0 %v4020_v10 }
  0xd1   : > { %690 = vmatmul.mubr.bf16.gmra.mxu0 %v4022_v11 }
  0xd2   : > { %697 = vmatprep.mubr.bf16.mxu0 %v4023_v12 }
  0xd9   : > { %698 = vmatmul.mubr.bf16.gmra.mxu0 %v4025_v13 }
  0xda   : > { %705 = vmatprep.mubr.bf16.mxu0 %v4026_v14 }
  0xe1   : > { %706 = vmatmul.mubr.bf16.gmra.mxu0 %v4028_v16 }
  0xe2   : > { %713 = vmatprep.mubr.bf16.mxu0 %v4029_v17 }
  0xe9   : > { %714 = vmatmul.mubr.bf16.gmra.mxu0 %v4034_v20 }
  0xea   : > { %721 = vmatprep.mubr.bf16.mxu0 %v4035_v21 }
  0xf1   : > { %722 = vmatmul.mubr.bf16.gmra.mxu0 %v4039_v23 }
 0x159   : > { %v3495_v32 = vpop.f32.mrf.mxu0  ;;  %v4677_v12 = vpop.f32.mrf.mxu1 }
 0x15b   : > { %v3496_v34 = vpop.f32.mrf.mxu0  ;;  %v3568_v17 = vpop.f32.mrf.mxu1 }
 0x15c   : > { %v3497_v38 = vadd.f32 %v3496_v34, %v3495_v32 }
 0x15d   : > { %v3498_v36 = vpop.f32.mrf.mxu0  ;;  %v3570_v21 = vpop.f32.mrf.mxu1 }
 0x15f   : > { %v3499_v37 = vpop.f32.mrf.mxu0  ;;  %v3571_v26 = vpop.f32.mrf.mxu1 }
 0x160   : > { %v3500_v40 = vadd.f32 %v3499_v37, %v3498_v36 }
 0x161   : > { %v3501_v42 = vpop.f32.mrf.mxu0  ;;  %v3573_v32 = vpop.f32.mrf.mxu1 }
 0x162   : > { %v762_v43 = vpack.c.bf16 %v3500_v40, %v3497_v38 }
 0x163   : > { %v3502_v44 = vpop.f32.mrf.mxu0  ;;  %v3574_v40 = vpop.f32.mrf.mxu1 }
 0x164   : > { %3855 = vmatprep.mubr.bf16.mxu1 %v762_v43  ;;  %v3503_v49 = vadd.f32 %v3502_v44, %v3501_v42 }
 0x165   : > { %v3504_v46 = vpop.f32.mrf.mxu0 }
 0x167   : > { %v3505_v48 = vpop.f32.mrf.mxu0 }
 0x168   : > { %v3506_v50 = vadd.f32 %v3505_v48, %v3504_v46  ;;  %v3576_v46 = vpop.f32.mrf.mxu1 }
 0x169   : > { %v3507_v51 = vpop.f32.mrf.mxu0 }
 0x16a   : > { %v763_v52 = vpack.c.bf16 %v3506_v50, %v3503_v49 }
 0x16b   : > { %v3508_v53 = vpop.f32.mrf.mxu0 }
 0x16c   : > { %3856 = vmatmul.mubr.bf16.vlgmr.msra.gmra.mxu1 %v763_v52  ;;  %v3509_v56 = vadd.f32 %v3508_v53, %v3507_v51  ;;  %v3577_v52 = vpop.f32.mrf.mxu1 }
 0x16d   : > { %v3510_v54 = vpop.f32.mrf.mxu0 }
 0x16f   : > { %v3511_v55 = vpop.f32.mrf.mxu0 }
 0x170   : > { %v3512_v57 = vadd.f32 %v3511_v55, %v3510_v54 }
 0x171   : > { %v3513_v58 = vpop.f32.mrf.mxu0 }
 0x172   : > { %v764_v59 = vpack.c.bf16 %v3512_v57, %v3509_v56  ;;  %v3579_v56 = vpop.f32.mrf.mxu1 }
 0x173   : > { %v3514_v60 = vpop.f32.mrf.mxu0 }
 0x174   : > { %3859 = vmatprep.mubr.bf16.mxu1 %v764_v59  ;;  %v3515_v63 = vadd.f32 %v3514_v60, %v3513_v58 }
 0x175   : > { %v3516_v61 = vpop.f32.mrf.mxu0 }
 0x177   : > { %v3517_v62 = vpop.f32.mrf.mxu0 }
 0x178   : > { %v3518_v0 = vadd.f32 %v3517_v62, %v3516_v61  ;;  %v3580_v61 = vpop.f32.mrf.mxu1 }
 0x179   : > { %v3519_v1 = vpop.f32.mrf.mxu0 }
 0x17a   : > { %v765_v2 = vpack.c.bf16 %v3518_v0, %v3515_v63 }
 0x17b   : > { %v3520_v3 = vpop.f32.mrf.mxu0 }
 0x17c   : > { %3860 = vmatmul.mubr.bf16.gmra.mxu1 %v765_v2  ;;  %v3521_v6 = vadd.f32 %v3520_v3, %v3519_v1  ;;  %v3582_v1 = vpop.f32.mrf.mxu1 }
 0x17d   : > { %v3522_v4 = vpop.f32.mrf.mxu0 }
 0x17f   : > { %v3523_v5 = vpop.f32.mrf.mxu0 }
 0x180   : > { %v3524_v7 = vadd.f32 %v3523_v5, %v3522_v4 }
 0x181   : > { %v3525_v8 = vpop.f32.mrf.mxu0 }
 0x182   : > { %v766_v9 = vpack.c.bf16 %v3524_v7, %v3521_v6  ;;  %v3583_v6 = vpop.f32.mrf.mxu1  ;;  %v4064_v7 = vld [vmem:[#allocation8 + $0xe0] ss:$16 sps:$4 sm:$0xff]  }
 0x183   : > { %v3526_v10 = vpop.f32.mrf.mxu0 }
 0x184   : > { %3863 = vmatprep.mubr.bf16.mxu1 %v766_v9  ;;  %v3527_v14 = vadd.f32 %v3526_v10, %v3525_v8  ;;  %v4066_v8 = vld [vmem:[#allocation8 + $0xe4] ss:$16 sps:$4 sm:$0xff]  }
 0x185   : > { %v3528_v11 = vpop.f32.mrf.mxu0  ;;  %1653 = vmatprep.subr.bf16.mxu1 %v4066_v8 }
 0x186   : > { %1654 = vmatpush1.bf16.msra.mxu1 %v4064_v7 }
 0x187   : > { %v3529_v13 = vpop.f32.mrf.mxu0 }
 0x188   : > { %v3530_v15 = vadd.f32 %v3529_v13, %v3528_v11  ;;  %v3569_v11 = vadd.f32 %v3568_v17, %v4677_v12  ;;  %v3572_v13 = vadd.f32 %v3571_v26, %v3570_v21  ;;  %v4072_v26 = vld [vmem:[#allocation8 + $0xc4] ss:$16 sps:$4 sm:$0xff]  }
 0x189   : > { %v3531_v16 = vpop.f32.mrf.mxu0  ;;  %1655 = vmatprep.subr.bf16.mxu1 %v4072_v26 }
 0x18a   : > { %v767_v18 = vpack.c.bf16 %v3530_v15, %v3527_v14  ;;  %v3585_v15 = vpop.f32.mrf.mxu1 }
 0x18b   : > { %v3532_v19 = vpop.f32.mrf.mxu0 }
 0x18c   : > { %3864 = vmatmul.mubr.bf16.gmra.mxu1 %v767_v18  ;;  %v3533_v23 = vadd.f32 %v3532_v19, %v3531_v16 }
 0x18d   : > { %v3534_v20 = vpop.f32.mrf.mxu0 }
 0x18f   : > { %v3535_v22 = vpop.f32.mrf.mxu0 }
 0x190   : > { %v3536_v24 = vadd.f32 %v3535_v22, %v3534_v20  ;;  %v774_v20 = vpack.c.bf16 %v3572_v13, %v3569_v11  ;;  %v3586_v22 = vpop.f32.mrf.mxu1 }
 0x191   : > { %v3537_v25 = vpop.f32.mrf.mxu0  ;;  %v3587_v12 = vadd.f32 %v3586_v22, %v3585_v15 }
 0x192   : > { %v768_v28 = vpack.c.bf16 %v3536_v24, %v3533_v23  ;;  %v3575_v24 = vadd.f32 %v3574_v40, %v3573_v32  ;;  %v4075_v32 = vld [vmem:[#allocation8 + $0xa4] ss:$16 sps:$4 sm:$0xff]   ;;  %v4073_v40 = vld [vmem:[#allocation8 + $0xa0] ss:$16 sps:$4 sm:$0xff]  }
 0x193   : > { %v3538_v30 = vpop.f32.mrf.mxu0 }
 0x194   : > { %3867 = vmatprep.mubr.bf16.mxu1 %v768_v28  ;;  %v3539_v36 = vadd.f32 %v3538_v30, %v3537_v25  ;;  %v3578_v25 = vadd.f32 %v3577_v52, %v3576_v46  ;;  %v3581_v28 = vadd.f32 %v3580_v61, %v3579_v56  ;;  %v3584_v30 = vadd.f32 %v3583_v6, %v3582_v1  ;;  %v4079_v46 = vld [vmem:[#allocation8 + $0x80] ss:$16 sps:$4 sm:$0xff]   ;;  %v4084_v52 = vld [vmem:[#allocation8 + $0x4c] ss:$16 sps:$4 sm:$0xff]   ;;  %v4102_v61 = vld [vmem:[#allocation8 + $0x4] ss:$16 sps:$4 sm:$0xff]  }
 0x195   : > { %v3540_v31 = vpop.f32.mrf.mxu0  ;;  %v4093_v56 = vld [vmem:[#allocation8 + $0x2c] ss:$16 sps:$4 sm:$0xff]  }
 0x197   : > { %v3541_v34 = vpop.f32.mrf.mxu0 }
 0x198   : > { %v3542_v37 = vadd.f32 %v3541_v34, %v3540_v31  ;;  %v3588_v31 = vpop.f32.mrf.mxu1  ;;  %v775_v34 = vpack.c.bf16 %v3578_v25, %v3575_v24 }
 0x199   : > { %v3543_v38 = vpop.f32.mrf.mxu0 }
 0x19a   : > { %v769_v42 = vpack.c.bf16 %v3542_v37, %v3539_v36  ;;  %v776_v36 = vpack.c.bf16 %v3584_v30, %v3581_v28  ;;  %v3589_v37 = vpop.f32.mrf.mxu1  ;;  %v4103_v28 = vld [vmem:[#allocation10 + $0x78] sm:$0xff]  }
 0x19b   : > { %v3544_v43 = vpop.f32.mrf.mxu0  ;;  %v3590_v17 = vadd.f32 %v3589_v37, %v3588_v31 }
 0x19c   : > { %3868 = vmatmul.mubr.bf16.gmra.mxu1 %v769_v42  ;;  %v3545_v49 = vadd.f32 %v3544_v43, %v3543_v38  ;;  %v4070_v38 = vld [vmem:[#allocation8 + $0xc0] ss:$16 sps:$4 sm:$0xff]   ;;  %v4069_v42 = vld [vmem:[#allocation8 + $0x8c] ss:$16 sps:$4 sm:$0xff]   ;;  %v4067_v43 = vld [vmem:[#allocation8 + $0x88] ss:$16 sps:$4 sm:$0xff]  }
 0x19d   : > { %v3546_v44 = vpop.f32.mrf.mxu0  ;;  %v777_v21 = vpack.c.bf16 %v3590_v17, %v3587_v12  ;;  %1656 = vmatpush1.bf16.msra.mxu1 %v4070_v38  ;;  %1852 = vmatprep.subr.bf16.mxu0 %v4069_v42 }
 0x19e   : > { %1657 = vmatprep.subr.bf16.mxu1 %v4075_v32  ;;  %1853 = vmatpush1.bf16.msra.mxu0 %v4067_v43 }
 0x19f   : > { %v3547_v48 = vpop.f32.mrf.mxu0 }
 0x1a0   : > { %v3548_v50 = vadd.f32 %v3547_v48, %v3546_v44  ;;  %v4081_v44 = vld [vmem:[#allocation8 + $0x84] ss:$16 sps:$4 sm:$0xff]   ;;  %v4078_v48 = vld [vmem:[#allocation8 + $0x6c] ss:$16 sps:$4 sm:$0xff]  }
 0x1a1   : > { %v3549_v51 = vpop.f32.mrf.mxu0  ;;  %1658 = vmatpush1.bf16.msra.mxu1 %v4073_v40  ;;  %1854 = vmatprep.subr.bf16.mxu0 %v4078_v48 }
 0x1a2   : > { %v770_v53 = vpack.c.bf16 %v3548_v50, %v3545_v49  ;;  %1659 = vmatprep.subr.bf16.mxu1 %v4081_v44  ;;  %v4076_v49 = vld [vmem:[#allocation8 + $0x68] ss:$16 sps:$4 sm:$0xff]   ;;  %v4087_v50 = vld [vmem:[#allocation8 + $0x64] ss:$16 sps:$4 sm:$0xff]  }
 0x1a3   : > { %v3550_v54 = vpop.f32.mrf.mxu0  ;;  %1855 = vmatpush1.bf16.msra.mxu0 %v4076_v49 }
 0x1a4   : > { %3871 = vmatprep.mubr.bf16.mxu1 %v770_v53  ;;  %v3551_v58 = vadd.f32 %v3550_v54, %v3549_v51  ;;  %v4085_v51 = vld [vmem:[#allocation8 + $0x60] ss:$16 sps:$4 sm:$0xff]   ;;  %v4090_v53 = vld [vmem:[#allocation8 + $0x44] ss:$16 sps:$4 sm:$0xff]   ;;  %v4082_v54 = vld [vmem:[#allocation8 + $0x48] ss:$16 sps:$4 sm:$0xff]   ;;  %1856 = vmatprep.subr.bf16.mxu0 %v4084_v52 }
 0x1a5   : > { %v3552_v55 = vpop.f32.mrf.mxu0  ;;  %1660 = vmatpush1.bf16.msra.mxu1 %v4079_v46 }
 0x1a6   : > { %1661 = vmatprep.subr.bf16.mxu1 %v4087_v50 }
 0x1a7   : > { %v3553_v57 = vpop.f32.mrf.mxu0  ;;  %1857 = vmatpush1.bf16.msra.mxu0 %v4082_v54 }
 0x1a8   : > { %v3554_v59 = vadd.f32 %v3553_v57, %v3552_v55  ;;  %v4088_v55 = vld [vmem:[#allocation8 + $0x40] ss:$16 sps:$4 sm:$0xff]   ;;  %v4096_v57 = vld [vmem:[#allocation8 + $0x24] ss:$16 sps:$4 sm:$0xff]   ;;  %1858 = vmatprep.subr.bf16.mxu0 %v4093_v56 }
 0x1a9   : > { %v3555_v60 = vpop.f32.mrf.mxu0  ;;  %1662 = vmatpush1.bf16.msra.mxu1 %v4085_v51 }
 0x1aa   : > { %v771_v62 = vpack.c.bf16 %v3554_v59, %v3551_v58  ;;  %1663 = vmatprep.subr.bf16.mxu1 %v4090_v53  ;;  %v4091_v58 = vld [vmem:[#allocation8 + $0x28] ss:$16 sps:$4 sm:$0xff]   ;;  %v4094_v59 = vld [vmem:[#allocation8 + $0x20] ss:$16 sps:$4 sm:$0xff]  }
 0x1ab   : > { %v3556_v63 = vpop.f32.mrf.mxu0  ;;  %1859 = vmatpush1.bf16.msra.mxu0 %v4091_v58 }
 0x1ac   : > { %3872 = vmatmul.mubr.bf16.gmra.mxu1 %v771_v62  ;;  %v3557_v3 = vadd.f32 %v3556_v63, %v3555_v60  ;;  %v4099_v60 = vld [vmem:[#allocation8 + $0xc] ss:$16 sps:$4 sm:$0xff]   ;;  %v4097_v62 = vld [vmem:[#allocation8 + $0x8] ss:$16 sps:$4 sm:$0xff]   ;;  %v4100_v63 = vld [vmem:[#allocation8] ss:$16 sps:$4 sm:$0xff]  }
 0x1ad   : > { %v3558_v0 = vpop.f32.mrf.mxu0  ;;  %1664 = vmatpush1.bf16.msra.mxu1 %v4088_v55  ;;  %1860 = vmatprep.subr.bf16.mxu0 %v4099_v60 }
 0x1ae   : > { %1665 = vmatprep.subr.bf16.mxu1 %v4096_v57 }
 0x1af   : > { %v3559_v2 = vpop.f32.mrf.mxu0  ;;  %1861 = vmatpush1.bf16.msra.mxu0 %v4097_v62 }
 0x1b0   : > { %v3560_v4 = vadd.f32 %v3559_v2, %v3558_v0  ;;  %v5710_v0 = vmov 0   ;;  %v4685_v2 = vld [vmem:[%s5701_s5] ss:$0 sm:$0xff] }
 0x1b1   : > { %v3561_v5 = vpop.f32.mrf.mxu0  ;;  %1666 = vmatpush1.bf16.msra.mxu1 %v4094_v59  ;;  %1878 = vmatprep.mubr.bf16.mxu0 %v5710_v0 }
 0x1b2   : > { %v772_v9 = vpack.c.bf16 %v3560_v4, %v3557_v3  ;;  %1667 = vmatprep.subr.bf16.mxu1 %v4102_v61 }
 0x1b3   : > { %v3562_v10 = vpop.f32.mrf.mxu0 }
 0x1b4   : > { %3875 = vmatprep.mubr.bf16.mxu1 %v772_v9  ;;  %v3563_v18 = vadd.f32 %v3562_v10, %v3561_v5 }
 0x1b5   : > { %v3564_v14 = vpop.f32.mrf.mxu0  ;;  %1668 = vmatpush1.bf16.msra.mxu1 %v4100_v63 }
 0x1b6   : > { %3615 = vmatprep.subr.bf16.mxu1 %v4103_v28 }
 0x1b7   : > { %v3565_v16 = vpop.f32.mrf.mxu0 }
 0x1b8   : > { %v3566_v19 = vadd.f32 %v3565_v16, %v3564_v14 }
 0x1ba   : > { %v773_v23 = vpack.c.bf16 %v3566_v19, %v3563_v18 }
 0x1bc   : > { %3876 = vmatmul.mubr.bf16.gmra.mxu1 %v773_v23 }
 0x1bd   : > { %3879 = vmatprep.mubr.bf16.mxu1 %v774_v20 }
 0x1c4   : > { %3880 = vmatmul.mubr.bf16.gmra.mxu1 %v775_v34 }
 0x1c5   : > { %3883 = vmatprep.mubr.bf16.mxu1 %v776_v36  ;;  %v4105_v36 = vld [vmem:[#allocation10 + $0xf8] sm:$0xff]  }
 0x1c6   : > { %3727 = vmatprep.subr.bf16.mxu0 %v4105_v36  ;;  %v1295_v36 = vlaneseq }
 0x1cc   : > { %3884 = vmatmul.mubr.bf16.gmra.mxu1 %v777_v21 }
 0x1cd   : > { %1685 = vmatprep.mubr.bf16.mxu1 %v5710_v0 }
 0x22c   : > { %v3857_v1 = vpop.f32.mrf.mxu1 }
 0x22d   : > { %v889_v6 = vadd.f32 %v3857_v1, %v4685_v2 }
 0x22e   : > { %v880_v3 = vpop.f32.mrf.mxu1 }
 0x22f   : > { %v881_v4 = vadd.f32 %v4685_v2, %v880_v3  ;;  %v4695_v11 = vadd.f32 %v889_v6, %v4660_v39 }
 0x230   : > { %v3858_v5 = vpop.f32.mrf.mxu1 }
 0x231   : > { %v4690_v8 = vadd.f32 %v881_v4, %v4670_v45  ;;  %v892_v9 = vadd.f32 %v3858_v5, %v4685_v2  ;;  %v1113_v18 = vmul.f32 %v4695_v11, %v4695_v11 }
 0x232   : > { %v883_v7 = vpop.f32.mrf.mxu1 }
 0x233   : > { %v884_v10 = vadd.f32 %v4685_v2, %v883_v7  ;;  %v1111_v14 = vmul.f32 %v4690_v8, %v4690_v8  ;;  %v4703_v15 = vadd.f32 %v892_v9, %v4663_v41 }
 0x235   : > { %v4698_v13 = vadd.f32 %v884_v10, %v4673_v47  ;;  %v1114_v47 = vmul.f32 %v4703_v15, %v4703_v15 }
 0x237   : > { %v1039_v45 = vadd.f32 %v4698_v13, %v4690_v8  ;;  %v1112_v16 = vmul.f32 %v4698_v13, %v4698_v13 }
 0x239   : > { %v1040_v39 = vadd.f32 %v1039_v45, %v4695_v11  ;;  %v1143_v19 = vadd.f32 %v1112_v16, %v1111_v14 }
 0x23b   : > { %v1041_v20 = vadd.f32 %v1040_v39, %v4703_v15  ;;  %v1144_v22 = vadd.f32 %v1143_v19, %v1113_v18  ;;  %v4167_v39 = vld [vmem:[%s4607_s12 + $0x40] sm:$0xff] }
 0x23c   : > { %v3861_v41 = vpop.f32.mrf.mxu1 }
 0x23d   : > { %v1042_v23 = vrot.slane %v1041_v20, 4  ;;  %v1145_v24 = vadd.f32 %v1144_v22, %v1114_v47  ;;  %v905_v37 = vadd.f32 %v3861_v41, %v4685_v2 }
 0x23e   : > { %v896_v25 = vpop.f32.mrf.mxu1 }
 0x23f   : > { %v1043_v30 = vadd.f32 %v1042_v23, %v1041_v20  ;;  %v1146_v31 = vrot.slane %v1145_v24, 4  ;;  %v897_v34 = vadd.f32 %v4685_v2, %v896_v25  ;;  %v4723_v44 = vadd.f32 %v905_v37, %v4640_v27 }
 0x240   : > { %v3862_v12 = vpop.f32.mrf.mxu1 }
 0x241   : > { %v1044_v17 = vrot.slane %v1043_v30, 2  ;;  %v1147_v21 = vadd.f32 %v1146_v31, %v1145_v24  ;;  %v4718_v26 = vadd.f32 %v897_v34, %v4650_v33  ;;  %v908_v38 = vadd.f32 %v3862_v12, %v4685_v2  ;;  %v4168_v24 = vld [vmem:[%s4607_s12 + $0x50] sm:$0xff]  ;;  %v4169_v31 = vld [vmem:[%s4607_s12 + $0x48] sm:$0xff]  ;;  %v4170_v12 = vld [vmem:[%s4607_s12 + $0x58] sm:$0xff] }
 0x242   : > { %v899_v32 = vpop.f32.mrf.mxu1  ;;  %v1117_v54 = vmul.f32 %v4723_v44, %v4723_v44 }
 0x243   : > { %v1045_v40 = vadd.f32 %v1044_v17, %v1043_v30  ;;  %v1148_v42 = vrot.slane %v1147_v21, 2  ;;  %v900_v43 = vadd.f32 %v4685_v2, %v899_v32  ;;  %v1115_v50 = vmul.f32 %v4718_v26, %v4718_v26 }
 0x244   : > { %v4731_v33 = vadd.f32 %v908_v38, %v4643_v29 }
 0x245   : > { %v1046_v46 = vrot.slane %v1045_v40, 1  ;;  %v1149_v48 = vadd.f32 %v1148_v42, %v1147_v21  ;;  %v4726_v49 = vadd.f32 %v900_v43, %v4653_v35 }
 0x246   : > { %v1118_v29 = vmul.f32 %v4731_v33, %v4731_v33 }
 0x247   : > { %v1047_v51 = vadd.f32 %v1046_v46, %v1045_v40  ;;  %v1150_v52 = vrot.slane %v1149_v48, 1  ;;  %v1048_v53 = vadd.f32 %v4726_v49, %v4718_v26  ;;  %v1116_v27 = vmul.f32 %v4726_v49, %v4726_v49 }
 0x249   : > { %v1151_v55 = vadd.f32 %v1150_v52, %v1149_v48  ;;  %v4739_v35 = vmul.f32 0.03125, %v1047_v51  ;;  %v1049_v56 = vadd.f32 %v1048_v53, %v4723_v44  ;;  %v1152_v57 = vadd.f32 %v1116_v27, %v1115_v50 }
 0x24a   : > { %v4774_v51 = vshrl.u32 %v1295_v36, 7  ;;  %v4172_v36 = vld [vmem:[%s4607_s12 + $0x70] sm:$0xff] }
 0x24b   : > { %v1223_v58 = vmul.f32 0.03125, %v1151_v55  ;;  %v1231_v59 = vmul.f32 %v4739_v35, %v4739_v35  ;;  %v1050_v60 = vadd.f32 %v1049_v56, %v4731_v33  ;;  %v1153_v61 = vadd.f32 %v1152_v57, %v1117_v54 }
 0x24c   : > { %v3865_v62 = vpop.f32.mrf.mxu1 }
 0x24d   : > { %v1239_v63 = vsub.f32 %v1223_v58, %v1231_v59  ;;  %v1051_v1 = vrot.slane %v1050_v60, 4  ;;  %v1154_v3 = vadd.f32 %v1153_v61, %v1118_v29  ;;  %v921_v9 = vadd.f32 %v3865_v62, %v4685_v2  ;;  %v4784_v59 = vld [vmem:[%s5701_s5 + $0x1] sm:$0x1] }
 0x24e   : > { %v912_v4 = vpop.f32.mrf.mxu1  ;;  %v4787_v61 = vsub.s32 0, %v4774_v51 }
 0x24f   : > { %v1247_v5 = vmax.f32 %v1239_v63, 0.0  ;;  %v1052_v6 = vadd.f32 %v1051_v1, %v1050_v60  ;;  %v1155_v7 = vrot.slane %v1154_v3, 4  ;;  %v913_v10 = vadd.f32 %v4685_v2, %v912_v4 }
 0x250   : > { %v3866_v14 = vpop.f32.mrf.mxu1  ;;  %v4755_v25 = vadd.f32 %v4168_v24, %v921_v9 }
 0x251   : > { %v1255_v45 = vadd.f32 1e-05, %v1247_v5  ;;  %v1053_v16 = vrot.slane %v1052_v6, 2  ;;  %v1156_v18 = vadd.f32 %v1155_v7, %v1154_v3  ;;  %v4750_v19 = vadd.f32 %v4167_v39, %v913_v10 }
 0x252   : > { %v924_v47 = vadd.f32 %v3866_v14, %v4685_v2  ;;  %v915_v20 = vpop.f32.mrf.mxu1  ;;  %v1121_v42 = vmul.f32 %v4755_v25, %v4755_v25  ;;  %v4794_v14 = vld [vmem:[%s5701_s5 + $0x2] sm:$0x1] }
 0x253   : > { %4135 = vrsqrt.f32 %v1255_v45  ;;  %v1054_v22 = vadd.f32 %v1053_v16, %v1052_v6  ;;  %v1157_v41 = vrot.slane %v1156_v18, 2  ;;  %v916_v23 = vadd.f32 %v4685_v2, %v915_v20 }
 0x254   : > { %v1119_v37 = vmul.f32 %v4750_v19, %v4750_v19  ;;  %v4763_v17 = vadd.f32 %v4170_v12, %v924_v47  ;;  %v4173_v12 = vld [vmem:[%s4607_s12 + $0x78] sm:$0xff] }
 0x255   : > { %v1055_v28 = vrot.slane %v1054_v22, 1  ;;  %v1158_v30 = vadd.f32 %v1157_v41, %v1156_v18  ;;  %v4758_v34 = vadd.f32 %v4169_v31, %v916_v23  ;;  %v4171_v41 = vld [vmem:[%s4607_s12 + $0x60] sm:$0xff] }
 0x256   : > { %v1122_v52 = vmul.f32 %v4763_v17, %v4763_v17 }
 0x257   : > { %v1056_v21 = vadd.f32 %v1055_v28, %v1054_v22  ;;  %v1159_v38 = vrot.slane %v1158_v30, 1  ;;  %v1057_v32 = vadd.f32 %v4758_v34, %v4750_v19  ;;  %v1120_v40 = vmul.f32 %v4758_v34, %v4758_v34 }
 0x259   : > { %v1160_v43 = vadd.f32 %v1159_v38, %v1158_v30  ;;  %v4771_v46 = vmul.f32 0.03125, %v1056_v21  ;;  %v1058_v48 = vadd.f32 %v1057_v32, %v4755_v25  ;;  %v1161_v50 = vadd.f32 %v1120_v40, %v1119_v37 }
 0x25b   : > { %v1224_v53 = vmul.f32 0.03125, %v1160_v43  ;;  %v1232_v27 = vmul.f32 %v4771_v46, %v4771_v46  ;;  %v1059_v54 = vadd.f32 %v1058_v48, %v4763_v17  ;;  %v1162_v55 = vadd.f32 %v1161_v50, %v1121_v42 }
 0x25c   : > { %v3869_v56 = vpop.f32.mrf.mxu1 }
 0x25d   : > { %v1240_v57 = vsub.f32 %v1224_v53, %v1232_v27  ;;  %v1060_v29 = vrot.slane %v1059_v54, 4  ;;  %v1163_v58 = vadd.f32 %v1162_v55, %v1122_v52  ;;  %v937_v45 = vadd.f32 %v3869_v56, %v4685_v2 }
 0x25e   : > { %v928_v60 = vpop.f32.mrf.mxu1 }
 0x25f   : > { %v1248_v62 = vmax.f32 %v1240_v57, 0.0  ;;  %v1061_v63 = vadd.f32 %v1060_v29, %v1059_v54  ;;  %v1164_v1 = vrot.slane %v1163_v58, 4  ;;  %v929_v4 = vadd.f32 %v4685_v2, %v928_v60 }
 0x260   : > { %v4136_v3 = vpop.eup %4135  ;;  %v3870_v5 = vpop.f32.mrf.mxu1  ;;  %v4806_v37 = vadd.f32 %v4172_v36, %v937_v45  ;;  %v4110_v36 = vld [vmem:[#allocation10 + $0xb0] sm:$0xff]  }
 0x261   : > { %v1271_v6 = vmul.f32 %v4136_v3, %v4784_v59  ;;  %v1256_v7 = vadd.f32 1e-05, %v1248_v62  ;;  %v1062_v9 = vrot.slane %v1061_v63, 2  ;;  %v1165_v10 = vadd.f32 %v1164_v1, %v1163_v58  ;;  %v4104_v62 = vld [vmem:[#allocation10 + $0x38] sm:$0xff]  }
 0x262   : > { %v940_v16 = vadd.f32 %v3870_v5, %v4685_v2  ;;  %v931_v18 = vpop.f32.mrf.mxu1  ;;  %v4801_v23 = vadd.f32 %v4171_v41, %v929_v4 }
 0x263   : > { %v1279_v39 = vmul.f32 %v1271_v6, %v4739_v35  ;;  %v1298_v47 = vrot.slane %v1271_v6, %v4787_v61  ;;  %4137 = vrsqrt.f32 %v1256_v7  ;;  %v1063_v20 = vadd.f32 %v1062_v9, %v1061_v63  ;;  %v4174_v35 = vld [vmem:[%s4607_s12 + $0x68] sm:$0xff]  ;;  %v4106_v63 = vld [vmem:[#allocation10 + $0xb8] sm:$0xff]   ;;  %v4107_v7 = vld [vmem:[#allocation10 + $0x70] sm:$0xff]  }
 0x264   : > { %v1166_v22 = vrot.slane %v1165_v10, 2  ;;  %v932_v24 = vadd.f32 %v4685_v2, %v931_v18  ;;  %v4809_v21 = vadd.f32 %v4173_v12, %v940_v16  ;;  %v1123_v50 = vmul.f32 %v4801_v23, %v4801_v23  ;;  %v4109_v9 = vld [vmem:[#allocation10 + $0xf0] sm:$0xff]   ;;  %v4111_v12 = vld [vmem:[#allocation10 + $0x68] sm:$0xff]  }
 0x265   : > { %v1287_v28 = vsub.f32 %v4794_v14, %v1279_v39  ;;  %v1064_v30 = vrot.slane %v1063_v20, 1  ;;  %v1328_v32 = vmul.f32 %v1298_v47, %v4698_v13  ;;  %v1327_v43 = vmul.f32 %v1298_v47, %v4690_v8 }
 0x266   : > { %v1167_v31 = vadd.f32 %v1166_v22, %v1165_v10  ;;  %v4812_v38 = vadd.f32 %v4174_v35, %v932_v24  ;;  %v1125_v8 = vmul.f32 %v4806_v37, %v4806_v37  ;;  %v1126_v58 = vmul.f32 %v4809_v21, %v4809_v21  ;;  %v4175_v35 = vld [vmem:[%s4607_s12 + $0x80] sm:$0xff] }
 0x267   : > { %v1362_v40 = vrot.slane %v1287_v28, %v4787_v61  ;;  %v1065_v42 = vadd.f32 %v1064_v30, %v1063_v20  ;;  %v1329_v6 = vmul.f32 %v1298_v47, %v4695_v11  ;;  %v1330_v10 = vmul.f32 %v1298_v47, %v4703_v15  ;;  %v4108_v15 = vld [vmem:[#allocation10 + $0x30] sm:$0xff]  }
 0x268   : > { %v1168_v48 = vrot.slane %v1167_v31, 1  ;;  %v1066_v52 = vadd.f32 %v4812_v38, %v4801_v23  ;;  %v1124_v53 = vmul.f32 %v4812_v38, %v4812_v38 }
 0x269   : > { %v4823_v27 = vadd.f32 %v1362_v40, %v1328_v32  ;;  %v4825_v54 = vmul.f32 0.03125, %v1065_v42  ;;  %v4827_v13 = vadd.f32 %v1362_v40, %v1327_v43  ;;  %v4843_v20 = vadd.f32 %v1362_v40, %v1329_v6  ;;  %v4114_v6 = vld [vmem:[#allocation10 + $0xa8] sm:$0xff]  }
 0x26a   : > { %v1169_v55 = vadd.f32 %v1168_v48, %v1167_v31  ;;  %v1067_v56 = vadd.f32 %v1066_v52, %v4806_v37  ;;  %v1170_v57 = vadd.f32 %v1124_v53, %v1123_v50  ;;  %v4847_v41 = vadd.f32 %v1362_v40, %v1330_v10  ;;  %v4176_v53 = vld [vmem:[%s4607_s12 + $0x90] sm:$0xff]  ;;  %v4178_v10 = vld [vmem:[%s4607_s12 + $0x98] sm:$0xff] }
 0x26b   : > { %v1233_v29 = vmul.f32 %v4825_v54, %v4825_v54  ;;  %v1423_v60 = vpack.c.bf16 %v4823_v27, %v4827_v13 }
 0x26c   : > { %v1225_v1 = vmul.f32 0.03125, %v1169_v55  ;;  %v1068_v3 = vadd.f32 %v1067_v56, %v4809_v21  ;;  %v1171_v4 = vadd.f32 %v1170_v57, %v1125_v8  ;;  %v3873_v5 = vpop.f32.mrf.mxu1  ;;  %v1424_v56 = vpack.c.bf16 %v4847_v41, %v4843_v20 }
 0x26d   : > { %1686 = vmatmul.mubr.bf16.vlgmr.msra.gmra.mxu1 %v1423_v60  ;;  %1879 = vmatmul.mubr.bf16.vlgmr.msra.gmra.mxu0 %v1423_v60  ;;  %v953_v22 = vadd.f32 %v3873_v5, %v4685_v2 }
 0x26e   : > { %v1241_v45 = vsub.f32 %v1225_v1, %v1233_v29  ;;  %v1069_v16 = vrot.slane %v1068_v3, 4  ;;  %v1172_v18 = vadd.f32 %v1171_v4, %v1126_v58  ;;  %v944_v39 = vpop.f32.mrf.mxu1  ;;  %1695 = vmatprep.mubr.bf16.mxu1 %v5710_v0  ;;  %1888 = vmatprep.mubr.bf16.mxu0 %v5710_v0  ;;  %v4112_v29 = vld [vmem:[#allocation10 + $0x28] sm:$0xff]   ;;  %v4115_v1 = vld [vmem:[#allocation10 + $0x60] sm:$0xff]  }
 0x26f   : > { %v945_v11 = vadd.f32 %v4685_v2, %v944_v39  ;;  %3616 = vmatpush3.bf16.msra.mxu1 %v4104_v62  ;;  %3728 = vmatpush3.bf16.msra.mxu0 %v4106_v63  ;;  %v4855_v55 = vadd.f32 %v4176_v53, %v953_v22  ;;  %v4113_v63 = vld [vmem:[#allocation10 + $0xe8] sm:$0xff]  }
 0x270   : > { %v4138_v47 = vpop.eup %4137  ;;  %v1249_v24 = vmax.f32 %v1241_v45, 0.0  ;;  %v1070_v28 = vadd.f32 %v1069_v16, %v1068_v3  ;;  %v1173_v30 = vrot.slane %v1172_v18, 4  ;;  %v3874_v31 = vpop.f32.mrf.mxu1  ;;  %3617 = vmatprep.subr.bf16.mxu1 %v4107_v7  ;;  %3729 = vmatprep.subr.bf16.mxu0 %v4109_v9  ;;  %v4177_v4 = vld [vmem:[%s4607_s12 + $0x88] sm:$0xff] }
 0x271   : > { %v4850_v32 = vadd.f32 %v4175_v35, %v945_v11  ;;  %v1272_v42 = vmul.f32 %v4138_v47, %v4784_v59  ;;  %v956_v50 = vadd.f32 %v3874_v31, %v4685_v2  ;;  %v4116_v47 = vld [vmem:[#allocation10 + $0x20] sm:$0xff]  }
 0x272   : > { %v1257_v40 = vadd.f32 1e-05, %v1249_v24  ;;  %v1071_v43 = vrot.slane %v1070_v28, 2  ;;  %v1174_v48 = vadd.f32 %v1173_v30, %v1172_v18  ;;  %v947_v52 = vpop.f32.mrf.mxu1  ;;  %v4117_v18 = vld [vmem:[#allocation10 + $0xe0] sm:$0xff]   ;;  %v1129_v30 = vmul.f32 %v4855_v55, %v4855_v55 }
 0x273   : > { %v948_v8 = vadd.f32 %v4685_v2, %v947_v52  ;;  %v1280_v57 = vmul.f32 %v1272_v42, %v4771_v46  ;;  %3618 = vmatpush3.bf16.msra.mxu1 %v4108_v15  ;;  %v1302_v62 = vrot.slane %v1272_v42, %v4787_v61  ;;  %3730 = vmatpush3.bf16.msra.mxu0 %v4110_v36 }
 0x274   : > { %4139 = vrsqrt.f32 %v1257_v40  ;;  %v1072_v58 = vadd.f32 %v1071_v43, %v1070_v28  ;;  %v1175_v60 = vrot.slane %v1174_v48, 2  ;;  %3619 = vmatprep.subr.bf16.mxu1 %v4111_v12  ;;  %v1127_v3 = vmul.f32 %v4850_v32, %v4850_v32  ;;  %3731 = vmatprep.subr.bf16.mxu0 %v4113_v63  ;;  %v4123_v63 = vld [vmem:[#allocation10 + $0x50] sm:$0xff]  }
 0x275   : > { %v4865_v5 = vadd.f32 %v4177_v4, %v948_v8  ;;  %1696 = vmatmul.mubr.bf16.gmra.mxu1 %v1424_v56  ;;  %1889 = vmatmul.mubr.bf16.gmra.mxu0 %v1424_v56  ;;  %v1288_v46 = vsub.f32 %v4794_v14, %v1280_v57  ;;  %v4869_v45 = vadd.f32 %v4178_v10, %v956_v50  ;;  %v4118_v8 = vld [vmem:[#allocation10 + $0xa0] sm:$0xff]   ;;  %v4120_v56 = vld [vmem:[#allocation10 + $0x18] sm:$0xff]  }
 0x276   : > { %v1073_v7 = vrot.slane %v1072_v58, 1  ;;  %v1176_v9 = vadd.f32 %v1175_v60, %v1174_v48  ;;  %1705 = vmatprep.mubr.bf16.mxu1 %v5710_v0  ;;  %1898 = vmatprep.mubr.bf16.mxu0 %v5710_v0  ;;  %v1331_v16 = vmul.f32 %v1302_v62, %v4718_v26  ;;  %v1332_v11 = vmul.f32 %v1302_v62, %v4726_v49  ;;  %v4119_v26 = vld [vmem:[#allocation10 + $0x58] sm:$0xff]  }
 0x277   : > { %v1075_v39 = vadd.f32 %v4865_v5, %v4850_v32  ;;  %v1128_v22 = vmul.f32 %v4865_v5, %v4865_v5  ;;  %v1366_v15 = vrot.slane %v1288_v46, %v4787_v61  ;;  %3620 = vmatpush3.bf16.msra.mxu1 %v4112_v29  ;;  %3732 = vmatpush3.bf16.msra.mxu0 %v4114_v6 }
 0x278   : > { %v1074_v24 = vadd.f32 %v1073_v7, %v1072_v58  ;;  %v1177_v28 = vrot.slane %v1176_v9, 1  ;;  %3621 = vmatprep.subr.bf16.mxu1 %v4115_v1  ;;  %v1130_v40 = vmul.f32 %v4869_v45, %v4869_v45  ;;  %v1333_v43 = vmul.f32 %v1302_v62, %v4723_v44  ;;  %3733 = vmatprep.subr.bf16.mxu0 %v4117_v18  ;;  %v4121_v44 = vld [vmem:[#allocation10 + $0xd8] sm:$0xff]  }
 0x279   : > { %v1076_v31 = vadd.f32 %v1075_v39, %v4855_v55  ;;  %v1179_v36 = vadd.f32 %v1128_v22, %v1127_v3  ;;  %v4883_v12 = vadd.f32 %v1366_v15, %v1331_v16  ;;  %v4885_v35 = vadd.f32 %v1366_v15, %v1332_v11  ;;  %v4122_v18 = vld [vmem:[#allocation10 + $0x98] sm:$0xff]   ;;  %v4124_v39 = vld [vmem:[#allocation10 + $0x10] sm:$0xff]  }
 0x27a   : > { %v1178_v49 = vadd.f32 %v1177_v28, %v1176_v9  ;;  %v4887_v42 = vmul.f32 0.03125, %v1074_v24  ;;  %v1334_v53 = vmul.f32 %v1302_v62, %v4731_v33  ;;  %v4898_v60 = vadd.f32 %v1366_v15, %v1333_v43  ;;  %v4179_v9 = vld [vmem:[%s4607_s12 + $0xb0] sm:$0xff] }
 0x27b   : > { %v1077_v48 = vadd.f32 %v1076_v31, %v4869_v45  ;;  %v1180_v50 = vadd.f32 %v1179_v36, %v1129_v30  ;;  %v1425_v52 = vpack.c.bf16 %v4885_v35, %v4883_v12  ;;  %3622 = vmatpush3.bf16.msra.mxu1 %v4116_v47  ;;  %3734 = vmatpush3.bf16.msra.mxu0 %v4118_v8  ;;  %v4127_v47 = vld [vmem:[#allocation10 + $0x48] sm:$0xff]  }
 0x27c   : > { %v1226_v57 = vmul.f32 0.03125, %v1178_v49  ;;  %v1234_v29 = vmul.f32 %v4887_v42, %v4887_v42  ;;  %v3877_v58 = vpop.f32.mrf.mxu1  ;;  %3623 = vmatprep.subr.bf16.mxu1 %v4119_v26  ;;  %v4901_v33 = vadd.f32 %v1366_v15, %v1334_v53  ;;  %3735 = vmatprep.subr.bf16.mxu0 %v4121_v44  ;;  %v4125_v15 = vld [vmem:[#allocation10 + $0xd0] sm:$0xff]   ;;  %v4180_v26 = vld [vmem:[%s4607_s12 + $0xa0] sm:$0xff] }
 0x27d   : > { %v1078_v1 = vrot.slane %v1077_v48, 4  ;;  %v1181_v3 = vadd.f32 %v1180_v50, %v1130_v40  ;;  %v969_v4 = vadd.f32 %v3877_v58, %v4685_v2  ;;  %1706 = vmatmul.mubr.bf16.gmra.mxu1 %v1425_v52  ;;  %1899 = vmatmul.mubr.bf16.gmra.mxu0 %v1425_v52  ;;  %v4181_v58 = vld [vmem:[%s4607_s12 + $0xb8] sm:$0xff] }
 0x27e   : > { %v1242_v62 = vsub.f32 %v1226_v57, %v1234_v29  ;;  %v960_v46 = vpop.f32.mrf.mxu1  ;;  %1715 = vmatprep.mubr.bf16.mxu1 %v5710_v0  ;;  %1908 = vmatprep.mubr.bf16.mxu0 %v5710_v0  ;;  %v1426_v36 = vpack.c.bf16 %v4901_v33, %v4898_v60  ;;  %v4126_v57 = vld [vmem:[#allocation10 + $0x90] sm:$0xff]   ;;  %v4128_v29 = vld [vmem:[#allocation10 + $0x8] sm:$0xff]  }
 0x27f   : > { %v1079_v6 = vadd.f32 %v1078_v1, %v1077_v48  ;;  %v1182_v7 = vrot.slane %v1181_v3, 4  ;;  %v4906_v10 = vadd.f32 %v4179_v9, %v969_v4  ;;  %v961_v16 = vadd.f32 %v4685_v2, %v960_v46  ;;  %3624 = vmatpush3.bf16.msra.mxu1 %v4120_v56  ;;  %3736 = vmatpush3.bf16.msra.mxu0 %v4122_v18  ;;  %v4129_v4 = vld [vmem:[#allocation10 + $0xc8] sm:$0xff]  }
 0x280   : > { %v1250_v22 = vmax.f32 %v1242_v62, 0.0  ;;  %v3878_v11 = vpop.f32.mrf.mxu1  ;;  %3625 = vmatprep.subr.bf16.mxu1 %v4123_v63  ;;  %3737 = vmatprep.subr.bf16.mxu0 %v4125_v15 }
 0x281   : > { %v4140_v24 = vpop.eup %4139  ;;  %v1080_v28 = vrot.slane %v1079_v6, 2  ;;  %v1183_v30 = vadd.f32 %v1182_v7, %v1181_v3  ;;  %v4910_v31 = vadd.f32 %v4180_v26, %v961_v16  ;;  %v4916_v40 = vmul.f32 %v4906_v10, %v4906_v10  ;;  %v4131_v16 = vld [vmem:[#allocation10 + $0x40] sm:$0xff]   ;;  %v4183_v26 = vld [vmem:[%s4607_s12 + $0xd0] sm:$0xff] }
 0x282   : > { %v1258_v49 = vadd.f32 1e-05, %v1250_v22  ;;  %v972_v43 = vadd.f32 %v3878_v11, %v4685_v2  ;;  %v963_v48 = vpop.f32.mrf.mxu1  ;;  %v1273_v50 = vmul.f32 %v4140_v24, %v4784_v59 }
 0x283   : > { %v1081_v52 = vadd.f32 %v1080_v28, %v1079_v6  ;;  %v1184_v53 = vrot.slane %v1183_v30, 2  ;;  %v1131_v8 = vmul.f32 %v4910_v31, %v4910_v31  ;;  %v964_v56 = vadd.f32 %v4685_v2, %v963_v48  ;;  %3626 = vmatpush3.bf16.msra.mxu1 %v4124_v39  ;;  %v4182_v6 = vld [vmem:[%s4607_s12 + $0xa8] sm:$0xff]  ;;  %3738 = vmatpush3.bf16.msra.mxu0 %v4126_v57 }
 0x284   : > { %v4924_v44 = vadd.f32 %v4181_v58, %v972_v43  ;;  %v3881_v63 = vpop.f32.mrf.mxu1  ;;  %v1281_v1 = vmul.f32 %v1273_v50, %v4825_v54  ;;  %v4928_v3 = vrot.slane %v1273_v50, %v4787_v61  ;;  %3627 = vmatprep.subr.bf16.mxu1 %v4127_v47  ;;  %4141 = vrsqrt.f32 %v1258_v49  ;;  %v4130_v28 = vld [vmem:[#allocation10 + $0x88] sm:$0xff]   ;;  %3739 = vmatprep.subr.bf16.mxu0 %v4129_v4  ;;  %v4133_v50 = vld [vmem:[#allocation10 + $0xc0] sm:$0xff]  }
 0x285   : > { %v1082_v62 = vrot.slane %v1081_v52, 1  ;;  %v1185_v46 = vadd.f32 %v1184_v53, %v1183_v30  ;;  %v4931_v7 = vadd.f32 %v4182_v6, %v964_v56  ;;  %v985_v9 = vadd.f32 %v3881_v63, %v4685_v2  ;;  %1716 = vmatmul.mubr.bf16.gmra.mxu1 %v1426_v36  ;;  %1909 = vmatmul.mubr.bf16.gmra.mxu0 %v1426_v36  ;;  %v4132_v30 = vld [vmem:[#allocation10] sm:$0xff]  }
 0x286   : > { %v1134_v54 = vmul.f32 %v4924_v44, %v4924_v44  ;;  %v976_v18 = vpop.f32.mrf.mxu1  ;;  %1725 = vmatprep.mubr.bf16.mxu1 %v5710_v0  ;;  %1918 = vmatprep.mubr.bf16.mxu0 %v5710_v0  ;;  %v1289_v39 = vsub.f32 %v4794_v14, %v1281_v1  ;;  %v1335_v22 = vmul.f32 %v4928_v3, %v4750_v19  ;;  %v4184_v58 = vld [vmem:[%s4607_s12 + $0xc0] sm:$0xff] }
 0x287   : > { %v1083_v11 = vadd.f32 %v1082_v62, %v1081_v52  ;;  %v1186_v15 = vrot.slane %v1185_v46, 1  ;;  %v1084_v47 = vadd.f32 %v4931_v7, %v4910_v31  ;;  %v1132_v24 = vmul.f32 %v4931_v7, %v4931_v7  ;;  %3628 = vmatpush3.bf16.msra.mxu1 %v4128_v29  ;;  %3740 = vmatpush3.bf16.msra.mxu0 %v4130_v28 }
 0x288   : > { %v4946_v36 = vadd.f32 %v4183_v26, %v985_v9  ;;  %v977_v49 = vadd.f32 %v4685_v2, %v976_v18  ;;  %v3882_v43 = vpop.f32.mrf.mxu1  ;;  %v1336_v19 = vmul.f32 %v4928_v3, %v4758_v34  ;;  %v4952_v48 = vrot.slane %v1289_v39, %v4787_v61  ;;  %3629 = vmatprep.subr.bf16.mxu1 %v4131_v16  ;;  %v4185_v16 = vld [vmem:[%s4607_s12 + $0xd8] sm:$0xff] }
 0x289   : > { %v1187_v52 = vadd.f32 %v1186_v15, %v1185_v46  ;;  %v4954_v53 = vmul.f32 0.03125, %v1083_v11  ;;  %v1085_v56 = vadd.f32 %v1084_v47, %v4906_v10  ;;  %v1188_v57 = vadd.f32 %v1132_v24, %v1131_v8  ;;  %3741 = vmatprep.subr.bf16.mxu0 %v4133_v50 }
 0x28a   : > { %v1137_v29 = vmul.f32 %v4946_v36, %v4946_v36  ;;  %v4960_v63 = vadd.f32 %v4184_v58, %v977_v49  ;;  %v988_v34 = vadd.f32 %v3882_v43, %v4685_v2  ;;  %v979_v1 = vpop.f32.mrf.mxu1  ;;  %v4964_v4 = vadd.f32 %v4952_v48, %v1335_v22 }
 0x28b   : > { %v1227_v62 = vmul.f32 0.03125, %v1187_v52  ;;  %v1235_v46 = vmul.f32 %v4954_v53, %v4954_v53  ;;  %v1086_v6 = vadd.f32 %v1085_v56, %v4924_v44  ;;  %v1189_v8 = vadd.f32 %v1188_v57, %v4916_v40  ;;  %3630 = vmatpush3.bf16.msra.mxu1 %v4132_v30  ;;  %v4186_v30 = vld [vmem:[%s4607_s12 + $0xc8] sm:$0xff]  ;;  %v4187_v57 = vld [vmem:[%s4607_s12 + $0xf0] sm:$0xff] }
 0x28c   : > { %v1135_v9 = vmul.f32 %v4960_v63, %v4960_v63  ;;  %v4973_v18 = vadd.f32 %v4185_v16, %v988_v34  ;;  %v980_v39 = vadd.f32 %v4685_v2, %v979_v1  ;;  %v3885_v22 = vpop.f32.mrf.mxu1  ;;  %v4977_v11 = vadd.f32 %v4952_v48, %v1336_v19 }
 0x28d   : > { %v1243_v15 = vsub.f32 %v1227_v62, %v1235_v46  ;;  %v1087_v47 = vrot.slane %v1086_v6, 4  ;;  %v1190_v24 = vadd.f32 %v1189_v8, %v1134_v54  ;;  %v1001_v40 = vadd.f32 %v3885_v22, %v4685_v2  ;;  %v4188_v22 = vld [vmem:[%s4607_s12 + $0xe0] sm:$0xff] }
 0x28e   : > { %v1138_v28 = vmul.f32 %v4973_v18, %v4973_v18  ;;  %v4983_v26 = vadd.f32 %v4186_v30, %v980_v39  ;;  %v1427_v49 = vpack.c.bf16 %v4977_v11, %v4964_v4  ;;  %v992_v43 = vpop.f32.mrf.mxu1  ;;  %v1337_v19 = vmul.f32 %v4928_v3, %v4755_v25 }
 0x28f   : > { %v1251_v52 = vmax.f32 %v1243_v15, 0.0  ;;  %v1088_v50 = vadd.f32 %v1087_v47, %v1086_v6  ;;  %v1191_v56 = vrot.slane %v1190_v24, 4  ;;  %v4990_v54 = vadd.f32 %v4187_v57, %v1001_v40 }
 0x290   : > { %v1093_v58 = vadd.f32 %v4983_v26, %v4960_v63  ;;  %v1136_v34 = vmul.f32 %v4983_v26, %v4983_v26  ;;  %1726 = vmatmul.mubr.bf16.gmra.mxu1 %v1427_v49  ;;  %1919 = vmatmul.mubr.bf16.gmra.mxu0 %v1427_v49  ;;  %v993_v1 = vadd.f32 %v4685_v2, %v992_v43  ;;  %v3886_v62 = vpop.f32.mrf.mxu1 }
 0x291   : > { %v1259_v46 = vadd.f32 1e-05, %v1251_v52  ;;  %v1089_v25 = vrot.slane %v1088_v50, 2  ;;  %v1192_v8 = vadd.f32 %v1191_v56, %v1190_v24  ;;  %v1141_v6 = vmul.f32 %v4990_v54, %v4990_v54  ;;  %1735 = vmatprep.mubr.bf16.mxu1 %v5710_v0  ;;  %1928 = vmatprep.mubr.bf16.mxu0 %v5710_v0  ;;  %v4142_v30 = vpop.eup %4141 }
 0x292   : > { %v1094_v16 = vadd.f32 %v1093_v58, %v4946_v36  ;;  %v1197_v39 = vadd.f32 %v1136_v34, %v1135_v9  ;;  %v5003_v15 = vadd.f32 %v4188_v22, %v993_v1  ;;  %v1004_v47 = vadd.f32 %v3886_v62, %v4685_v2  ;;  %v995_v40 = vpop.f32.mrf.mxu1  ;;  %v4189_v9 = vld [vmem:[%s4607_s12 + $0xf8] sm:$0xff]  ;;  %v4190_v22 = vld [vmem:[%s4607_s12 + $0xe8] sm:$0xff]  ;;  %s5417_s12 = scalar_lea.vmem [#allocation11], %s3361_s1  ;;  %s3478_s1 = sshll.u32 %s4473_s28, 12 }
 0x293   : > { %4143 = vrsqrt.f32 %v1259_v46  ;;  %v1090_v24 = vadd.f32 %v1089_v25, %v1088_v50  ;;  %v1193_v49 = vrot.slane %v1192_v8, 2  ;;  %v996_v43 = vadd.f32 %v4685_v2, %v995_v40  ;;  %s3239_s30 = sshll.u32 %s5417_s12, 4  ;;  %s5647_s29 = scalar_lea.hbm %s5703_s7, %s3478_s1  ;;  %s5649_s30 = int_to_ptr.vmem [resolvable:$true] %s3239_s30 }
 0x294   : > { %v1095_v52 = vadd.f32 %v1094_v16, %v4973_v18  ;;  %v1198_v56 = vadd.f32 %v1197_v39, %v1137_v29  ;;  %v1139_v57 = vmul.f32 %v5003_v15, %v5003_v15  ;;  %v5011_v58 = vadd.f32 %v4189_v9, %v1004_v47  ;;  %s3226_s28 = scalar_lea.sflag [#allocation4], %s4601_s17  ;;  %s4323_s11 = scalar_lea.vmem %s5649_s30, 4096 }
 0x295   : > { %v1091_v34 = vrot.slane %v1090_v24, 1  ;;  %v1194_v1 = vadd.f32 %v1193_v49, %v1192_v8  ;;  %v5014_v62 = vadd.f32 %v4190_v22, %v996_v43  ;;  %v1338_v50 = vmul.f32 %v4928_v3, %v4763_v17  ;;  %p4324_p7 = scmp.ne.s32.totalorder %s5649_s30, %s4323_s11  ;;  %p4330_p10 = scmp.lt.s32.totalorder %s5649_s30, %s4328_s23 }
 0x296   : > { %v1096_v46 = vrot.slane %v1095_v52, 4  ;;  %v1199_v25 = vadd.f32 %v1198_v56, %v1138_v28  ;;  %v1142_v2 = vmul.f32 %v5011_v58, %v5011_v58  ;;  %v5021_v29 = vadd.f32 %v4952_v48, %v1337_v19  ;;  %p4331_p3 = scmp.lt.s32.totalorder %s4329_s19, %s4323_s11 }
 0x297   : > { %v1092_v16 = vadd.f32 %v1091_v34, %v1090_v24  ;;  %v1195_v39 = vrot.slane %v1194_v1, 1  ;;  %v1102_v47 = vadd.f32 %v5014_v62, %v5003_v15  ;;  %v1140_v8 = vmul.f32 %v5014_v62, %v5014_v62  ;;  %p4325_p13 = pnand %p4324_p7, %p5729_p12 }
 0x298   : > { %v1097_v40 = vadd.f32 %v1096_v46, %v1095_v52  ;;  %v1200_v49 = vrot.slane %v1199_v25, 4  ;;  %v5028_v17 = vadd.f32 %v4952_v48, %v1338_v50  ;;  %v1274_v3 = vmul.f32 %v4142_v30, %v4784_v59  ;;  %p4332_p11 = por %p4331_p3, %p4330_p10 }
 0x299   : > { %v1196_v28 = vadd.f32 %v1195_v39, %v1194_v1  ;;  %v5031_v43 = vmul.f32 0.03125, %v1092_v16  ;;  %v1103_v19 = vadd.f32 %v1102_v47, %v4990_v54  ;;  %v1206_v24 = vadd.f32 %v1140_v8, %v1139_v57  ;;  %p4326_p0 = pneg %p4325_p13 }
 0x29a   : > { %v1098_v56 = vrot.slane %v1097_v40, 2  ;;  %v1201_v9 = vadd.f32 %v1200_v49, %v1199_v25  ;;  %v1428_v34 = vpack.c.bf16 %v5028_v17, %v5021_v29  ;;  %v1282_v22 = vmul.f32 %v1274_v3, %v4887_v42 }
 0x29b   : > { %v1228_v52 = vmul.f32 0.03125, %v1196_v28  ;;  %v1236_v48 = vmul.f32 %v5031_v43, %v5031_v43  ;;  %v1104_v50 = vadd.f32 %v1103_v19, %v5011_v58  ;;  %v1207_v30 = vadd.f32 %v1206_v24, %v1141_v6  ;;  %p4333_p9 = pnand %p4332_p11, %p4326_p0 }
 0x29c   : > { %v1099_v1 = vadd.f32 %v1098_v56, %v1097_v40  ;;  %v1202_v46 = vrot.slane %v1201_v9, 2  ;;  %1736 = vmatmul.mubr.bf16.gmra.mxu1 %v1428_v34  ;;  %1929 = vmatmul.mubr.bf16.gmra.mxu0 %v1428_v34  ;;  %v1290_v57 = vsub.f32 %v4794_v14, %v1282_v22  ;;  %v1310_v25 = vrot.slane %v1274_v3, %v4787_v61 }
 0x29d   : > { %v1244_v16 = vsub.f32 %v1228_v52, %v1236_v48  ;;  %v1105_v39 = vrot.slane %v1104_v50, 4  ;;  %v1208_v47 = vadd.f32 %v1207_v30, %v1142_v2  ;;  %1745 = vmatprep.mubr.bf16.mxu1 %v5710_v0  ;;  %1938 = vmatprep.mubr.bf16.mxu0 %v5710_v0 }
 0x29e   : > { %v1100_v42 = vrot.slane %v1099_v1, 1  ;;  %v1203_v8 = vadd.f32 %v1202_v46, %v1201_v9  ;;  %v1339_v49 = vmul.f32 %v1310_v25, %v4801_v23  ;;  %v1374_v19 = vrot.slane %v1290_v57, %v4787_v61 }
 0x29f   : > { %v1252_v6 = vmax.f32 %v1244_v16, 0.0  ;;  %v1106_v40 = vadd.f32 %v1105_v39, %v1104_v50  ;;  %v1209_v28 = vrot.slane %v1208_v47, 4  ;;  %v1340_v3 = vmul.f32 %v1310_v25, %v4812_v38 }
 0x2a0   : > { %v4144_v24 = vpop.eup %4143  ;;  %v1101_v56 = vadd.f32 %v1100_v42, %v1099_v1  ;;  %v1204_v34 = vrot.slane %v1203_v8, 1  ;;  %v5047_v48 = vadd.f32 %v1374_v19, %v1339_v49  ;;  %v1342_v42 = vmul.f32 %v1310_v25, %v4809_v21 }
 0x2a1   : > { %v1260_v22 = vadd.f32 1e-05, %v1252_v6  ;;  %v1107_v2 = vrot.slane %v1106_v40, 2  ;;  %v1210_v52 = vadd.f32 %v1209_v28, %v1208_v47  ;;  %v5051_v9 = vadd.f32 %v1374_v19, %v1340_v3 }
 0x2a2   : > { %v1205_v30 = vadd.f32 %v1204_v34, %v1203_v8  ;;  %v5049_v0 = vmul.f32 0.03125, %v1101_v56  ;;  %v1275_v57 = vmul.f32 %v4144_v24, %v4784_v59  ;;  %v1341_v47 = vmul.f32 %v1310_v25, %v4806_v37 }
 0x2a3   : > { %4145 = vrsqrt.f32 %v1260_v22  ;;  %v1108_v23 = vadd.f32 %v1107_v2, %v1106_v40  ;;  %v1211_v50 = vrot.slane %v1210_v52, 2  ;;  %v1429_v38 = vpack.c.bf16 %v5051_v9, %v5047_v48 }
 0x2a4   : > { %v1229_v46 = vmul.f32 0.03125, %v1205_v30  ;;  %v1237_v1 = vmul.f32 %v5049_v0, %v5049_v0  ;;  %v1283_v49 = vmul.f32 %v1275_v57, %v4954_v53  ;;  %v5728_v6 = vmov 0  }
 0x2a5   : > { %v1109_v16 = vrot.slane %v1108_v23, 1  ;;  %v1212_v39 = vadd.f32 %v1211_v50, %v1210_v52  ;;  %1746 = vmatmul.mubr.bf16.gmra.mxu1 %v1429_v38  ;;  %1939 = vmatmul.mubr.bf16.gmra.mxu0 %v1429_v38  ;;  %v5063_v40 = vadd.f32 %v1374_v19, %v1341_v47  ;;  %v5065_v28 = vadd.f32 %v1374_v19, %v1342_v42 }
 0x2a6   : > { %v1245_v8 = vsub.f32 %v1229_v46, %v1237_v1  ;;  %1755 = vmatprep.mubr.bf16.mxu1 %v5728_v6  ;;  %1948 = vmatprep.mubr.bf16.mxu0 %v5728_v6  ;;  %v1314_v24 = vrot.slane %v1275_v57, %v4787_v61  ;;  %v1291_v21 = vsub.f32 %v4794_v14, %v1283_v49  ;;  %v4134_v1 = vld [vmem:[#allocation10 + $0x80] sm:$0xff]  }
 0x2a7   : > { %v1110_v34 = vadd.f32 %v1109_v16, %v1108_v23  ;;  %v1213_v37 = vrot.slane %v1212_v39, 1  ;;  %v1430_v53 = vpack.c.bf16 %v5065_v28, %v5063_v40  ;;  %3742 = vmatpush3.bf16.msra.mxu0 %v4134_v1 }
 0x2a8   : > { %v1253_v56 = vmax.f32 %v1245_v8, 0.0  ;;  %v1378_v25 = vrot.slane %v1291_v21, %v4787_v61  ;;  %v1343_v3 = vmul.f32 %v1314_v24, %v4850_v32  ;;  %v1344_v19 = vmul.f32 %v1314_v24, %v4865_v5 }
 0x2a9   : > { %v1214_v2 = vadd.f32 %v1213_v37, %v1212_v39  ;;  %v5073_v52 = vmul.f32 0.03125, %v1110_v34  ;;  %v1345_v39 = vmul.f32 %v1314_v24, %v4855_v55  ;;  %v1346_v47 = vmul.f32 %v1314_v24, %v4869_v45 }
 0x2aa   : > { %v1261_v22 = vadd.f32 1e-05, %v1253_v56  ;;  %v5076_v30 = vadd.f32 %v1378_v25, %v1343_v3  ;;  %v5078_v23 = vadd.f32 %v1378_v25, %v1344_v19 }
 0x2ab   : > { %v1230_v46 = vmul.f32 0.03125, %v1214_v2  ;;  %v1238_v32 = vmul.f32 %v5073_v52, %v5073_v52  ;;  %v5093_v49 = vadd.f32 %v1378_v25, %v1345_v39  ;;  %v5095_v56 = vadd.f32 %v1378_v25, %v1346_v47 }
 0x2ac   : > { %4147 = vrsqrt.f32 %v1261_v22  ;;  %v1431_v5 = vpack.c.bf16 %v5078_v23, %v5076_v30 }
 0x2ad   : > { %1756 = vmatmul.mubr.bf16.gmra.mxu1 %v1430_v53  ;;  %1949 = vmatmul.mubr.bf16.gmra.mxu0 %v1430_v53  ;;  %v1246_v16 = vsub.f32 %v1230_v46, %v1238_v32  ;;  %v1432_v55 = vpack.c.bf16 %v5095_v56, %v5093_v49 }
 0x2ae   : > { %1765 = vmatprep.mubr.bf16.mxu1 %v5728_v6  ;;  %1958 = vmatprep.mubr.bf16.mxu0 %v5728_v6 }
 0x2af   : > { %v1254_v8 = vmax.f32 %v1246_v16, 0.0 }
 0x2b0   : > { %v4146_v50 = vpop.eup %4145 }
 0x2b1   : > { %v1276_v38 = vmul.f32 %v4146_v50, %v4784_v59  ;;  %v1262_v37 = vadd.f32 1e-05, %v1254_v8 }
 0x2b3   : > { %v1284_v57 = vmul.f32 %v1276_v38, %v5031_v43  ;;  %v1318_v43 = vrot.slane %v1276_v38, %v4787_v61  ;;  %4149 = vrsqrt.f32 %v1262_v37 }
 0x2b5   : > { %1766 = vmatmul.mubr.bf16.gmra.mxu1 %v1431_v5  ;;  %1959 = vmatmul.mubr.bf16.gmra.mxu0 %v1431_v5  ;;  %v1292_v42 = vsub.f32 %v4794_v14, %v1284_v57  ;;  %v1347_v45 = vmul.f32 %v1318_v43, %v4910_v31  ;;  %v1348_v24 = vmul.f32 %v1318_v43, %v4931_v7 }
 0x2b6   : > { %1775 = vmatprep.mubr.bf16.mxu1 %v5728_v6  ;;  %1968 = vmatprep.mubr.bf16.mxu0 %v5728_v6  ;;  %v1349_v7 = vmul.f32 %v1318_v43, %v4906_v10  ;;  %v1350_v2 = vmul.f32 %v1318_v43, %v4924_v44 }
 0x2b7   : > { %v1382_v34 = vrot.slane %v1292_v42, %v4787_v61 }
 0x2b9   : > { %v4148_v21 = vpop.eup %4147  ;;  %v5103_v53 = vadd.f32 %v1382_v34, %v1347_v45  ;;  %v5105_v3 = vadd.f32 %v1382_v34, %v1348_v24  ;;  %v5117_v19 = vadd.f32 %v1382_v34, %v1349_v7  ;;  %v5119_v50 = vadd.f32 %v1382_v34, %v1350_v2 }
 0x2ba   : > { %v1277_v25 = vmul.f32 %v4148_v21, %v4784_v59 }
 0x2bb   : > { %v1433_v22 = vpack.c.bf16 %v5105_v3, %v5103_v53 }
 0x2bc   : > { %v1285_v31 = vmul.f32 %v1277_v25, %v5049_v0  ;;  %v1322_v32 = vrot.slane %v1277_v25, %v4787_v61  ;;  %v1434_v0 = vpack.c.bf16 %v5119_v50, %v5117_v19  ;;  %v1479_v25 = vsub.s32 1, %v4774_v51 }
 0x2bd   : > { %1776 = vmatmul.mubr.bf16.gmra.mxu1 %v1432_v55  ;;  %1969 = vmatmul.mubr.bf16.gmra.mxu0 %v1432_v55 }
 0x2be   : > { %1785 = vmatprep.mubr.bf16.mxu1 %v5728_v6  ;;  %1978 = vmatprep.mubr.bf16.mxu0 %v5728_v6  ;;  %v1293_v46 = vsub.f32 %v4794_v14, %v1285_v31  ;;  %v1351_v44 = vmul.f32 %v1322_v32, %v4960_v63  ;;  %v1352_v38 = vmul.f32 %v1322_v32, %v4983_v26 }
 0x2bf   : > { %v1353_v63 = vmul.f32 %v1322_v32, %v4946_v36  ;;  %v1354_v26 = vmul.f32 %v1322_v32, %v4973_v18 }
 0x2c0   : > { %v1386_v1 = vrot.slane %v1293_v46, %v4787_v61  ;;  %v4150_v10 = vpop.eup %4149 }
 0x2c1   : > { %v1278_v16 = vmul.f32 %v4150_v10, %v4784_v59 }
 0x2c2   : > { %v5130_v5 = vadd.f32 %v1386_v1, %v1351_v44  ;;  %v5132_v57 = vadd.f32 %v1386_v1, %v1352_v38  ;;  %v5142_v42 = vadd.f32 %v1386_v1, %v1353_v63  ;;  %v5144_v8 = vadd.f32 %v1386_v1, %v1354_v26 }
 0x2c3   : > { %v1286_v47 = vmul.f32 %v1278_v16, %v5073_v52  ;;  %v1326_v43 = vrot.slane %v1278_v16, %v4787_v61 }
 0x2c4   : > { %v1435_v39 = vpack.c.bf16 %v5132_v57, %v5130_v5  ;;  %v1436_v52 = vpack.c.bf16 %v5144_v8, %v5142_v42 }
 0x2c5   : > { %1786 = vmatmul.mubr.bf16.gmra.mxu1 %v1433_v22  ;;  %1979 = vmatmul.mubr.bf16.gmra.mxu0 %v1433_v22  ;;  %v1294_v59 = vsub.f32 %v4794_v14, %v1286_v47  ;;  %v1355_v36 = vmul.f32 %v1326_v43, %v5003_v15  ;;  %v1356_v18 = vmul.f32 %v1326_v43, %v5014_v62  ;;  %v1487_v22 = vsub.s32 3, %v4774_v51 }
 0x2c6   : > { %1795 = vmatprep.mubr.bf16.mxu1 %v5728_v6  ;;  %1988 = vmatprep.mubr.bf16.mxu0 %v5728_v6  ;;  %v1357_v45 = vmul.f32 %v1326_v43, %v4990_v54  ;;  %v1358_v24 = vmul.f32 %v1326_v43, %v5011_v58  ;;  %v1483_v54 = vsub.s32 2, %v4774_v51  ;;  %v1471_v58 = vld [vmem:[%s5702_s6] sm:$0xf] }
 0x2c7   : > { %v1390_v34 = vrot.slane %v1294_v59, %v4787_v61  ;;  %v5177_v7 = vrot.slane %v1471_v58, %v1479_v25  ;;  %v5179_v2 = vrot.slane %v1471_v58, %v1487_v22  ;;  %v5182_v46 = vrot.slane %v1471_v58, %v4787_v61 }
 0x2c8   : > { %v5184_v32 = vrot.slane %v1471_v58, %v1483_v54 }
 0x2c9   : > { %v5155_v37 = vadd.f32 %v1390_v34, %v1355_v36  ;;  %v5157_v14 = vadd.f32 %v1390_v34, %v1356_v18  ;;  %v5165_v15 = vadd.f32 %v1390_v34, %v1357_v45  ;;  %v5167_v62 = vadd.f32 %v1390_v34, %v1358_v24 }
 0x2cb   : > { %v1437_v55 = vpack.c.bf16 %v5157_v14, %v5155_v37  ;;  %v1438_v21 = vpack.c.bf16 %v5167_v62, %v5165_v15 }
 0x2cd   : > { %1796 = vmatmul.mubr.bf16.gmra.mxu1 %v1434_v0  ;;  %1989 = vmatmul.mubr.bf16.gmra.mxu0 %v1434_v0 }
 0x2ce   : > { %1805 = vmatprep.mubr.bf16.mxu1 %v5728_v6  ;;  %1998 = vmatprep.mubr.bf16.mxu0 %v5728_v6 }
 0x2d5   : > { %1806 = vmatmul.mubr.bf16.gmra.mxu1 %v1435_v39  ;;  %1999 = vmatmul.mubr.bf16.gmra.mxu0 %v1435_v39 }
 0x2d6   : > { %1815 = vmatprep.mubr.bf16.mxu1 %v5728_v6  ;;  %2008 = vmatprep.mubr.bf16.mxu0 %v5728_v6 }
 0x2dd   : > { %1816 = vmatmul.mubr.bf16.gmra.mxu1 %v1436_v52  ;;  %2009 = vmatmul.mubr.bf16.gmra.mxu0 %v1436_v52 }
 0x2de   : > { %1825 = vmatprep.mubr.bf16.mxu1 %v5728_v6  ;;  %2018 = vmatprep.mubr.bf16.mxu0 %v5728_v6 }
 0x2e5   : > { %1826 = vmatmul.mubr.bf16.gmra.mxu1 %v1437_v55  ;;  %2019 = vmatmul.mubr.bf16.gmra.mxu0 %v1437_v55 }
 0x2e6   : > { %1835 = vmatprep.mubr.bf16.mxu1 %v5728_v6  ;;  %2028 = vmatprep.mubr.bf16.mxu0 %v5728_v6 }
 0x2ed   : > { %1836 = vmatmul.mubr.bf16.gmra.mxu1 %v1438_v21  ;;  %2029 = vmatmul.mubr.bf16.gmra.mxu0 %v1438_v21 }
 0x32d   : > { %v1687_v6 = vpop.f32.mrf.mxu1  ;;  %v1880_v31 = vpop.f32.mrf.mxu0 }
 0x32e   : > { %v1688_v47 = vadd.f32 %v1687_v6, %v5182_v46  ;;  %v1881_v63 = vadd.f32 %v1880_v31, %v5184_v32 }
 0x32f   : > { %v1689_v0 = vpop.f32.mrf.mxu1  ;;  %v1882_v1 = vpop.f32.mrf.mxu0 }
 0x330   : > { %v1690_v51 = vadd.f32 %v1689_v0, %v5177_v7  ;;  %v1883_v38 = vadd.f32 %v1882_v1, %v5179_v2  ;;  %v2039_v22 = vmax.f32 %v1688_v47, 0.0  ;;  %v2041_v54 = vmax.f32 %v1881_v63, 0.0 }
 0x331   : > { %v1691_v10 = vpop.f32.mrf.mxu1  ;;  %v1884_v44 = vpop.f32.mrf.mxu0 }
 0x332   : > { %v1692_v16 = vadd.f32 %v1691_v10, %v5182_v46  ;;  %v1885_v39 = vadd.f32 %v1884_v44, %v5184_v32  ;;  %v2040_v45 = vmax.f32 %v1690_v51, 0.0  ;;  %v2042_v24 = vmax.f32 %v1883_v38, 0.0 }
 0x333   : > { %v1693_v26 = vpop.f32.mrf.mxu1  ;;  %v1886_v59 = vpop.f32.mrf.mxu0 }
 0x334   : > { %v1694_v43 = vadd.f32 %v1693_v26, %v5177_v7  ;;  %v1887_v52 = vadd.f32 %v1886_v59, %v5179_v2  ;;  %v2043_v34 = vmax.f32 %v1692_v16, 0.0  ;;  %v2045_v36 = vmax.f32 %v1885_v39, 0.0 }
 0x335   : > { %v1697_v18 = vpop.f32.mrf.mxu1  ;;  %v1890_v55 = vpop.f32.mrf.mxu0 }
 0x336   : > { %v2044_v21 = vmax.f32 %v1694_v43, 0.0  ;;  %v2046_v25 = vmax.f32 %v1887_v52, 0.0  ;;  %v2167_v1 = vpack.c.bf16 %v2043_v34, %v2039_v22  ;;  %v2169_v10 = vpack.c.bf16 %v2045_v36, %v2041_v54 }
 0x337   : > { %v1699_v58 = vpop.f32.mrf.mxu1  ;;  %v1892_v6 = vpop.f32.mrf.mxu0  ;;  %v1698_v38 = vadd.f32 %v1697_v18, %v5182_v46  ;;  %v1891_v47 = vadd.f32 %v1890_v55, %v5184_v32 }
 0x338   : > { %v2168_v0 = vpack.c.bf16 %v2044_v21, %v2040_v45  ;;  %v2170_v31 = vpack.c.bf16 %v2046_v25, %v2042_v24  ;;  %v1700_v44 = vadd.f32 %v1699_v58, %v5177_v7  ;;  %v1893_v16 = vadd.f32 %v1892_v6, %v5179_v2 }
 0x339   : > { %v1701_v26 = vpop.f32.mrf.mxu1  ;;  %v1894_v59 = vpop.f32.mrf.mxu0  ;;  %v2047_v6 = vmax.f32 %v1698_v38, 0.0  ;;  %v2049_v18 = vmax.f32 %v1891_v47, 0.0 }
 0x33a   : > { %v1702_v39 = vadd.f32 %v1701_v26, %v5182_v46  ;;  %v1895_v51 = vadd.f32 %v1894_v59, %v5184_v32  ;;  %2519 = vmatprep.mubr.bf16.mxu1 %v2168_v0  ;;  %2680 = vmatprep.mubr.bf16.mxu0 %v2170_v31  ;;  %v2048_v25 = vmax.f32 %v1700_v44, 0.0  ;;  %v2050_v22 = vmax.f32 %v1893_v16, 0.0 }
 0x33b   : > { %v1703_v63 = vpop.f32.mrf.mxu1  ;;  %v1896_v43 = vpop.f32.mrf.mxu0  ;;  %2520 = vmatmul.mubr.bf16.vlgmr.msra.gmra.mxu1 %v2167_v1  ;;  %2681 = vmatmul.mubr.bf16.vlgmr.msra.gmra.mxu0 %v2169_v10 }
 0x33c   : > { %v1704_v52 = vadd.f32 %v1703_v63, %v5177_v7  ;;  %v1897_v34 = vadd.f32 %v1896_v43, %v5179_v2  ;;  %v2051_v36 = vmax.f32 %v1702_v39, 0.0  ;;  %v2053_v45 = vmax.f32 %v1895_v51, 0.0 }
 0x33d   : > { %v1707_v24 = vpop.f32.mrf.mxu1  ;;  %v1900_v21 = vpop.f32.mrf.mxu0 }
 0x33e   : > { %v2052_v54 = vmax.f32 %v1704_v52, 0.0  ;;  %v2054_v58 = vmax.f32 %v1897_v34, 0.0  ;;  %v2171_v1 = vpack.c.bf16 %v2051_v36, %v2047_v6  ;;  %v2173_v10 = vpack.c.bf16 %v2053_v45, %v2049_v18 }
 0x33f   : > { %v1709_v0 = vpop.f32.mrf.mxu1  ;;  %v1902_v55 = vpop.f32.mrf.mxu0  ;;  %v1708_v16 = vadd.f32 %v1707_v24, %v5182_v46  ;;  %v1901_v38 = vadd.f32 %v1900_v21, %v5184_v32 }
 0x340   : > { %v2172_v31 = vpack.c.bf16 %v2052_v54, %v2048_v25  ;;  %v2174_v26 = vpack.c.bf16 %v2054_v58, %v2050_v22  ;;  %v1710_v59 = vadd.f32 %v1709_v0, %v5177_v7  ;;  %v1903_v39 = vadd.f32 %v1902_v55, %v5179_v2 }
 0x341   : > { %v1711_v63 = vpop.f32.mrf.mxu1  ;;  %v1904_v43 = vpop.f32.mrf.mxu0  ;;  %v2055_v55 = vmax.f32 %v1708_v16, 0.0  ;;  %v2057_v24 = vmax.f32 %v1901_v38, 0.0 }
 0x342   : > { %v1712_v51 = vadd.f32 %v1711_v63, %v5182_v46  ;;  %v1905_v44 = vadd.f32 %v1904_v43, %v5184_v32  ;;  %2527 = vmatprep.mubr.bf16.mxu1 %v2172_v31  ;;  %2688 = vmatprep.mubr.bf16.mxu0 %v2174_v26  ;;  %v2056_v58 = vmax.f32 %v1710_v59, 0.0  ;;  %v2058_v6 = vmax.f32 %v1903_v39, 0.0 }
 0x343   : > { %v1713_v47 = vpop.f32.mrf.mxu1  ;;  %v1906_v52 = vpop.f32.mrf.mxu0  ;;  %2528 = vmatmul.mubr.bf16.gmra.mxu1 %v2171_v1  ;;  %2689 = vmatmul.mubr.bf16.gmra.mxu0 %v2173_v10 }
 0x344   : > { %v1714_v34 = vadd.f32 %v1713_v47, %v5177_v7  ;;  %v1907_v36 = vadd.f32 %v1906_v52, %v5179_v2  ;;  %v2059_v45 = vmax.f32 %v1712_v51, 0.0  ;;  %v2061_v25 = vmax.f32 %v1905_v44, 0.0 }
 0x345   : > { %v1717_v22 = vpop.f32.mrf.mxu1  ;;  %v1910_v54 = vpop.f32.mrf.mxu0 }
 0x346   : > { %v2060_v18 = vmax.f32 %v1714_v34, 0.0  ;;  %v2062_v0 = vmax.f32 %v1907_v36, 0.0  ;;  %v2175_v1 = vpack.c.bf16 %v2059_v45, %v2055_v55  ;;  %v2177_v10 = vpack.c.bf16 %v2061_v25, %v2057_v24 }
 0x347   : > { %v1719_v31 = vpop.f32.mrf.mxu1  ;;  %v1912_v21 = vpop.f32.mrf.mxu0  ;;  %v1718_v39 = vadd.f32 %v1717_v22, %v5182_v46  ;;  %v1911_v16 = vadd.f32 %v1910_v54, %v5184_v32 }
 0x348   : > { %v2176_v26 = vpack.c.bf16 %v2060_v18, %v2056_v58  ;;  %v2178_v63 = vpack.c.bf16 %v2062_v0, %v2058_v6  ;;  %v1720_v43 = vadd.f32 %v1719_v31, %v5177_v7  ;;  %v1913_v51 = vadd.f32 %v1912_v21, %v5179_v2 }
 0x349   : > { %v1721_v47 = vpop.f32.mrf.mxu1  ;;  %v1914_v52 = vpop.f32.mrf.mxu0  ;;  %v2063_v24 = vmax.f32 %v1718_v39, 0.0  ;;  %v2065_v31 = vmax.f32 %v1911_v16, 0.0 }
 0x34a   : > { %v1722_v44 = vadd.f32 %v1721_v47, %v5182_v46  ;;  %v1915_v59 = vadd.f32 %v1914_v52, %v5184_v32  ;;  %2535 = vmatprep.mubr.bf16.mxu1 %v2176_v26  ;;  %2696 = vmatprep.mubr.bf16.mxu0 %v2178_v63  ;;  %v2064_v6 = vmax.f32 %v1720_v43, 0.0  ;;  %v2066_v18 = vmax.f32 %v1913_v51, 0.0 }
 0x34b   : > { %v1723_v38 = vpop.f32.mrf.mxu1  ;;  %v1916_v34 = vpop.f32.mrf.mxu0  ;;  %2536 = vmatmul.mubr.bf16.gmra.mxu1 %v2175_v1  ;;  %2697 = vmatmul.mubr.bf16.gmra.mxu0 %v2177_v10 }
 0x34c   : > { %v1724_v36 = vadd.f32 %v1723_v38, %v5177_v7  ;;  %v1917_v45 = vadd.f32 %v1916_v34, %v5179_v2  ;;  %v2067_v25 = vmax.f32 %v1722_v44, 0.0  ;;  %v2069_v58 = vmax.f32 %v1915_v59, 0.0 }
 0x34e   : > { %v2068_v0 = vmax.f32 %v1724_v36, 0.0  ;;  %v2070_v55 = vmax.f32 %v1917_v45, 0.0  ;;  %v2179_v63 = vpack.c.bf16 %v2067_v25, %v2063_v24  ;;  %v2181_v47 = vpack.c.bf16 %v2069_v58, %v2065_v31 }
 0x350   : > { %v1727_v21 = vpop.f32.mrf.mxu1  ;;  %v1920_v22 = vpop.f32.mrf.mxu0  ;;  %v2180_v26 = vpack.c.bf16 %v2068_v0, %v2064_v6  ;;  %v2182_v54 = vpack.c.bf16 %v2070_v55, %v2066_v18 }
 0x351   : > { %v1728_v16 = vadd.f32 %v1727_v21, %v5182_v46  ;;  %v1921_v38 = vadd.f32 %v1920_v22, %v5184_v32 }
 0x352   : > { %v1729_v1 = vpop.f32.mrf.mxu1  ;;  %v1922_v10 = vpop.f32.mrf.mxu0  ;;  %2543 = vmatprep.mubr.bf16.mxu1 %v2180_v26  ;;  %2704 = vmatprep.mubr.bf16.mxu0 %v2182_v54 }
 0x353   : > { %2544 = vmatmul.mubr.bf16.gmra.mxu1 %v2179_v63  ;;  %2705 = vmatmul.mubr.bf16.gmra.mxu0 %v2181_v47  ;;  %v1730_v43 = vadd.f32 %v1729_v1, %v5177_v7  ;;  %v1923_v51 = vadd.f32 %v1922_v10, %v5179_v2  ;;  %v2071_v31 = vmax.f32 %v1728_v16, 0.0  ;;  %v2073_v26 = vmax.f32 %v1921_v38, 0.0 }
 0x354   : > { %v1731_v52 = vpop.f32.mrf.mxu1  ;;  %v1924_v44 = vpop.f32.mrf.mxu0 }
 0x355   : > { %v1732_v59 = vadd.f32 %v1731_v52, %v5182_v46  ;;  %v1925_v39 = vadd.f32 %v1924_v44, %v5184_v32  ;;  %v2072_v18 = vmax.f32 %v1730_v43, 0.0  ;;  %v2074_v0 = vmax.f32 %v1923_v51, 0.0 }
 0x356   : > { %v1733_v34 = vpop.f32.mrf.mxu1  ;;  %v1926_v36 = vpop.f32.mrf.mxu0 }
 0x357   : > { %v1734_v45 = vadd.f32 %v1733_v34, %v5177_v7  ;;  %v1927_v25 = vadd.f32 %v1926_v36, %v5179_v2  ;;  %v2075_v58 = vmax.f32 %v1732_v59, 0.0  ;;  %v2077_v6 = vmax.f32 %v1925_v39, 0.0 }
 0x359   : > { %v2076_v55 = vmax.f32 %v1734_v45, 0.0  ;;  %v2078_v24 = vmax.f32 %v1927_v25, 0.0  ;;  %v2183_v47 = vpack.c.bf16 %v2075_v58, %v2071_v31  ;;  %v2185_v21 = vpack.c.bf16 %v2077_v6, %v2073_v26 }
 0x35b   : > { %v2184_v54 = vpack.c.bf16 %v2076_v55, %v2072_v18  ;;  %v2186_v63 = vpack.c.bf16 %v2078_v24, %v2074_v0 }
 0x35c   : > { %v1737_v1 = vpop.f32.mrf.mxu1  ;;  %v1930_v22 = vpop.f32.mrf.mxu0 }
 0x35d   : > { %2551 = vmatprep.mubr.bf16.mxu1 %v2184_v54  ;;  %2712 = vmatprep.mubr.bf16.mxu0 %v2186_v63  ;;  %v1738_v38 = vadd.f32 %v1737_v1, %v5182_v46  ;;  %v1931_v34 = vadd.f32 %v1930_v22, %v5184_v32 }
 0x35e   : > { %v1739_v10 = vpop.f32.mrf.mxu1  ;;  %v1932_v52 = vpop.f32.mrf.mxu0  ;;  %2552 = vmatmul.mubr.bf16.gmra.mxu1 %v2183_v47  ;;  %2713 = vmatmul.mubr.bf16.gmra.mxu0 %v2185_v21 }
 0x35f   : > { %v1740_v43 = vadd.f32 %v1739_v10, %v5177_v7  ;;  %v1933_v51 = vadd.f32 %v1932_v52, %v5179_v2  ;;  %v2079_v26 = vmax.f32 %v1738_v38, 0.0  ;;  %v2081_v54 = vmax.f32 %v1931_v34, 0.0 }
 0x360   : > { %v1741_v44 = vpop.f32.mrf.mxu1  ;;  %v1934_v59 = vpop.f32.mrf.mxu0 }
 0x361   : > { %v1742_v39 = vadd.f32 %v1741_v44, %v5182_v46  ;;  %v1935_v16 = vadd.f32 %v1934_v59, %v5184_v32  ;;  %v2080_v0 = vmax.f32 %v1740_v43, 0.0  ;;  %v2082_v55 = vmax.f32 %v1933_v51, 0.0 }
 0x362   : > { %v1743_v36 = vpop.f32.mrf.mxu1  ;;  %v1936_v45 = vpop.f32.mrf.mxu0 }
 0x363   : > { %v1744_v25 = vadd.f32 %v1743_v36, %v5177_v7  ;;  %v1937_v58 = vadd.f32 %v1936_v45, %v5179_v2  ;;  %v2083_v6 = vmax.f32 %v1742_v39, 0.0  ;;  %v2085_v18 = vmax.f32 %v1935_v16, 0.0 }
 0x365   : > { %v2084_v24 = vmax.f32 %v1744_v25, 0.0  ;;  %v2086_v31 = vmax.f32 %v1937_v58, 0.0  ;;  %v1747_v63 = vpop.f32.mrf.mxu1  ;;  %v1940_v47 = vpop.f32.mrf.mxu0  ;;  %v2187_v10 = vpack.c.bf16 %v2083_v6, %v2079_v26  ;;  %v2189_v22 = vpack.c.bf16 %v2085_v18, %v2081_v54 }
 0x366   : > { %v1748_v38 = vadd.f32 %v1747_v63, %v5182_v46  ;;  %v1941_v34 = vadd.f32 %v1940_v47, %v5184_v32 }
 0x367   : > { %v2188_v21 = vpack.c.bf16 %v2084_v24, %v2080_v0  ;;  %v2190_v1 = vpack.c.bf16 %v2086_v31, %v2082_v55  ;;  %v1749_v52 = vpop.f32.mrf.mxu1  ;;  %v1942_v44 = vpop.f32.mrf.mxu0 }
 0x368   : > { %v1750_v43 = vadd.f32 %v1749_v52, %v5177_v7  ;;  %v1943_v51 = vadd.f32 %v1942_v44, %v5179_v2 }
 0x369   : > { %2559 = vmatprep.mubr.bf16.mxu1 %v2188_v21  ;;  %2720 = vmatprep.mubr.bf16.mxu0 %v2190_v1  ;;  %v1751_v59 = vpop.f32.mrf.mxu1  ;;  %v1944_v36 = vpop.f32.mrf.mxu0  ;;  %v2087_v1 = vmax.f32 %v1748_v38, 0.0 }
 0x36a   : > { %2560 = vmatmul.mubr.bf16.gmra.mxu1 %v2187_v10  ;;  %2721 = vmatmul.mubr.bf16.gmra.mxu0 %v2189_v22  ;;  %v1752_v39 = vadd.f32 %v1751_v59, %v5182_v46  ;;  %v1945_v16 = vadd.f32 %v1944_v36, %v5184_v32  ;;  %v2088_v31 = vmax.f32 %v1750_v43, 0.0  ;;  %v2090_v26 = vmax.f32 %v1943_v51, 0.0 }
 0x36b   : > { %v1753_v45 = vpop.f32.mrf.mxu1  ;;  %v1946_v25 = vpop.f32.mrf.mxu0  ;;  %v2089_v10 = vmax.f32 %v1941_v34, 0.0 }
 0x36c   : > { %v1754_v58 = vadd.f32 %v1753_v45, %v5177_v7  ;;  %v1947_v6 = vadd.f32 %v1946_v25, %v5179_v2  ;;  %v2091_v18 = vmax.f32 %v1752_v39, 0.0  ;;  %v2093_v0 = vmax.f32 %v1945_v16, 0.0 }
 0x36d   : > { %v1757_v55 = vpop.f32.mrf.mxu1  ;;  %v1950_v24 = vpop.f32.mrf.mxu0 }
 0x36e   : > { %v2092_v54 = vmax.f32 %v1754_v58, 0.0  ;;  %v2094_v21 = vmax.f32 %v1947_v6, 0.0  ;;  %v2191_v44 = vpack.c.bf16 %v2091_v18, %v2087_v1  ;;  %v2193_v59 = vpack.c.bf16 %v2093_v0, %v2089_v10 }
 0x36f   : > { %v1759_v22 = vpop.f32.mrf.mxu1  ;;  %v1952_v63 = vpop.f32.mrf.mxu0  ;;  %v1758_v51 = vadd.f32 %v1757_v55, %v5182_v46  ;;  %v1951_v38 = vadd.f32 %v1950_v24, %v5184_v32 }
 0x370   : > { %v2192_v52 = vpack.c.bf16 %v2092_v54, %v2088_v31  ;;  %v2194_v47 = vpack.c.bf16 %v2094_v21, %v2090_v26  ;;  %v1760_v36 = vadd.f32 %v1759_v22, %v5177_v7  ;;  %v1953_v39 = vadd.f32 %v1952_v63, %v5179_v2 }
 0x371   : > { %v1761_v45 = vpop.f32.mrf.mxu1  ;;  %v1954_v25 = vpop.f32.mrf.mxu0  ;;  %v2095_v63 = vmax.f32 %v1758_v51, 0.0  ;;  %v2097_v55 = vmax.f32 %v1951_v38, 0.0 }
 0x372   : > { %v1762_v16 = vadd.f32 %v1761_v45, %v5182_v46  ;;  %v1955_v43 = vadd.f32 %v1954_v25, %v5184_v32  ;;  %2567 = vmatprep.mubr.bf16.mxu1 %v2192_v52  ;;  %2728 = vmatprep.mubr.bf16.mxu0 %v2194_v47  ;;  %v2096_v21 = vmax.f32 %v1760_v36, 0.0  ;;  %v2098_v1 = vmax.f32 %v1953_v39, 0.0 }
 0x373   : > { %v1763_v34 = vpop.f32.mrf.mxu1  ;;  %v1956_v58 = vpop.f32.mrf.mxu0  ;;  %2568 = vmatmul.mubr.bf16.gmra.mxu1 %v2191_v44  ;;  %2729 = vmatmul.mubr.bf16.gmra.mxu0 %v2193_v59 }
 0x374   : > { %v1764_v6 = vadd.f32 %v1763_v34, %v5177_v7  ;;  %v1957_v18 = vadd.f32 %v1956_v58, %v5179_v2  ;;  %v2099_v0 = vmax.f32 %v1762_v16, 0.0  ;;  %v2101_v31 = vmax.f32 %v1955_v43, 0.0 }
 0x375   : > { %v1767_v26 = vpop.f32.mrf.mxu1  ;;  %v1960_v54 = vpop.f32.mrf.mxu0 }
 0x376   : > { %v2100_v10 = vmax.f32 %v1764_v6, 0.0  ;;  %v2102_v22 = vmax.f32 %v1957_v18, 0.0  ;;  %v2195_v44 = vpack.c.bf16 %v2099_v0, %v2095_v63  ;;  %v2197_v59 = vpack.c.bf16 %v2101_v31, %v2097_v55 }
 0x377   : > { %v1769_v52 = vpop.f32.mrf.mxu1  ;;  %v1962_v24 = vpop.f32.mrf.mxu0  ;;  %v1768_v39 = vadd.f32 %v1767_v26, %v5182_v46  ;;  %v1961_v51 = vadd.f32 %v1960_v54, %v5184_v32 }
 0x378   : > { %v2196_v47 = vpack.c.bf16 %v2100_v10, %v2096_v21  ;;  %v2198_v45 = vpack.c.bf16 %v2102_v22, %v2098_v1  ;;  %v1770_v25 = vadd.f32 %v1769_v52, %v5177_v7  ;;  %v1963_v16 = vadd.f32 %v1962_v24, %v5179_v2 }
 0x379   : > { %v1771_v34 = vpop.f32.mrf.mxu1  ;;  %v1964_v58 = vpop.f32.mrf.mxu0  ;;  %v2103_v24 = vmax.f32 %v1768_v39, 0.0  ;;  %v2105_v26 = vmax.f32 %v1961_v51, 0.0 }
 0x37a   : > { %v1772_v43 = vadd.f32 %v1771_v34, %v5182_v46  ;;  %v1965_v36 = vadd.f32 %v1964_v58, %v5184_v32  ;;  %2575 = vmatprep.mubr.bf16.mxu1 %v2196_v47  ;;  %2736 = vmatprep.mubr.bf16.mxu0 %v2198_v45  ;;  %v2104_v22 = vmax.f32 %v1770_v25, 0.0  ;;  %v2106_v63 = vmax.f32 %v1963_v16, 0.0 }
 0x37b   : > { %v1773_v38 = vpop.f32.mrf.mxu1  ;;  %v1966_v6 = vpop.f32.mrf.mxu0  ;;  %2576 = vmatmul.mubr.bf16.gmra.mxu1 %v2195_v44  ;;  %2737 = vmatmul.mubr.bf16.gmra.mxu0 %v2197_v59 }
 0x37c   : > { %v1774_v18 = vadd.f32 %v1773_v38, %v5177_v7  ;;  %v1967_v0 = vadd.f32 %v1966_v6, %v5179_v2  ;;  %v2107_v31 = vmax.f32 %v1772_v43, 0.0  ;;  %v2109_v21 = vmax.f32 %v1965_v36, 0.0 }
 0x37d   : > { %v1777_v1 = vpop.f32.mrf.mxu1  ;;  %v1970_v10 = vpop.f32.mrf.mxu0 }
 0x37e   : > { %v2108_v55 = vmax.f32 %v1774_v18, 0.0  ;;  %v2110_v52 = vmax.f32 %v1967_v0, 0.0  ;;  %v2199_v44 = vpack.c.bf16 %v2107_v31, %v2103_v24  ;;  %v2201_v59 = vpack.c.bf16 %v2109_v21, %v2105_v26 }
 0x37f   : > { %v1779_v47 = vpop.f32.mrf.mxu1  ;;  %v1972_v54 = vpop.f32.mrf.mxu0  ;;  %v1778_v16 = vadd.f32 %v1777_v1, %v5182_v46  ;;  %v1971_v39 = vadd.f32 %v1970_v10, %v5184_v32 }
 0x380   : > { %v2200_v45 = vpack.c.bf16 %v2108_v55, %v2104_v22  ;;  %v2202_v34 = vpack.c.bf16 %v2110_v52, %v2106_v63  ;;  %v1780_v58 = vadd.f32 %v1779_v47, %v5177_v7  ;;  %v1973_v43 = vadd.f32 %v1972_v54, %v5179_v2 }
 0x381   : > { %v1781_v38 = vpop.f32.mrf.mxu1  ;;  %v1974_v6 = vpop.f32.mrf.mxu0  ;;  %v2111_v54 = vmax.f32 %v1778_v16, 0.0  ;;  %v2113_v1 = vmax.f32 %v1971_v39, 0.0 }
 0x382   : > { %v1782_v36 = vadd.f32 %v1781_v38, %v5182_v46  ;;  %v1975_v25 = vadd.f32 %v1974_v6, %v5184_v32  ;;  %2583 = vmatprep.mubr.bf16.mxu1 %v2200_v45  ;;  %2744 = vmatprep.mubr.bf16.mxu0 %v2202_v34  ;;  %v2112_v52 = vmax.f32 %v1780_v58, 0.0  ;;  %v2114_v24 = vmax.f32 %v1973_v43, 0.0 }
 0x383   : > { %v1783_v51 = vpop.f32.mrf.mxu1  ;;  %v1976_v18 = vpop.f32.mrf.mxu0  ;;  %2584 = vmatmul.mubr.bf16.gmra.mxu1 %v2199_v44  ;;  %2745 = vmatmul.mubr.bf16.gmra.mxu0 %v2201_v59 }
 0x384   : > { %v1784_v0 = vadd.f32 %v1783_v51, %v5177_v7  ;;  %v1977_v31 = vadd.f32 %v1976_v18, %v5179_v2  ;;  %v2115_v21 = vmax.f32 %v1782_v36, 0.0  ;;  %v2117_v22 = vmax.f32 %v1975_v25, 0.0 }
 0x385   : > { %v1787_v63 = vpop.f32.mrf.mxu1  ;;  %v1980_v55 = vpop.f32.mrf.mxu0 }
 0x386   : > { %v2116_v26 = vmax.f32 %v1784_v0, 0.0  ;;  %v2118_v47 = vmax.f32 %v1977_v31, 0.0  ;;  %v2203_v44 = vpack.c.bf16 %v2115_v21, %v2111_v54  ;;  %v2205_v59 = vpack.c.bf16 %v2117_v22, %v2113_v1 }
 0x387   : > { %v1789_v45 = vpop.f32.mrf.mxu1  ;;  %v1982_v10 = vpop.f32.mrf.mxu0  ;;  %v1788_v43 = vadd.f32 %v1787_v63, %v5182_v46  ;;  %v1981_v16 = vadd.f32 %v1980_v55, %v5184_v32 }
 0x388   : > { %v2204_v34 = vpack.c.bf16 %v2116_v26, %v2112_v52  ;;  %v2206_v38 = vpack.c.bf16 %v2118_v47, %v2114_v24  ;;  %v1790_v6 = vadd.f32 %v1789_v45, %v5177_v7  ;;  %v1983_v36 = vadd.f32 %v1982_v10, %v5179_v2 }
 0x389   : > { %v1791_v51 = vpop.f32.mrf.mxu1  ;;  %v1984_v18 = vpop.f32.mrf.mxu0  ;;  %v2119_v10 = vmax.f32 %v1788_v43, 0.0  ;;  %v2121_v63 = vmax.f32 %v1981_v16, 0.0 }
 0x38a   : > { %v1792_v25 = vadd.f32 %v1791_v51, %v5182_v46  ;;  %v1985_v58 = vadd.f32 %v1984_v18, %v5184_v32  ;;  %2591 = vmatprep.mubr.bf16.mxu1 %v2204_v34  ;;  %2752 = vmatprep.mubr.bf16.mxu0 %v2206_v38  ;;  %v2120_v47 = vmax.f32 %v1790_v6, 0.0  ;;  %v2122_v54 = vmax.f32 %v1983_v36, 0.0 }
 0x38b   : > { %v1793_v39 = vpop.f32.mrf.mxu1  ;;  %v1986_v0 = vpop.f32.mrf.mxu0  ;;  %2592 = vmatmul.mubr.bf16.gmra.mxu1 %v2203_v44  ;;  %2753 = vmatmul.mubr.bf16.gmra.mxu0 %v2205_v59 }
 0x38c   : > { %v1794_v31 = vadd.f32 %v1793_v39, %v5177_v7  ;;  %v1987_v21 = vadd.f32 %v1986_v0, %v5179_v2  ;;  %v2123_v22 = vmax.f32 %v1792_v25, 0.0  ;;  %v2125_v52 = vmax.f32 %v1985_v58, 0.0 }
 0x38d   : > { %v1797_v24 = vpop.f32.mrf.mxu1  ;;  %v1990_v26 = vpop.f32.mrf.mxu0 }
 0x38e   : > { %v2124_v1 = vmax.f32 %v1794_v31, 0.0  ;;  %v2126_v45 = vmax.f32 %v1987_v21, 0.0  ;;  %v2207_v44 = vpack.c.bf16 %v2123_v22, %v2119_v10  ;;  %v2209_v59 = vpack.c.bf16 %v2125_v52, %v2121_v63 }
 0x38f   : > { %v1799_v34 = vpop.f32.mrf.mxu1  ;;  %v1992_v55 = vpop.f32.mrf.mxu0  ;;  %v1798_v36 = vadd.f32 %v1797_v24, %v5182_v46  ;;  %v1991_v43 = vadd.f32 %v1990_v26, %v5184_v32 }
 0x390   : > { %v2208_v38 = vpack.c.bf16 %v2124_v1, %v2120_v47  ;;  %v2210_v51 = vpack.c.bf16 %v2126_v45, %v2122_v54  ;;  %v1800_v18 = vadd.f32 %v1799_v34, %v5177_v7  ;;  %v1993_v25 = vadd.f32 %v1992_v55, %v5179_v2 }
 0x391   : > { %v1801_v39 = vpop.f32.mrf.mxu1  ;;  %v1994_v0 = vpop.f32.mrf.mxu0  ;;  %v2127_v55 = vmax.f32 %v1798_v36, 0.0  ;;  %v2129_v24 = vmax.f32 %v1991_v43, 0.0 }
 0x392   : > { %v1802_v58 = vadd.f32 %v1801_v39, %v5182_v46  ;;  %v1995_v6 = vadd.f32 %v1994_v0, %v5184_v32  ;;  %2599 = vmatprep.mubr.bf16.mxu1 %v2208_v38  ;;  %2760 = vmatprep.mubr.bf16.mxu0 %v2210_v51  ;;  %v2128_v45 = vmax.f32 %v1800_v18, 0.0  ;;  %v2130_v10 = vmax.f32 %v1993_v25, 0.0 }
 0x393   : > { %v1803_v16 = vpop.f32.mrf.mxu1  ;;  %v1996_v31 = vpop.f32.mrf.mxu0  ;;  %2600 = vmatmul.mubr.bf16.gmra.mxu1 %v2207_v44  ;;  %2761 = vmatmul.mubr.bf16.gmra.mxu0 %v2209_v59 }
 0x394   : > { %v1804_v21 = vadd.f32 %v1803_v16, %v5177_v7  ;;  %v1997_v22 = vadd.f32 %v1996_v31, %v5179_v2  ;;  %v2131_v52 = vmax.f32 %v1802_v58, 0.0  ;;  %v2133_v47 = vmax.f32 %v1995_v6, 0.0 }
 0x395   : > { %v1807_v54 = vpop.f32.mrf.mxu1  ;;  %v2000_v1 = vpop.f32.mrf.mxu0 }
 0x396   : > { %v2132_v63 = vmax.f32 %v1804_v21, 0.0  ;;  %v2134_v34 = vmax.f32 %v1997_v22, 0.0  ;;  %v2211_v44 = vpack.c.bf16 %v2131_v52, %v2127_v55  ;;  %v2213_v59 = vpack.c.bf16 %v2133_v47, %v2129_v24 }
 0x397   : > { %v1809_v38 = vpop.f32.mrf.mxu1  ;;  %v2002_v26 = vpop.f32.mrf.mxu0  ;;  %v1808_v25 = vadd.f32 %v1807_v54, %v5182_v46  ;;  %v2001_v36 = vadd.f32 %v2000_v1, %v5184_v32 }
 0x398   : > { %v2212_v51 = vpack.c.bf16 %v2132_v63, %v2128_v45  ;;  %v2214_v39 = vpack.c.bf16 %v2134_v34, %v2130_v10  ;;  %v1810_v0 = vadd.f32 %v1809_v38, %v5177_v7  ;;  %v2003_v58 = vadd.f32 %v2002_v26, %v5179_v2 }
 0x399   : > { %v1811_v16 = vpop.f32.mrf.mxu1  ;;  %v2004_v31 = vpop.f32.mrf.mxu0  ;;  %v2135_v26 = vmax.f32 %v1808_v25, 0.0  ;;  %v2137_v54 = vmax.f32 %v2001_v36, 0.0 }
 0x39a   : > { %v1812_v6 = vadd.f32 %v1811_v16, %v5182_v46  ;;  %v2005_v18 = vadd.f32 %v2004_v31, %v5184_v32  ;;  %2607 = vmatprep.mubr.bf16.mxu1 %v2212_v51  ;;  %2768 = vmatprep.mubr.bf16.mxu0 %v2214_v39  ;;  %v2136_v34 = vmax.f32 %v1810_v0, 0.0  ;;  %v2138_v55 = vmax.f32 %v2003_v58, 0.0 }
 0x39b   : > { %v1813_v43 = vpop.f32.mrf.mxu1  ;;  %v2006_v21 = vpop.f32.mrf.mxu0  ;;  %2608 = vmatmul.mubr.bf16.gmra.mxu1 %v2211_v44  ;;  %2769 = vmatmul.mubr.bf16.gmra.mxu0 %v2213_v59 }
 0x39c   : > { %v1814_v22 = vadd.f32 %v1813_v43, %v5177_v7  ;;  %v2007_v52 = vadd.f32 %v2006_v21, %v5179_v2  ;;  %v2139_v47 = vmax.f32 %v1812_v6, 0.0  ;;  %v2141_v45 = vmax.f32 %v2005_v18, 0.0 }
 0x39d   : > { %v1817_v10 = vpop.f32.mrf.mxu1  ;;  %v2010_v63 = vpop.f32.mrf.mxu0 }
 0x39e   : > { %v2140_v24 = vmax.f32 %v1814_v22, 0.0  ;;  %v2142_v38 = vmax.f32 %v2007_v52, 0.0  ;;  %v2215_v44 = vpack.c.bf16 %v2139_v47, %v2135_v26  ;;  %v2217_v59 = vpack.c.bf16 %v2141_v45, %v2137_v54 }
 0x39f   : > { %v1819_v51 = vpop.f32.mrf.mxu1  ;;  %v2012_v1 = vpop.f32.mrf.mxu0  ;;  %v1818_v58 = vadd.f32 %v1817_v10, %v5182_v46  ;;  %v2011_v25 = vadd.f32 %v2010_v63, %v5184_v32 }
 0x3a0   : > { %v2216_v39 = vpack.c.bf16 %v2140_v24, %v2136_v34  ;;  %v2218_v16 = vpack.c.bf16 %v2142_v38, %v2138_v55  ;;  %v1820_v31 = vadd.f32 %v1819_v51, %v5177_v7  ;;  %v2013_v6 = vadd.f32 %v2012_v1, %v5179_v2 }
 0x3a1   : > { %v1821_v43 = vpop.f32.mrf.mxu1  ;;  %v2014_v21 = vpop.f32.mrf.mxu0  ;;  %v2143_v1 = vmax.f32 %v1818_v58, 0.0  ;;  %v2145_v10 = vmax.f32 %v2011_v25, 0.0 }
 0x3a2   : > { %v1822_v18 = vadd.f32 %v1821_v43, %v5182_v46  ;;  %v2015_v0 = vadd.f32 %v2014_v21, %v5184_v32  ;;  %2615 = vmatprep.mubr.bf16.mxu1 %v2216_v39  ;;  %2776 = vmatprep.mubr.bf16.mxu0 %v2218_v16  ;;  %v2144_v38 = vmax.f32 %v1820_v31, 0.0  ;;  %v2146_v26 = vmax.f32 %v2013_v6, 0.0 }
 0x3a3   : > { %v1823_v36 = vpop.f32.mrf.mxu1  ;;  %v2016_v22 = vpop.f32.mrf.mxu0  ;;  %2616 = vmatmul.mubr.bf16.gmra.mxu1 %v2215_v44  ;;  %2777 = vmatmul.mubr.bf16.gmra.mxu0 %v2217_v59 }
 0x3a4   : > { %v1824_v52 = vadd.f32 %v1823_v36, %v5177_v7  ;;  %v2017_v47 = vadd.f32 %v2016_v22, %v5179_v2  ;;  %v2147_v45 = vmax.f32 %v1822_v18, 0.0  ;;  %v2149_v34 = vmax.f32 %v2015_v0, 0.0 }
 0x3a5   : > { %v1827_v55 = vpop.f32.mrf.mxu1  ;;  %v2020_v24 = vpop.f32.mrf.mxu0 }
 0x3a6   : > { %v2148_v54 = vmax.f32 %v1824_v52, 0.0  ;;  %v2150_v51 = vmax.f32 %v2017_v47, 0.0  ;;  %v2219_v44 = vpack.c.bf16 %v2147_v45, %v2143_v1  ;;  %v2221_v59 = vpack.c.bf16 %v2149_v34, %v2145_v10 }
 0x3a7   : > { %v1829_v39 = vpop.f32.mrf.mxu1  ;;  %v2022_v63 = vpop.f32.mrf.mxu0  ;;  %v1828_v6 = vadd.f32 %v1827_v55, %v5182_v46  ;;  %v2021_v58 = vadd.f32 %v2020_v24, %v5184_v32 }
 0x3a8   : > { %v2220_v16 = vpack.c.bf16 %v2148_v54, %v2144_v38  ;;  %v2222_v43 = vpack.c.bf16 %v2150_v51, %v2146_v26  ;;  %v1830_v21 = vadd.f32 %v1829_v39, %v5177_v7  ;;  %v2023_v18 = vadd.f32 %v2022_v63, %v5179_v2 }
 0x3a9   : > { %v1831_v36 = vpop.f32.mrf.mxu1  ;;  %v2024_v22 = vpop.f32.mrf.mxu0  ;;  %v2151_v63 = vmax.f32 %v1828_v6, 0.0  ;;  %v2153_v55 = vmax.f32 %v2021_v58, 0.0 }
 0x3aa   : > { %v1832_v0 = vadd.f32 %v1831_v36, %v5182_v46  ;;  %v2025_v31 = vadd.f32 %v2024_v22, %v5184_v32  ;;  %2623 = vmatprep.mubr.bf16.mxu1 %v2220_v16  ;;  %2784 = vmatprep.mubr.bf16.mxu0 %v2222_v43  ;;  %v2152_v51 = vmax.f32 %v1830_v21, 0.0  ;;  %v2154_v1 = vmax.f32 %v2023_v18, 0.0 }
 0x3ab   : > { %v1833_v25 = vpop.f32.mrf.mxu1  ;;  %v2026_v52 = vpop.f32.mrf.mxu0  ;;  %2624 = vmatmul.mubr.bf16.gmra.mxu1 %v2219_v44  ;;  %2785 = vmatmul.mubr.bf16.gmra.mxu0 %v2221_v59 }
 0x3ac   : > { %v1834_v47 = vadd.f32 %v1833_v25, %v5177_v7  ;;  %v2027_v45 = vadd.f32 %v2026_v52, %v5179_v2  ;;  %v2155_v34 = vmax.f32 %v1832_v0, 0.0  ;;  %v2157_v38 = vmax.f32 %v2025_v31, 0.0 }
 0x3ad   : > { %v1837_v26 = vpop.f32.mrf.mxu1  ;;  %v2030_v54 = vpop.f32.mrf.mxu0 }
 0x3ae   : > { %v2156_v10 = vmax.f32 %v1834_v47, 0.0  ;;  %v2158_v39 = vmax.f32 %v2027_v45, 0.0  ;;  %v2223_v44 = vpack.c.bf16 %v2155_v34, %v2151_v63  ;;  %v2225_v59 = vpack.c.bf16 %v2157_v38, %v2153_v55 }
 0x3af   : > { %v1839_v16 = vpop.f32.mrf.mxu1  ;;  %v2032_v24 = vpop.f32.mrf.mxu0  ;;  %v1838_v18 = vadd.f32 %v1837_v26, %v5182_v46  ;;  %v2031_v6 = vadd.f32 %v2030_v54, %v5184_v32 }
 0x3b0   : > { %v2224_v43 = vpack.c.bf16 %v2156_v10, %v2152_v51  ;;  %v2226_v36 = vpack.c.bf16 %v2158_v39, %v2154_v1  ;;  %v1840_v22 = vadd.f32 %v1839_v16, %v5177_v7  ;;  %v2033_v0 = vadd.f32 %v2032_v24, %v5179_v2 }
 0x3b1   : > { %v1841_v25 = vpop.f32.mrf.mxu1  ;;  %v2034_v52 = vpop.f32.mrf.mxu0  ;;  %v2159_v55 = vmax.f32 %v1838_v18, 0.0  ;;  %v2161_v16 = vmax.f32 %v2031_v6, 0.0 }
 0x3b2   : > { %v1842_v31 = vadd.f32 %v1841_v25, %v5182_v46  ;;  %v2035_v21 = vadd.f32 %v2034_v52, %v5184_v32  ;;  %2631 = vmatprep.mubr.bf16.mxu1 %v2224_v43  ;;  %2792 = vmatprep.mubr.bf16.mxu0 %v2226_v36  ;;  %v2160_v1 = vmax.f32 %v1840_v22, 0.0  ;;  %v2162_v10 = vmax.f32 %v2033_v0, 0.0 }
 0x3b3   : > { %v1843_v58 = vpop.f32.mrf.mxu1  ;;  %v2036_v47 = vpop.f32.mrf.mxu0  ;;  %2632 = vmatmul.mubr.bf16.gmra.mxu1 %v2223_v44  ;;  %2793 = vmatmul.mubr.bf16.gmra.mxu0 %v2225_v59 }
 0x3b4   : > { %v1844_v45 = vadd.f32 %v1843_v58, %v5177_v7  ;;  %v2037_v34 = vadd.f32 %v2036_v47, %v5179_v2  ;;  %v2163_v38 = vmax.f32 %v1842_v31, 0.0  ;;  %v2165_v51 = vmax.f32 %v2035_v21, 0.0 }
 0x3b6   : > { %v2164_v39 = vmax.f32 %v1844_v45, 0.0  ;;  %v2166_v63 = vmax.f32 %v2037_v34, 0.0  ;;  %v2227_v26 = vpack.c.bf16 %v2163_v38, %v2159_v55  ;;  %v2229_v32 = vpack.c.bf16 %v2165_v51, %v2161_v16 }
 0x3b8   : > { %v2228_v24 = vpack.c.bf16 %v2164_v39, %v2160_v1  ;;  %v2230_v46 = vpack.c.bf16 %v2166_v63, %v2162_v10 }
 0x3ba   : > { %2639 = vmatprep.mubr.bf16.mxu1 %v2228_v24  ;;  %2800 = vmatprep.mubr.bf16.mxu0 %v2230_v46 }
 0x3bb   : > { %2640 = vmatmul.mubr.bf16.gmra.mxu1 %v2227_v26  ;;  %2801 = vmatmul.mubr.bf16.gmra.mxu0 %v2229_v32 }
 0x3fb   : > { %v3631_v54 = vpop.f32.mrf.mxu1  ;;  %v3743_v7 = vpop.f32.mrf.mxu0 }
 0x3fd   : > { %v3632_v43 = vpop.f32.mrf.mxu1  ;;  %v3744_v2 = vpop.f32.mrf.mxu0 }
 0x3fe   : > { %v3633_v36 = vadd.f32 %v3632_v43, %v3631_v54  ;;  %v3745_v58 = vadd.f32 %v3744_v2, %v3743_v7 }
 0x3ff   : > { %v3634_v44 = vpop.f32.mrf.mxu1  ;;  %v3746_v59 = vpop.f32.mrf.mxu0 }
 0x400   : > { %v2522_v0 = vadd.f32 %v3633_v36, %v4827_v13 }
 0x401   : > { %v3635_v22 = vpop.f32.mrf.mxu1  ;;  %v3747_v25 = vpop.f32.mrf.mxu0 }
 0x402   : > { %v3636_v52 = vadd.f32 %v3635_v22, %v3634_v44  ;;  %v3748_v6 = vadd.f32 %v3747_v25, %v3746_v59  ;;  %v5318_v51 = vadd.f32 %v3745_v58, %v2522_v0 }
 0x403   : > { %v3637_v31 = vpop.f32.mrf.mxu1  ;;  %v3749_v21 = vpop.f32.mrf.mxu0 }
 0x404   : > { %v2525_v18 = vadd.f32 %v3636_v52, %v4823_v27  ;;  %v2881_v46 = vmul.f32 %v5318_v51, %v5318_v51 }
 0x405   : > { %v3638_v47 = vpop.f32.mrf.mxu1  ;;  %v3750_v45 = vpop.f32.mrf.mxu0 }
 0x406   : > { %v5316_v34 = vadd.f32 %v3748_v6, %v2525_v18  ;;  %v3639_v38 = vadd.f32 %v3638_v47, %v3637_v31  ;;  %v3751_v63 = vadd.f32 %v3750_v45, %v3749_v21 }
 0x407   : > { %v3640_v1 = vpop.f32.mrf.mxu1  ;;  %v3752_v10 = vpop.f32.mrf.mxu0 }
 0x408   : > { %v2530_v39 = vadd.f32 %v3639_v38, %v4843_v20  ;;  %v2882_v16 = vmul.f32 %v5316_v34, %v5316_v34  ;;  %v2809_v54 = vadd.f32 %v5316_v34, %v5318_v51 }
 0x409   : > { %v3641_v55 = vpop.f32.mrf.mxu1  ;;  %v3753_v13 = vpop.f32.mrf.mxu0 }
 0x40a   : > { %v5323_v27 = vadd.f32 %v3751_v63, %v2530_v39  ;;  %v3642_v24 = vadd.f32 %v3641_v55, %v3640_v1  ;;  %v3754_v43 = vadd.f32 %v3753_v13, %v3752_v10  ;;  %v2913_v44 = vadd.f32 %v2882_v16, %v2881_v46 }
 0x40b   : > { %v3643_v26 = vpop.f32.mrf.mxu1  ;;  %v3755_v32 = vpop.f32.mrf.mxu0 }
 0x40c   : > { %v2883_v20 = vmul.f32 %v5323_v27, %v5323_v27  ;;  %v2533_v7 = vadd.f32 %v3642_v24, %v4847_v41  ;;  %v2810_v59 = vadd.f32 %v2809_v54, %v5323_v27 }
 0x40d   : > { %v3644_v2 = vpop.f32.mrf.mxu1  ;;  %v3756_v36 = vpop.f32.mrf.mxu0 }
 0x40e   : > { %v5333_v22 = vadd.f32 %v3754_v43, %v2533_v7  ;;  %v3645_v25 = vadd.f32 %v3644_v2, %v3643_v26  ;;  %v2914_v31 = vadd.f32 %v2913_v44, %v2883_v20  ;;  %v3757_v16 = vadd.f32 %v3756_v36, %v3755_v32 }
 0x40f   : > { %v3646_v52 = vpop.f32.mrf.mxu1  ;;  %v3758_v0 = vpop.f32.mrf.mxu0 }
 0x410   : > { %v2811_v21 = vadd.f32 %v2810_v59, %v5333_v22  ;;  %v2884_v18 = vmul.f32 %v5333_v22, %v5333_v22  ;;  %v2538_v38 = vadd.f32 %v3645_v25, %v4883_v12 }
 0x411   : > { %v3647_v6 = vpop.f32.mrf.mxu1  ;;  %v3759_v58 = vpop.f32.mrf.mxu0 }
 0x412   : > { %v2812_v41 = vrot.slane %v2811_v21, 4  ;;  %v2915_v47 = vadd.f32 %v2914_v31, %v2884_v18  ;;  %v3648_v45 = vadd.f32 %v3647_v6, %v3646_v52  ;;  %v3760_v13 = vadd.f32 %v3759_v58, %v3758_v0 }
 0x413   : > { %v3649_v1 = vpop.f32.mrf.mxu1  ;;  %v3761_v10 = vpop.f32.mrf.mxu0  ;;  %v5342_v43 = vadd.f32 %v3757_v16, %v2538_v38 }
 0x414   : > { %v2813_v39 = vadd.f32 %v2812_v41, %v2811_v21  ;;  %v2916_v63 = vrot.slane %v2915_v47, 4  ;;  %v2541_v55 = vadd.f32 %v3648_v45, %v4885_v35 }
 0x415   : > { %v3650_v24 = vpop.f32.mrf.mxu1  ;;  %v3762_v46 = vpop.f32.mrf.mxu0  ;;  %v2885_v18 = vmul.f32 %v5342_v43, %v5342_v43 }
 0x416   : > { %v2814_v26 = vrot.slane %v2813_v39, 2  ;;  %v2917_v54 = vadd.f32 %v2916_v63, %v2915_v47  ;;  %v5340_v20 = vadd.f32 %v3760_v13, %v2541_v55  ;;  %v3651_v7 = vadd.f32 %v3650_v24, %v3649_v1 }
 0x417   : > { %v3652_v2 = vpop.f32.mrf.mxu1  ;;  %v3764_v44 = vpop.f32.mrf.mxu0  ;;  %v3763_v52 = vadd.f32 %v3762_v46, %v3761_v10 }
 0x418   : > { %v2815_v12 = vadd.f32 %v2814_v26, %v2813_v39  ;;  %v2918_v59 = vrot.slane %v2917_v54, 2  ;;  %v2886_v25 = vmul.f32 %v5340_v20, %v5340_v20  ;;  %v2546_v35 = vadd.f32 %v3651_v7, %v4898_v60 }
 0x419   : > { %v3653_v32 = vpop.f32.mrf.mxu1  ;;  %v3765_v36 = vpop.f32.mrf.mxu0  ;;  %v2818_v6 = vadd.f32 %v5340_v20, %v5342_v43 }
 0x41a   : > { %v2816_v0 = vrot.slane %v2815_v12, 1  ;;  %v2919_v31 = vadd.f32 %v2918_v59, %v2917_v54  ;;  %v3654_v21 = vadd.f32 %v3653_v32, %v3652_v2  ;;  %v5351_v58 = vadd.f32 %v3763_v52, %v2546_v35 }
 0x41b   : > { %v3766_v38 = vadd.f32 %v3765_v36, %v3764_v44  ;;  %v2922_v60 = vadd.f32 %v2886_v25, %v2885_v18 }
 0x41c   : > { %v2817_v41 = vadd.f32 %v2816_v0, %v2815_v12  ;;  %v2920_v47 = vrot.slane %v2919_v31, 1  ;;  %v2549_v45 = vadd.f32 %v3654_v21, %v4901_v33  ;;  %v2887_v1 = vmul.f32 %v5351_v58, %v5351_v58 }
 0x41d   : > { %v2819_v63 = vadd.f32 %v2818_v6, %v5351_v58 }
 0x41e   : > { %v2921_v10 = vadd.f32 %v2920_v47, %v2919_v31  ;;  %v5356_v39 = vmul.f32 0.03125, %v2817_v41  ;;  %v5359_v55 = vadd.f32 %v3766_v38, %v2549_v45  ;;  %v3655_v13 = vpop.f32.mrf.mxu1  ;;  %v3767_v16 = vpop.f32.mrf.mxu0  ;;  %v2923_v24 = vadd.f32 %v2922_v60, %v2887_v1 }
 0x420   : > { %v2993_v46 = vmul.f32 0.03125, %v2921_v10  ;;  %v3001_v26 = vmul.f32 %v5356_v39, %v5356_v39  ;;  %v2820_v33 = vadd.f32 %v2819_v63, %v5359_v55  ;;  %v2888_v54 = vmul.f32 %v5359_v55, %v5359_v55  ;;  %v3656_v7 = vpop.f32.mrf.mxu1  ;;  %v3768_v2 = vpop.f32.mrf.mxu0 }
 0x421   : > { %v3657_v41 = vadd.f32 %v3656_v7, %v3655_v13 }
 0x422   : > { %v3009_v44 = vsub.f32 %v2993_v46, %v3001_v26  ;;  %v2821_v12 = vrot.slane %v2820_v33, 4  ;;  %v2924_v59 = vadd.f32 %v2923_v24, %v2888_v54  ;;  %v3658_v25 = vpop.f32.mrf.mxu1  ;;  %v3770_v35 = vpop.f32.mrf.mxu0 }
 0x423   : > { %v2554_v63 = vadd.f32 %v3657_v41, %v4964_v4 }
 0x424   : > { %v3017_v52 = vmax.f32 %v3009_v44, 0.0  ;;  %v2822_v32 = vadd.f32 %v2821_v12, %v2820_v33  ;;  %v2925_v36 = vrot.slane %v2924_v59, 4  ;;  %v3659_v0 = vpop.f32.mrf.mxu1  ;;  %v3771_v47 = vpop.f32.mrf.mxu0  ;;  %v3769_v44 = vadd.f32 %v3768_v2, %v3767_v16 }
 0x425   : > { %v3660_v31 = vadd.f32 %v3659_v0, %v3658_v25  ;;  %v3772_v26 = vadd.f32 %v3771_v47, %v3770_v35 }
 0x426   : > { %v3025_v21 = vadd.f32 1e-05, %v3017_v52  ;;  %v2823_v18 = vrot.slane %v2822_v32, 2  ;;  %v2926_v6 = vadd.f32 %v2925_v36, %v2924_v59 }
 0x427   : > { %v2557_v60 = vadd.f32 %v3660_v31, %v4977_v11 }
 0x428   : > { %4151 = vrsqrt.f32 %v3025_v21  ;;  %v2824_v45 = vadd.f32 %v2823_v18, %v2822_v32  ;;  %v2927_v38 = vrot.slane %v2926_v6, 2  ;;  %v5372_v32 = vadd.f32 %v3769_v44, %v2554_v63 }
 0x429   : > { %v5368_v59 = vadd.f32 %v3772_v26, %v2557_v60 }
 0x42a   : > { %v2825_v1 = vrot.slane %v2824_v45, 1  ;;  %v2928_v10 = vadd.f32 %v2927_v38, %v2926_v6  ;;  %v3661_v24 = vpop.f32.mrf.mxu1  ;;  %v3773_v46 = vpop.f32.mrf.mxu0  ;;  %v2889_v47 = vmul.f32 %v5372_v32, %v5372_v32 }
 0x42b   : > { %v2890_v21 = vmul.f32 %v5368_v59, %v5368_v59 }
 0x42c   : > { %v2826_v33 = vadd.f32 %v2825_v1, %v2824_v45  ;;  %v2929_v54 = vrot.slane %v2928_v10, 1  ;;  %v3662_v12 = vpop.f32.mrf.mxu1  ;;  %v3774_v25 = vpop.f32.mrf.mxu0  ;;  %v2827_v45 = vadd.f32 %v5368_v59, %v5372_v32 }
 0x42d   : > { %v3663_v13 = vadd.f32 %v3662_v12, %v3661_v24  ;;  %v3775_v0 = vadd.f32 %v3774_v25, %v3773_v46  ;;  %v2931_v26 = vadd.f32 %v2890_v21, %v2889_v47 }
 0x42e   : > { %v2930_v7 = vadd.f32 %v2929_v54, %v2928_v10  ;;  %v5370_v52 = vmul.f32 0.03125, %v2826_v33  ;;  %v3664_v11 = vpop.f32.mrf.mxu1  ;;  %v3776_v36 = vpop.f32.mrf.mxu0 }
 0x42f   : > { %v2562_v4 = vadd.f32 %v3663_v13, %v5021_v29  ;;  %v5386_v29 = vld [vmem:[%s5701_s5 + $0x3] sm:$0x1] }
 0x430   : > { %v2994_v31 = vmul.f32 0.03125, %v2930_v7  ;;  %v3002_v35 = vmul.f32 %v5370_v52, %v5370_v52  ;;  %v3665_v16 = vpop.f32.mrf.mxu1  ;;  %v3777_v2 = vpop.f32.mrf.mxu0  ;;  %v5400_v7 = vld [vmem:[%s5701_s5 + $0x4] sm:$0x1] }
 0x431   : > { %v5379_v18 = vadd.f32 %v3775_v0, %v2562_v4  ;;  %v3666_v6 = vadd.f32 %v3665_v16, %v3664_v11  ;;  %v3778_v1 = vadd.f32 %v3777_v2, %v3776_v36 }
 0x432   : > { %v3010_v41 = vsub.f32 %v2994_v31, %v3002_v35 }
 0x433   : > { %v2891_v38 = vmul.f32 %v5379_v18, %v5379_v18  ;;  %v2565_v60 = vadd.f32 %v3666_v6, %v5028_v17  ;;  %v3667_v63 = vpop.f32.mrf.mxu1  ;;  %v3779_v24 = vpop.f32.mrf.mxu0  ;;  %v2828_v33 = vadd.f32 %v2827_v45, %v5379_v18 }
 0x434   : > { %v3018_v10 = vmax.f32 %v3010_v41, 0.0 }
 0x435   : > { %v4152_v46 = vpop.eup %4151  ;;  %v5394_v54 = vadd.f32 %v3778_v1, %v2565_v60  ;;  %v3668_v25 = vpop.f32.mrf.mxu1  ;;  %v2932_v17 = vadd.f32 %v2931_v26, %v2891_v38 }
 0x436   : > { %v3041_v44 = vmul.f32 %v4152_v46, %v5386_v29  ;;  %v3026_v12 = vadd.f32 1e-05, %v3018_v10  ;;  %v3780_v13 = vpop.f32.mrf.mxu0  ;;  %v3669_v4 = vadd.f32 %v3668_v25, %v3667_v63 }
 0x437   : > { %v2829_v11 = vadd.f32 %v2828_v33, %v5394_v54  ;;  %v2892_v36 = vmul.f32 %v5394_v54, %v5394_v54  ;;  %v3670_v35 = vpop.f32.mrf.mxu1  ;;  %v3781_v25 = vadd.f32 %v3780_v13, %v3779_v24 }
 0x438   : > { %v3049_v0 = vmul.f32 %v3041_v44, %v5356_v39  ;;  %v3068_v31 = vrot.slane %v3041_v44, %v4787_v61  ;;  %4153 = vrsqrt.f32 %v3026_v12  ;;  %v3782_v16 = vpop.f32.mrf.mxu0  ;;  %v2570_v41 = vadd.f32 %v3669_v4, %v5047_v48 }
 0x439   : > { %v2830_v2 = vrot.slane %v2829_v11, 4  ;;  %v2933_v21 = vadd.f32 %v2932_v17, %v2892_v36  ;;  %v3671_v47 = vpop.f32.mrf.mxu1 }
 0x43a   : > { %v3057_v6 = vsub.f32 %v5400_v7, %v3049_v0  ;;  %v3783_v45 = vpop.f32.mrf.mxu0  ;;  %v3097_v38 = vmul.f32 %v3068_v31, %v5318_v51  ;;  %v3098_v60 = vmul.f32 %v3068_v31, %v5316_v34  ;;  %v3099_v39 = vmul.f32 %v3068_v31, %v5323_v27 }
 0x43b   : > { %v2831_v1 = vadd.f32 %v2830_v2, %v2829_v11  ;;  %v2934_v10 = vrot.slane %v2933_v21, 4  ;;  %v3100_v63 = vmul.f32 %v3068_v31, %v5333_v22  ;;  %v3672_v26 = vadd.f32 %v3671_v47, %v3670_v35  ;;  %v3673_v33 = vpop.f32.mrf.mxu1 }
 0x43c   : > { %v3132_v46 = vrot.slane %v3057_v6, %v4787_v61  ;;  %v3785_v44 = vpop.f32.mrf.mxu0  ;;  %v3784_v17 = vadd.f32 %v3783_v45, %v3782_v16  ;;  %v5423_v24 = vadd.f32 %v3781_v25, %v2570_v41 }
 0x43d   : > { %v2832_v12 = vrot.slane %v2831_v1, 2  ;;  %v2935_v48 = vadd.f32 %v2934_v10, %v2933_v21  ;;  %v3674_v11 = vpop.f32.mrf.mxu1  ;;  %v2573_v22 = vadd.f32 %v3672_v26, %v5051_v9 }
 0x43e   : > { %v3161_v36 = vadd.f32 %v3132_v46, %v3097_v38  ;;  %v3162_v51 = vadd.f32 %v3132_v46, %v3098_v60  ;;  %v3163_v4 = vadd.f32 %v3132_v46, %v3099_v39  ;;  %v3164_v34 = vadd.f32 %v3132_v46, %v3100_v63  ;;  %v3786_v0 = vpop.f32.mrf.mxu0 }
 0x43f   : > { %v2833_v2 = vadd.f32 %v2832_v12, %v2831_v1  ;;  %v2936_v27 = vrot.slane %v2935_v48, 2  ;;  %v3675_v31 = vadd.f32 %v3674_v11, %v3673_v33  ;;  %v3676_v13 = vpop.f32.mrf.mxu1  ;;  %v5425_v6 = vadd.f32 %v3784_v17, %v2573_v22 }
 0x440   : > { %3193 = vst [vmem:[%s5417_s12] sm:$0xff] %v3161_v36  ;;  %3194 = vst [vmem:[%s5417_s12 + $0x8] sm:$0xff] %v3162_v51  ;;  %v3788_v35 = vpop.f32.mrf.mxu0  ;;  %v3787_v47 = vadd.f32 %v3786_v0, %v3785_v44 }
 0x441   : > { %3195 = vst [vmem:[%s5417_s12 + $0x10] sm:$0xff] %v3163_v4  ;;  %3196 = vst [vmem:[%s5417_s12 + $0x18] sm:$0xff] %v3164_v34  ;;  %v2834_v16 = vrot.slane %v2833_v2, 1  ;;  %v2937_v21 = vadd.f32 %v2936_v27, %v2935_v48  ;;  %v2578_v9 = vadd.f32 %v3675_v31, %v5063_v40  ;;  %v3677_v45 = vpop.f32.mrf.mxu1  ;;  %v2894_v10 = vmul.f32 %v5425_v6, %v5425_v6 }
 0x442   : > { %v3789_v38 = vpop.f32.mrf.mxu0  ;;  %v3678_v41 = vadd.f32 %v3677_v45, %v3676_v13  ;;  %v2893_v40 = vmul.f32 %v5423_v24, %v5423_v24  ;;  %v2836_v11 = vadd.f32 %v5425_v6, %v5423_v24 }
 0x443   : > { %v2835_v60 = vadd.f32 %v2834_v16, %v2833_v2  ;;  %v2938_v1 = vrot.slane %v2937_v21, 1  ;;  %v5430_v39 = vadd.f32 %v3787_v47, %v2578_v9  ;;  %v3679_v63 = vpop.f32.mrf.mxu1  ;;  %v3790_v17 = vadd.f32 %v3789_v38, %v3788_v35 }
 0x444   : > { %v3791_v46 = vpop.f32.mrf.mxu0  ;;  %v2581_v25 = vadd.f32 %v3678_v41, %v5065_v28  ;;  %v2940_v22 = vadd.f32 %v2894_v10, %v2893_v40 }
 0x445   : > { %v4154_v26 = vpop.eup %4153  ;;  %v2939_v33 = vadd.f32 %v2938_v1, %v2937_v21  ;;  %v5432_v12 = vmul.f32 0.03125, %v2835_v60  ;;  %v2895_v48 = vmul.f32 %v5430_v39, %v5430_v39  ;;  %v3680_v36 = vpop.f32.mrf.mxu1  ;;  %v2837_v16 = vadd.f32 %v2836_v11, %v5430_v39 }
 0x446   : > { %v3042_v44 = vmul.f32 %v4154_v26, %v5386_v29  ;;  %v3792_v51 = vpop.f32.mrf.mxu0  ;;  %v3681_v0 = vadd.f32 %v3680_v36, %v3679_v63  ;;  %v5446_v31 = vadd.f32 %v3790_v17, %v2581_v25 }
 0x447   : > { %v2995_v4 = vmul.f32 0.03125, %v2939_v33  ;;  %v3003_v34 = vmul.f32 %v5432_v12, %v5432_v12  ;;  %v3682_v13 = vpop.f32.mrf.mxu1  ;;  %v2941_v47 = vadd.f32 %v2940_v22, %v2895_v48  ;;  %v3793_v25 = vadd.f32 %v3792_v51, %v3791_v46 }
 0x448   : > { %v3050_v2 = vmul.f32 %v3042_v44, %v5370_v52  ;;  %v3072_v27 = vrot.slane %v3042_v44, %v4787_v61  ;;  %v3794_v28 = vpop.f32.mrf.mxu0  ;;  %v2586_v45 = vadd.f32 %v3681_v0, %v5076_v30  ;;  %v2838_v10 = vadd.f32 %v2837_v16, %v5446_v31 }
 0x449   : > { %v3011_v35 = vsub.f32 %v2995_v4, %v3003_v34  ;;  %v3683_v38 = vpop.f32.mrf.mxu1  ;;  %v2896_v41 = vmul.f32 %v5446_v31, %v5446_v31 }
 0x44a   : > { %v3058_v21 = vsub.f32 %v5400_v7, %v3050_v2  ;;  %v3101_v9 = vmul.f32 %v3072_v27, %v5342_v43  ;;  %v3795_v60 = vpop.f32.mrf.mxu0  ;;  %v3102_v52 = vmul.f32 %v3072_v27, %v5340_v20  ;;  %v3103_v63 = vmul.f32 %v3072_v27, %v5351_v58 }
 0x44b   : > { %v3019_v1 = vmax.f32 %v3011_v35, 0.0  ;;  %v3104_v26 = vmul.f32 %v3072_v27, %v5359_v55  ;;  %v3684_v43 = vadd.f32 %v3683_v38, %v3682_v13  ;;  %v3685_v40 = vpop.f32.mrf.mxu1  ;;  %v2839_v20 = vrot.slane %v2838_v10, 4 }
 0x44c   : > { %v3136_v33 = vrot.slane %v3058_v21, %v4787_v61  ;;  %v3797_v30 = vpop.f32.mrf.mxu0  ;;  %v2942_v48 = vadd.f32 %v2941_v47, %v2896_v41  ;;  %v5463_v2 = vadd.f32 %v3793_v25, %v2586_v45  ;;  %v3796_v22 = vadd.f32 %v3795_v60, %v3794_v28 }
 0x44d   : > { %v3027_v44 = vadd.f32 1e-05, %v3019_v1  ;;  %v3686_v58 = vpop.f32.mrf.mxu1  ;;  %v2840_v55 = vadd.f32 %v2839_v20, %v2838_v10  ;;  %v2589_v27 = vadd.f32 %v3684_v43, %v5078_v23 }
 0x44e   : > { %v3165_v17 = vadd.f32 %v3136_v33, %v3101_v9  ;;  %v3166_v36 = vadd.f32 %v3136_v33, %v3102_v52  ;;  %v3167_v4 = vadd.f32 %v3136_v33, %v3103_v63  ;;  %v3168_v34 = vadd.f32 %v3136_v33, %v3104_v26  ;;  %v3798_v11 = vpop.f32.mrf.mxu0 }
 0x44f   : > { %4155 = vrsqrt.f32 %v3027_v44  ;;  %v2943_v0 = vrot.slane %v2942_v48, 4  ;;  %v3687_v13 = vadd.f32 %v3686_v58, %v3685_v40  ;;  %v3688_v46 = vpop.f32.mrf.mxu1  ;;  %v2841_v35 = vrot.slane %v2840_v55, 2 }
 0x450   : > { %3197 = vst [vmem:[%s5417_s12 + $0x20] sm:$0xff] %v3165_v17  ;;  %3198 = vst [vmem:[%s5417_s12 + $0x28] sm:$0xff] %v3166_v36  ;;  %v3800_v51 = vpop.f32.mrf.mxu0  ;;  %v5466_v21 = vadd.f32 %v3796_v22, %v2589_v27  ;;  %v3799_v47 = vadd.f32 %v3798_v11, %v3797_v30  ;;  %v2897_v45 = vmul.f32 %v5463_v2, %v5463_v2 }
 0x451   : > { %3199 = vst [vmem:[%s5417_s12 + $0x30] sm:$0xff] %v3167_v4  ;;  %3200 = vst [vmem:[%s5417_s12 + $0x38] sm:$0xff] %v3168_v34  ;;  %v2944_v16 = vadd.f32 %v2943_v0, %v2942_v48  ;;  %v2594_v9 = vadd.f32 %v3687_v13, %v5093_v49  ;;  %v3689_v38 = vpop.f32.mrf.mxu1  ;;  %v2842_v1 = vadd.f32 %v2841_v35, %v2840_v55 }
 0x452   : > { %v3801_v52 = vpop.f32.mrf.mxu0  ;;  %v3690_v41 = vadd.f32 %v3689_v38, %v3688_v46  ;;  %v2898_v23 = vmul.f32 %v5466_v21, %v5466_v21  ;;  %v2845_v49 = vadd.f32 %v5466_v21, %v5463_v2 }
 0x453   : > { %v2945_v10 = vrot.slane %v2944_v16, 2  ;;  %v5473_v28 = vadd.f32 %v3799_v47, %v2594_v9  ;;  %v3802_v60 = vadd.f32 %v3801_v52, %v3800_v51  ;;  %v3691_v63 = vpop.f32.mrf.mxu1  ;;  %v2843_v33 = vrot.slane %v2842_v1, 1 }
 0x454   : > { %v3803_v26 = vpop.f32.mrf.mxu0  ;;  %v2597_v40 = vadd.f32 %v3690_v41, %v5095_v56  ;;  %v2949_v30 = vadd.f32 %v2898_v23, %v2897_v45 }
 0x455   : > { %v2946_v43 = vadd.f32 %v2945_v10, %v2944_v16  ;;  %v2899_v44 = vmul.f32 %v5473_v28, %v5473_v28  ;;  %v3692_v20 = vpop.f32.mrf.mxu1  ;;  %v2844_v25 = vadd.f32 %v2843_v33, %v2842_v1  ;;  %v2846_v36 = vadd.f32 %v2845_v49, %v5473_v28 }
 0x456   : > { %v3804_v48 = vpop.f32.mrf.mxu0  ;;  %v5481_v4 = vadd.f32 %v3802_v60, %v2597_v40  ;;  %v3693_v58 = vadd.f32 %v3692_v20, %v3691_v63 }
 0x457   : > { %v2947_v17 = vrot.slane %v2946_v43, 1  ;;  %v2950_v34 = vadd.f32 %v2949_v30, %v2899_v44  ;;  %v3694_v11 = vpop.f32.mrf.mxu1  ;;  %v5483_v27 = vmul.f32 0.03125, %v2844_v25  ;;  %v3805_v63 = vadd.f32 %v3804_v48, %v3803_v26 }
 0x458   : > { %v3806_v55 = vpop.f32.mrf.mxu0  ;;  %v2847_v56 = vadd.f32 %v2846_v36, %v5481_v4  ;;  %v2900_v22 = vmul.f32 %v5481_v4, %v5481_v4  ;;  %v2602_v38 = vadd.f32 %v3693_v58, %v5103_v53 }
 0x459   : > { %v2948_v0 = vadd.f32 %v2947_v17, %v2946_v43  ;;  %v3695_v13 = vpop.f32.mrf.mxu1  ;;  %v3004_v35 = vmul.f32 %v5483_v27, %v5483_v27 }
 0x45a   : > { %v3807_v46 = vpop.f32.mrf.mxu0  ;;  %v2848_v16 = vrot.slane %v2847_v56, 4  ;;  %v2951_v9 = vadd.f32 %v2950_v34, %v2900_v22  ;;  %v3696_v52 = vadd.f32 %v3695_v13, %v3694_v11  ;;  %v5495_v17 = vadd.f32 %v3805_v63, %v2602_v38 }
 0x45b   : > { %v2996_v51 = vmul.f32 0.03125, %v2948_v0  ;;  %v3697_v1 = vpop.f32.mrf.mxu1  ;;  %v3808_v43 = vadd.f32 %v3807_v46, %v3806_v55 }
 0x45c   : > { %v4156_v47 = vpop.eup %4155  ;;  %v3809_v10 = vpop.f32.mrf.mxu0  ;;  %v2849_v23 = vadd.f32 %v2848_v16, %v2847_v56  ;;  %v2952_v60 = vrot.slane %v2951_v9, 4  ;;  %v2605_v33 = vadd.f32 %v3696_v52, %v5105_v3 }
 0x45d   : > { %v3043_v41 = vmul.f32 %v4156_v47, %v5386_v29  ;;  %v3012_v45 = vsub.f32 %v2996_v51, %v3004_v35  ;;  %v3698_v49 = vpop.f32.mrf.mxu1 }
 0x45e   : > { %v3810_v40 = vpop.f32.mrf.mxu0  ;;  %v2850_v53 = vrot.slane %v2849_v23, 2  ;;  %v2953_v25 = vadd.f32 %v2952_v60, %v2951_v9  ;;  %v5497_v36 = vadd.f32 %v3808_v43, %v2605_v33  ;;  %v3699_v34 = vadd.f32 %v3698_v49, %v3697_v1 }
 0x45f   : > { %v3051_v30 = vmul.f32 %v3043_v41, %v5432_v12  ;;  %v3076_v44 = vrot.slane %v3043_v41, %v4787_v61  ;;  %v3020_v20 = vmax.f32 %v3012_v45, 0.0  ;;  %v3700_v58 = vpop.f32.mrf.mxu1  ;;  %v3811_v55 = vadd.f32 %v3810_v40, %v3809_v10 }
 0x460   : > { %v3812_v11 = vpop.f32.mrf.mxu0  ;;  %v2851_v56 = vadd.f32 %v2850_v53, %v2849_v23  ;;  %v2954_v22 = vrot.slane %v2953_v25, 2  ;;  %v2902_v16 = vmul.f32 %v5497_v36, %v5497_v36  ;;  %v2610_v9 = vadd.f32 %v3699_v34, %v5117_v19 }
 0x461   : > { %v3059_v26 = vsub.f32 %v5400_v7, %v3051_v30  ;;  %v3105_v3 = vmul.f32 %v3076_v44, %v5372_v32  ;;  %v3106_v48 = vmul.f32 %v3076_v44, %v5368_v59  ;;  %v3107_v12 = vmul.f32 %v3076_v44, %v5379_v18  ;;  %v3701_v13 = vpop.f32.mrf.mxu1 }
 0x462   : > { %v3028_v0 = vadd.f32 1e-05, %v3020_v20  ;;  %v3813_v46 = vpop.f32.mrf.mxu0  ;;  %v3108_v51 = vmul.f32 %v3076_v44, %v5394_v54  ;;  %v2852_v59 = vrot.slane %v2851_v56, 1  ;;  %v2955_v32 = vadd.f32 %v2954_v22, %v2953_v25 }
 0x463   : > { %v3140_v35 = vrot.slane %v3059_v26, %v4787_v61  ;;  %v3702_v18 = vadd.f32 %v3701_v13, %v3700_v58  ;;  %v3703_v47 = vpop.f32.mrf.mxu1  ;;  %v2901_v23 = vmul.f32 %v5495_v17, %v5495_v17  ;;  %v5510_v19 = vadd.f32 %v3811_v55, %v2610_v9 }
 0x464   : > { %4157 = vrsqrt.f32 %v3028_v0  ;;  %v3815_v38 = vpop.f32.mrf.mxu0  ;;  %v2853_v41 = vadd.f32 %v2852_v59, %v2851_v56  ;;  %v2956_v45 = vrot.slane %v2955_v32, 1  ;;  %v2854_v33 = vadd.f32 %v5497_v36, %v5495_v17 }
 0x465   : > { %v3169_v52 = vadd.f32 %v3140_v35, %v3105_v3  ;;  %v3170_v1 = vadd.f32 %v3140_v35, %v3106_v48  ;;  %v3171_v54 = vadd.f32 %v3140_v35, %v3107_v12  ;;  %v3172_v10 = vadd.f32 %v3140_v35, %v3108_v51  ;;  %v3704_v60 = vpop.f32.mrf.mxu1 }
 0x466   : > { %v3816_v63 = vpop.f32.mrf.mxu0  ;;  %v2613_v43 = vadd.f32 %v3702_v18, %v5119_v50  ;;  %v3814_v49 = vadd.f32 %v3813_v46, %v3812_v11  ;;  %v3705_v40 = vadd.f32 %v3704_v60, %v3703_v47  ;;  %v2957_v30 = vadd.f32 %v2956_v45, %v2955_v32 }
 0x467   : > { %3201 = vst [vmem:[%s5417_s12 + $0x40] sm:$0xff] %v3169_v52  ;;  %3202 = vst [vmem:[%s5417_s12 + $0x48] sm:$0xff] %v3170_v1  ;;  %v5519_v44 = vmul.f32 0.03125, %v2853_v41  ;;  %v2903_v20 = vmul.f32 %v5510_v19, %v5510_v19  ;;  %v3706_v53 = vpop.f32.mrf.mxu1  ;;  %v2958_v34 = vadd.f32 %v2902_v16, %v2901_v23  ;;  %v2855_v58 = vadd.f32 %v2854_v33, %v5510_v19 }
 0x468   : > { %3203 = vst [vmem:[%s5417_s12 + $0x50] sm:$0xff] %v3171_v54  ;;  %3204 = vst [vmem:[%s5417_s12 + $0x58] sm:$0xff] %v3172_v10  ;;  %v3818_v25 = vpop.f32.mrf.mxu0  ;;  %v5524_v26 = vadd.f32 %v3814_v49, %v2613_v43  ;;  %v2997_v3 = vmul.f32 0.03125, %v2957_v30  ;;  %v2618_v50 = vadd.f32 %v3705_v40, %v5130_v5  ;;  %v3817_v9 = vadd.f32 %v3816_v63, %v3815_v38 }
 0x469   : > { %v3005_v48 = vmul.f32 %v5519_v44, %v5519_v44  ;;  %v3707_v11 = vpop.f32.mrf.mxu1  ;;  %v2959_v12 = vadd.f32 %v2958_v34, %v2903_v20 }
 0x46a   : > { %v3819_v55 = vpop.f32.mrf.mxu0  ;;  %v2856_v0 = vadd.f32 %v2855_v58, %v5524_v26  ;;  %v2904_v56 = vmul.f32 %v5524_v26, %v5524_v26  ;;  %v3708_v22 = vadd.f32 %v3707_v11, %v3706_v53  ;;  %v5533_v54 = vadd.f32 %v3817_v9, %v2618_v50 }
 0x46b   : > { %v3013_v13 = vsub.f32 %v2997_v3, %v3005_v48  ;;  %v3709_v46 = vpop.f32.mrf.mxu1  ;;  %v3820_v18 = vadd.f32 %v3819_v55, %v3818_v25 }
 0x46c   : > { %v3821_v51 = vpop.f32.mrf.mxu0  ;;  %v2857_v35 = vrot.slane %v2856_v0, 4  ;;  %v2960_v16 = vadd.f32 %v2959_v12, %v2904_v56  ;;  %v2621_v59 = vadd.f32 %v3708_v22, %v5132_v57  ;;  %v2905_v25 = vmul.f32 %v5533_v54, %v5533_v54 }
 0x46d   : > { %v3021_v32 = vmax.f32 %v3013_v13, 0.0  ;;  %v3710_v5 = vpop.f32.mrf.mxu1 }
 0x46e   : > { %v3822_v47 = vpop.f32.mrf.mxu0  ;;  %v2858_v52 = vadd.f32 %v2857_v35, %v2856_v0  ;;  %v2961_v1 = vrot.slane %v2960_v16, 4  ;;  %v3711_v10 = vadd.f32 %v3710_v5, %v3709_v46  ;;  %v5535_v45 = vadd.f32 %v3820_v18, %v2621_v59 }
 0x46f   : > { %v3029_v41 = vadd.f32 1e-05, %v3021_v32  ;;  %v3712_v23 = vpop.f32.mrf.mxu1  ;;  %v3823_v63 = vadd.f32 %v3822_v47, %v3821_v51 }
 0x470   : > { %v3824_v60 = vpop.f32.mrf.mxu0  ;;  %v2859_v43 = vrot.slane %v2858_v52, 2  ;;  %v2962_v49 = vadd.f32 %v2961_v1, %v2960_v16  ;;  %v2626_v57 = vadd.f32 %v3711_v10, %v5142_v42  ;;  %v2863_v48 = vadd.f32 %v5535_v45, %v5533_v54 }
 0x471   : > { %v4158_v33 = vpop.eup %4157  ;;  %4159 = vrsqrt.f32 %v3029_v41  ;;  %v3713_v40 = vpop.f32.mrf.mxu1  ;;  %v2906_v0 = vmul.f32 %v5535_v45, %v5535_v45 }
 0x472   : > { %v3044_v38 = vmul.f32 %v4158_v33, %v5386_v29  ;;  %v3825_v30 = vpop.f32.mrf.mxu0  ;;  %v2860_v20 = vadd.f32 %v2859_v43, %v2858_v52  ;;  %v2963_v53 = vrot.slane %v2962_v49, 2  ;;  %v3714_v34 = vadd.f32 %v3713_v40, %v3712_v23 }
 0x473   : > { %v5545_v50 = vadd.f32 %v3823_v63, %v2626_v57  ;;  %v3715_v11 = vpop.f32.mrf.mxu1  ;;  %v3826_v46 = vadd.f32 %v3825_v30, %v3824_v60 }
 0x474   : > { %v3052_v58 = vmul.f32 %v3044_v38, %v5483_v27  ;;  %v3080_v3 = vrot.slane %v3044_v38, %v4787_v61  ;;  %v3827_v42 = vpop.f32.mrf.mxu0  ;;  %v2861_v55 = vrot.slane %v2860_v20, 1  ;;  %v2964_v12 = vadd.f32 %v2963_v53, %v2962_v49 }
 0x475   : > { %v2629_v56 = vadd.f32 %v3714_v34, %v5144_v8  ;;  %v3716_v51 = vpop.f32.mrf.mxu1  ;;  %v2907_v8 = vmul.f32 %v5545_v50, %v5545_v50  ;;  %v2864_v1 = vadd.f32 %v2863_v48, %v5545_v50 }
 0x476   : > { %v3060_v22 = vsub.f32 %v5400_v7, %v3052_v58  ;;  %v3109_v27 = vmul.f32 %v3080_v3, %v5423_v24  ;;  %v3110_v13 = vmul.f32 %v3080_v3, %v5425_v6  ;;  %v3828_v35 = vpop.f32.mrf.mxu0  ;;  %v3111_v16 = vmul.f32 %v3080_v3, %v5430_v39 }
 0x477   : > { %v3112_v9 = vmul.f32 %v3080_v3, %v5446_v31  ;;  %v2862_v59 = vadd.f32 %v2861_v55, %v2860_v20  ;;  %v2965_v32 = vrot.slane %v2964_v12, 1  ;;  %v5558_v5 = vadd.f32 %v3826_v46, %v2629_v56  ;;  %v3718_v24 = vpop.f32.mrf.mxu1 }
 0x478   : > { %v3144_v18 = vrot.slane %v3060_v22, %v4787_v61  ;;  %v3717_v47 = vadd.f32 %v3716_v51, %v3715_v11  ;;  %v3830_v6 = vpop.f32.mrf.mxu0  ;;  %v2967_v31 = vadd.f32 %v2906_v0, %v2905_v25  ;;  %v3829_v48 = vadd.f32 %v3828_v35, %v3827_v42 }
 0x479   : > { %v2966_v52 = vadd.f32 %v2965_v32, %v2964_v12  ;;  %v5560_v39 = vmul.f32 0.03125, %v2862_v59  ;;  %v3719_v33 = vpop.f32.mrf.mxu1  ;;  %v2865_v57 = vadd.f32 %v2864_v1, %v5558_v5  ;;  %v2908_v40 = vmul.f32 %v5558_v5, %v5558_v5 }
 0x47a   : > { %v3173_v10 = vadd.f32 %v3144_v18, %v3109_v27  ;;  %v3174_v41 = vadd.f32 %v3144_v18, %v3110_v13  ;;  %v3175_v23 = vadd.f32 %v3144_v18, %v3111_v16  ;;  %v3176_v60 = vadd.f32 %v3144_v18, %v3112_v9  ;;  %v3831_v43 = vpop.f32.mrf.mxu0 }
 0x47b   : > { %v2998_v49 = vmul.f32 0.03125, %v2966_v52  ;;  %v3006_v38 = vmul.f32 %v5560_v39, %v5560_v39  ;;  %v2968_v63 = vadd.f32 %v2967_v31, %v2907_v8  ;;  %v2634_v30 = vadd.f32 %v3717_v47, %v5155_v37  ;;  %v3721_v53 = vpop.f32.mrf.mxu1 }
 0x47c   : > { %3205 = vst [vmem:[%s5417_s12 + $0x60] sm:$0xff] %v3173_v10  ;;  %3206 = vst [vmem:[%s5417_s12 + $0x68] sm:$0xff] %v3174_v41  ;;  %v3720_v20 = vadd.f32 %v3719_v33, %v3718_v24  ;;  %v3833_v25 = vpop.f32.mrf.mxu0  ;;  %v2866_v58 = vrot.slane %v2865_v57, 4  ;;  %v3832_v55 = vadd.f32 %v3831_v43, %v3830_v6 }
 0x47d   : > { %3207 = vst [vmem:[%s5417_s12 + $0x70] sm:$0xff] %v3175_v23  ;;  %3208 = vst [vmem:[%s5417_s12 + $0x78] sm:$0xff] %v3176_v60  ;;  %v3014_v34 = vsub.f32 %v2998_v49, %v3006_v38  ;;  %v2969_v3 = vadd.f32 %v2968_v63, %v2908_v40  ;;  %v3722_v12 = vpop.f32.mrf.mxu1  ;;  %v5575_v37 = vadd.f32 %v3829_v48, %v2634_v30 }
 0x47e   : > { %v2637_v11 = vadd.f32 %v3720_v20, %v5157_v14  ;;  %v3834_v0 = vpop.f32.mrf.mxu0  ;;  %v4160_v56 = vpop.eup %4159  ;;  %v2867_v27 = vadd.f32 %v2866_v58, %v2865_v57  ;;  %v3723_v13 = vadd.f32 %v3722_v12, %v3721_v53 }
 0x47f   : > { %v3022_v22 = vmax.f32 %v3014_v34, 0.0  ;;  %v3045_v46 = vmul.f32 %v4160_v56, %v5386_v29  ;;  %v2970_v51 = vrot.slane %v2969_v3, 4  ;;  %v3724_v9 = vpop.f32.mrf.mxu1  ;;  %v3835_v14 = vadd.f32 %v3834_v0, %v3833_v25 }
 0x480   : > { %v5577_v16 = vadd.f32 %v3832_v55, %v2637_v11  ;;  %v2868_v32 = vrot.slane %v2867_v27, 2  ;;  %v2642_v42 = vadd.f32 %v3723_v13, %v5165_v15  ;;  %v3836_v47 = vpop.f32.mrf.mxu0  ;;  %v2909_v1 = vmul.f32 %v5575_v37, %v5575_v37 }
 0x481   : > { %v3030_v59 = vadd.f32 1e-05, %v3022_v22  ;;  %v3053_v35 = vmul.f32 %v3045_v46, %v5519_v44  ;;  %v3084_v18 = vrot.slane %v3045_v46, %v4787_v61  ;;  %v2971_v8 = vadd.f32 %v2970_v51, %v2969_v3  ;;  %v3725_v52 = vpop.f32.mrf.mxu1 }
 0x482   : > { %v2869_v24 = vadd.f32 %v2868_v32, %v2867_v27  ;;  %v5582_v6 = vadd.f32 %v3835_v14, %v2642_v42  ;;  %v2910_v15 = vmul.f32 %v5577_v16, %v5577_v16  ;;  %v3726_v49 = vadd.f32 %v3725_v52, %v3724_v9  ;;  %v3837_v38 = vpop.f32.mrf.mxu0 }
 0x483   : > { %4161 = vrsqrt.f32 %v3030_v59  ;;  %v3061_v31 = vsub.f32 %v5400_v7, %v3053_v35  ;;  %v3113_v10 = vmul.f32 %v3084_v18, %v5463_v2  ;;  %v3114_v44 = vmul.f32 %v3084_v18, %v5466_v21 }
 0x484   : > { %v2870_v41 = vrot.slane %v2869_v24, 1  ;;  %v2972_v23 = vrot.slane %v2971_v8, 2  ;;  %v3115_v60 = vmul.f32 %v3084_v18, %v5473_v28  ;;  %v3116_v33 = vmul.f32 %v3084_v18, %v5481_v4 }
 0x485   : > { %v3148_v43 = vrot.slane %v3061_v31, %v4787_v61  ;;  %v2872_v2 = vadd.f32 %v5577_v16, %v5575_v37  ;;  %v2911_v21 = vmul.f32 %v5582_v6, %v5582_v6  ;;  %v2645_v25 = vadd.f32 %v3726_v49, %v5167_v62 }
 0x486   : > { %v2871_v57 = vadd.f32 %v2870_v41, %v2869_v24  ;;  %v2973_v63 = vadd.f32 %v2972_v23, %v2971_v8  ;;  %v3838_v34 = vadd.f32 %v3837_v38, %v3836_v47  ;;  %v2976_v58 = vadd.f32 %v2910_v15, %v2909_v1 }
 0x487   : > { %v3177_v40 = vadd.f32 %v3148_v43, %v3113_v10  ;;  %v3178_v28 = vadd.f32 %v3148_v43, %v3114_v44  ;;  %v3179_v30 = vadd.f32 %v3148_v43, %v3115_v60  ;;  %v3180_v4 = vadd.f32 %v3148_v43, %v3116_v33 }
 0x488   : > { %v2974_v20 = vrot.slane %v2973_v63, 1  ;;  %v2991_v53 = vmul.f32 0.03125, %v2871_v57  ;;  %v2873_v11 = vadd.f32 %v2872_v2, %v5582_v6  ;;  %v5604_v55 = vadd.f32 %v3838_v34, %v2645_v25 }
 0x489   : > { %3209 = vst [vmem:[%s5417_s12 + $0x80] sm:$0xff] %v3177_v40  ;;  %3210 = vst [vmem:[%s5417_s12 + $0x88] sm:$0xff] %v3178_v28  ;;  %v2977_v0 = vadd.f32 %v2976_v58, %v2911_v21 }
 0x48a   : > { %3211 = vst [vmem:[%s5417_s12 + $0x90] sm:$0xff] %v3179_v30  ;;  %3212 = vst [vmem:[%s5417_s12 + $0x98] sm:$0xff] %v3180_v4  ;;  %v2975_v3 = vadd.f32 %v2974_v20, %v2973_v63  ;;  %v3007_v48 = vmul.f32 %v2991_v53, %v2991_v53  ;;  %v2874_v56 = vadd.f32 %v2873_v11, %v5604_v55 }
 0x48b   : > { %v2912_v22 = vmul.f32 %v5604_v55, %v5604_v55 }
 0x48c   : > { %v2999_v12 = vmul.f32 0.03125, %v2975_v3  ;;  %v2875_v27 = vrot.slane %v2874_v56, 4 }
 0x48d   : > { %v2978_v13 = vadd.f32 %v2977_v0, %v2912_v22 }
 0x48e   : > { %v3015_v62 = vsub.f32 %v2999_v12, %v3007_v48  ;;  %v2876_v59 = vadd.f32 %v2875_v27, %v2874_v56 }
 0x48f   : > { %v2979_v32 = vrot.slane %v2978_v13, 4 }
 0x490   : > { %v4162_v46 = vpop.eup %4161  ;;  %v3023_v9 = vmax.f32 %v3015_v62, 0.0  ;;  %v2877_v18 = vrot.slane %v2876_v59, 2 }
 0x491   : > { %v3046_v51 = vmul.f32 %v4162_v46, %v5386_v29  ;;  %v2980_v8 = vadd.f32 %v2979_v32, %v2978_v13 }
 0x492   : > { %v3031_v35 = vadd.f32 1e-05, %v3023_v9  ;;  %v2878_v52 = vadd.f32 %v2877_v18, %v2876_v59 }
 0x493   : > { %v3054_v42 = vmul.f32 %v3046_v51, %v5560_v39  ;;  %v3088_v14 = vrot.slane %v3046_v51, %v4787_v61  ;;  %v2981_v31 = vrot.slane %v2980_v8, 2 }
 0x494   : > { %4163 = vrsqrt.f32 %v3031_v35  ;;  %v2879_v44 = vrot.slane %v2878_v52, 1 }
 0x495   : > { %v3062_v47 = vsub.f32 %v5400_v7, %v3054_v42  ;;  %v3117_v24 = vmul.f32 %v3088_v14, %v5495_v17  ;;  %v3118_v1 = vmul.f32 %v3088_v14, %v5497_v36  ;;  %v3119_v39 = vmul.f32 %v3088_v14, %v5510_v19 }
 0x496   : > { %v3120_v15 = vmul.f32 %v3088_v14, %v5524_v26  ;;  %v2982_v41 = vadd.f32 %v2981_v31, %v2980_v8  ;;  %v2880_v43 = vadd.f32 %v2879_v44, %v2878_v52 }
 0x497   : > { %v3152_v10 = vrot.slane %v3062_v47, %v4787_v61 }
 0x498   : > { %v2983_v49 = vrot.slane %v2982_v41, 1  ;;  %v2992_v36 = vmul.f32 0.03125, %v2880_v43 }
 0x499   : > { %v3181_v23 = vadd.f32 %v3152_v10, %v3117_v24  ;;  %v3182_v60 = vadd.f32 %v3152_v10, %v3118_v1  ;;  %v3183_v17 = vadd.f32 %v3152_v10, %v3119_v39  ;;  %v3184_v33 = vadd.f32 %v3152_v10, %v3120_v15 }
 0x49a   : > { %v2984_v38 = vadd.f32 %v2983_v49, %v2982_v41  ;;  %v3008_v19 = vmul.f32 %v2992_v36, %v2992_v36 }
 0x49b   : > { %3213 = vst [vmem:[%s5417_s12 + $0xa0] sm:$0xff] %v3181_v23  ;;  %3214 = vst [vmem:[%s5417_s12 + $0xa8] sm:$0xff] %v3182_v60 }
 0x49c   : > { %3215 = vst [vmem:[%s5417_s12 + $0xb0] sm:$0xff] %v3183_v17  ;;  %3216 = vst [vmem:[%s5417_s12 + $0xb8] sm:$0xff] %v3184_v33  ;;  %v3000_v57 = vmul.f32 0.03125, %v2984_v38 }
 0x49e   : > { %v3016_v63 = vsub.f32 %v3000_v57, %v3008_v19 }
 0x4a0   : > { %v3024_v26 = vmax.f32 %v3016_v63, 0.0 }
 0x4a1   : > { %v4164_v2 = vpop.eup %4163 }
 0x4a2   : > { %v3047_v21 = vmul.f32 %v4164_v2, %v5386_v29  ;;  %v3032_v40 = vadd.f32 1e-05, %v3024_v26 }
 0x4a4   : > { %v3055_v28 = vmul.f32 %v3047_v21, %v2991_v53  ;;  %v3092_v30 = vrot.slane %v3047_v21, %v4787_v61  ;;  %4165 = vrsqrt.f32 %v3032_v40 }
 0x4a6   : > { %v3063_v4 = vsub.f32 %v5400_v7, %v3055_v28  ;;  %v3121_v20 = vmul.f32 %v3092_v30, %v5533_v54  ;;  %v3122_v25 = vmul.f32 %v3092_v30, %v5535_v45  ;;  %v3123_v34 = vmul.f32 %v3092_v30, %v5545_v50 }
 0x4a7   : > { %v3124_v58 = vmul.f32 %v3092_v30, %v5558_v5 }
 0x4a8   : > { %v3156_v3 = vrot.slane %v3063_v4, %v4787_v61 }
 0x4aa   : > { %v3185_v48 = vadd.f32 %v3156_v3, %v3121_v20  ;;  %v3186_v53 = vadd.f32 %v3156_v3, %v3122_v25  ;;  %v3187_v11 = vadd.f32 %v3156_v3, %v3123_v34  ;;  %v3188_v12 = vadd.f32 %v3156_v3, %v3124_v58 }
 0x4ac   : > { %3217 = vst [vmem:[%s5417_s12 + $0xc0] sm:$0xff] %v3185_v48  ;;  %3218 = vst [vmem:[%s5417_s12 + $0xc8] sm:$0xff] %v3186_v53 }
 0x4ad   : > { %3219 = vst [vmem:[%s5417_s12 + $0xd0] sm:$0xff] %v3187_v11  ;;  %3220 = vst [vmem:[%s5417_s12 + $0xd8] sm:$0xff] %v3188_v12 }
 0x4b1   : > { %v4166_v0 = vpop.eup %4165 }
 0x4b2   : > { %v3048_v54 = vmul.f32 %v4166_v0, %v5386_v29 }
 0x4b4   : > { %v3056_v45 = vmul.f32 %v3048_v54, %v2992_v36  ;;  %v3096_v50 = vrot.slane %v3048_v54, %v4787_v61 }
 0x4b6   : > { %v3064_v5 = vsub.f32 %v5400_v7, %v3056_v45  ;;  %v3125_v56 = vmul.f32 %v3096_v50, %v5575_v37  ;;  %v3126_v22 = vmul.f32 %v3096_v50, %v5577_v16  ;;  %v3127_v62 = vmul.f32 %v3096_v50, %v5582_v6 }
 0x4b7   : > { %v3128_v29 = vmul.f32 %v3096_v50, %v5604_v55 }
 0x4b8   : > { %v3160_v27 = vrot.slane %v3064_v5, %v4787_v61 }
 0x4ba   : > { %v3189_v7 = vadd.f32 %v3160_v27, %v3125_v56  ;;  %v3190_v37 = vadd.f32 %v3160_v27, %v3126_v22  ;;  %v3191_v16 = vadd.f32 %v3160_v27, %v3127_v62  ;;  %v3192_v13 = vadd.f32 %v3160_v27, %v3128_v29 }
 0x4bc   : > { %3221 = vst [vmem:[%s5417_s12 + $0xe0] sm:$0xff] %v3189_v7  ;;  %3222 = vst [vmem:[%s5417_s12 + $0xe8] sm:$0xff] %v3190_v37 }
 0x4bd   : > { %3223 = vst [vmem:[%s5417_s12 + $0xf0] sm:$0xff] %v3191_v16  ;;  %3224 = vst [vmem:[%s5417_s12 + $0xf8] sm:$0xff] %v3192_v13 }
 0x4be   : > { %4336 = shalt.err (!%p4333_p9)
}
 0x4bf   : > { %s4337_s15 = scalar_lea.hbm %s5647_s29, 4096  ;;  %s4341_s20 = scalar_lea.hbm %s5703_s7, 8192 }
 0x4c0   : > { %p4338_p1 = scmp.ne.s32.totalorder %s5647_s29, %s4337_s15  ;;  %p4342_p8 = scmp.lt.s32.totalorder %s5647_s29, %s5703_s7 }
 0x4c1   : > { %p4343_p5 = scmp.lt.s32.totalorder %s4341_s20, %s4337_s15 }
 0x4c2   : > { %p4339_p4 = pnand %p4338_p1, %p5729_p12 }
 0x4c3   : > { %p4344_p2 = por %p4343_p5, %p4342_p8 }
 0x4c4   : > { %p4340_p6 = pneg %p4339_p4 }
 0x4c6   : > { %p4345_p7 = pnand %p4344_p2, %p4340_p6 }
 0x4c8   : > { %4348 = shalt.err (!%p4345_p7)
}
 0x4c9   : > { %s4410_s9 = smov 128   ;;  %s4411_s22 = smov 8  }
 0x4ca   : > { %3921 = dma.vmem_to_hbm [thread:$0]  (%p5729_p12), %s5649_s30, 4096, %s5647_s29, %s3226_s28, %s4410_s9, %s4410_s9, %s4411_s22  }
 0x4cb PF: > { %s3254_s11 = sand.u32 1, %s4383_s24   ;;  %p5730_p13 = scmp.ne.s32.totalorder %s5714_s8, 0 }
 0x4cc   : > { %p5731_p0 = scmp.ge.s32.totalorder %s4395_s27, 2  ;;  %s3255_s21 = scalar_lea.sflag [#allocation4], %s3254_s11 }
 0x4ce   : > { %p3941_p10 = pnand %p5731_p0, %p5730_p13 }
 0x4d0   : > { %p3942_p3 = pneg %p3941_p10 }
 0x4d2   : > { %4378 = dma.done.wait (%p3942_p3), %s3255_s21, 4096  }
 0x4d3   : > { %4380 = vsyncadd (%p3942_p3), %s3255_s21, 4294963200  ;;  %p22_p11 = scmp.ge.s32.totalorder %s4543_s10, 4   ;;  %s5732_s24 = smov %s4387_s25 }
 0x4d4   : > { %s5733_s25 = smov %s4391_s26  ;;  %s5734_s26 = smov %s4559_s14 }
 0x4d5   : > { %s5735_s27 = smov %s4543_s10  ;;  %24 = sbr.rel (!%p22_p11) target bundleno = 9 (0x9), region = 109 }
 0x4da   :  { %3260 = vsyncpa [#allocation3], 1 }
 0x4db   :  { %3262 = vsyncpa [#allocation3 + $0x1], 1 }
 0x4dc   :  { %3263 = vsyncpa [#allocation6], 1 }
 0x4dd   :  { %3264 = vsyncpa [#allocation9], 1 }
 0x4de   :  { %3265 = vsyncpa [#allocation4], 1 }
 0x4df   :  { %3267 = vsyncpa [#allocation4 + $0x1], 1 }

</bundles_post_ra>
